<compile_context>
chip_gen: v6e
topology: v6e:2x2x1
jax: 0.10.0
libtpu: 0.0.40
codegen_flags: <defaults>
</compile_context>

<pallas_src>
import jax
import jax.numpy as jnp
from jax import lax
from jax.experimental import pallas as pl
from jax.experimental.pallas import tpu as pltpu


# ----------------------------- kernel ---------------------------------------


def seq2seq_kernel(
    xproj_ref,     # [S*Bp, 4Hp] f32 VMEM  encoder input proj (bias folded), time-major
    gates_tf_ref,  # [T, Bp, 4Hp] f32 VMEM teacher-forced decoder input-gate contributions
    tf_ref,        # [T]         int32 SMEM teacher-forcing flags
    e_whh_ref,     # [Hp, 4Hp]   encoder W_hh^T (gate-block padded, zero pad rows)
    d_whh_ref,     # [Hp, 4Hp]   decoder W_hh^T
    dec_m_ref,     # [Vp, 4Hp]   emb @ W_ih^T + b (vocab-row indexed; greedy path only)
    fc_w_ref,      # [Hp, Vp]    output proj W^T (zero pad rows/cols)
    fc_b_ref,      # [1, Vp]     output proj bias (-1e30 on padded lanes)
    out_ref,       # [T, Bp, Vp] f32 VMEM logits
    ig_ref,        # [Bp, 4Hp]   VMEM scratch: decoder input-path gate contribution
):
    SBp = xproj_ref.shape[0]
    T, Bp, Vp = out_ref.shape
    Hp = e_whh_ref.shape[0]
    S = SBp // Bp

    # Hoisted broadcasts / iota (JAX does not CSE broadcast_in_dim inside loops).
    fc_b = jnp.broadcast_to(fc_b_ref[...], (Bp, Vp))
    iota_v = lax.broadcasted_iota(jnp.int32, (Bp, Vp), 1)

    def lstm_gates(gates, c):
        # 2 full-vreg transcendental pushes; gate slices are 128-lane aligned.
        # PyTorch gate order: i, f, g, o.
        sig = jax.nn.sigmoid(gates)              # [Bp, 4Hp]
        th = jnp.tanh(gates)                     # [Bp, 4Hp]
        i = sig[:, 0 * Hp:1 * Hp]
        f = sig[:, 1 * Hp:2 * Hp]
        g = th[:, 2 * Hp:3 * Hp]
        o = sig[:, 3 * Hp:4 * Hp]
        c_new = f * c + i * g
        h_new = o * jnp.tanh(c_new)
        return h_new, c_new

    # ---------------- Encoder -------------------------------------------------
    h = jnp.zeros((Bp, Hp), jnp.float32)
    c = jnp.zeros((Bp, Hp), jnp.float32)

    for t in range(S):                           # static full unroll (S small)
        gates = xproj_ref[t * Bp:(t + 1) * Bp, :] + jnp.dot(
            h, e_whh_ref[...], preferred_element_type=jnp.float32)
        h, c = lstm_gates(gates, c)

    # ---------------- Decoder -------------------------------------------------
    # First decoder input is always trg[:, 0]  ->  its gate contribution.
    ig_ref[...] = gates_tf_ref[0]

    for t in range(T):                           # static full unroll (T small)
        gates = ig_ref[...] + jnp.dot(
            h, d_whh_ref[...], preferred_element_type=jnp.float32)
        h, c = lstm_gates(gates, c)

        logits = jnp.dot(h, fc_w_ref[...], preferred_element_type=jnp.float32) + fc_b
        out_ref[t] = logits                      # dense (8,128) store

        if t < T - 1:                            # last step's next input is unused
            tf = tf_ref[t]                       # scalar flag from SMEM

            @pl.when(tf == 1)
            def _(t=t):
                # Teacher forcing: next input = trg[:, t]; gate contribution hoisted.
                ig_ref[...] = gates_tf_ref[t]

            @pl.when(tf == 0)
            def _(logits=logits):
                # Greedy decode: argmax (first-max index; padded lanes hold -1e30
                # so they can never win) -> one-hot -> embedding+proj in one matmul.
                maxv = jnp.max(logits, axis=-1, keepdims=True)
                pred = jnp.min(jnp.where(logits >= maxv, iota_v, Vp),
                               axis=-1, keepdims=True)          # [Bp, 1] int32
                pred_oh = (iota_v == pred).astype(jnp.float32)  # [Bp, Vp]
                ig_ref[...] = jnp.dot(pred_oh, dec_m_ref[...],
                                      preferred_element_type=jnp.float32)


# ----------------------------- wrapper ---------------------------------------


def encoder_decoder_forward(params, src, trg, tf_flags):
    """src: [B, S, D] f32, trg: [B, T] int32, tf_flags: [T] int32. Returns [B, T, V]."""
    B, S, D = src.shape
    T = trg.shape[1]
    V = params["emb"].shape[0]
    H = params["e_whh_t"].shape[0]

    Bp = ((max(B, 8) + 7) // 8) * 8              # sublane-pad batch
    Hp = ((max(H, 128) + 127) // 128) * 128      # lane-pad hidden
    Vp = ((max(V, 128) + 127) // 128) * 128      # lane-pad vocab
    H4p = 4 * Hp

    def pad_gate_cols(w):
        # [rows, 4H] -> [rows, 4Hp]; gate k columns placed at [k*Hp : k*Hp + H].
        out = jnp.zeros((w.shape[0], H4p), jnp.float32)
        for k in range(4):
            out = out.at[:, k * Hp:k * Hp + H].set(w[:, k * H:(k + 1) * H])
        return out

    def pad_rows(w, rows_p):
        return jnp.zeros((rows_p,) + w.shape[1:], jnp.float32).at[:w.shape[0]].set(w)

    # --- padded / folded weights (all pad rows & columns are exactly zero) ------
    e_wih_p = pad_gate_cols(params["e_wih_t"])                       # [D, 4Hp]
    e_b_p = pad_gate_cols(params["e_b"])                             # [1, 4Hp]
    e_whh_p = pad_rows(pad_gate_cols(params["e_whh_t"]), Hp)         # [Hp, 4Hp]
    d_whh_p = pad_rows(pad_gate_cols(params["d_whh_t"]), Hp)         # [Hp, 4Hp]

    # Fold decoder embedding + input projection + input bias into one matrix.
    dec_m = jnp.dot(params["emb"], params["d_wih_t"],
                    precision=lax.Precision.HIGHEST) + params["d_b"]  # [V, 4H]
    dec_m_p = pad_rows(pad_gate_cols(dec_m), Vp)                      # [Vp, 4Hp]

    fc_w_p = jnp.zeros((Hp, Vp), jnp.float32).at[:H, :V].set(params["fc_w_t"])
    fc_b_p = jnp.full((1, Vp), -1e30, jnp.float32).at[:, :V].set(params["fc_b"])

    # --- encoder input projection in XLA (off the kernel's serial prologue) ----
    src_tm = jnp.transpose(src, (1, 0, 2)).astype(jnp.float32)        # [S, B, D]
    src_tm = jnp.zeros((S, Bp, D), jnp.float32).at[:, :B].set(src_tm)
    xproj = jnp.dot(src_tm.reshape(S * Bp, D), e_wih_p,
                    precision=lax.Precision.HIGHEST) + e_b_p          # [S*Bp, 4Hp]

    # --- teacher-forced decoder input gate contributions (row gather of dec_m) --
    trg_tm = jnp.transpose(trg, (1, 0)).astype(jnp.int32)             # [T, B]
    gates_tf = dec_m_p[trg_tm]                                        # [T, B, 4Hp]
    gates_tf = jnp.zeros((T, Bp, H4p), jnp.float32).at[:, :B].set(gates_tf)

    tf_flags = tf_flags.astype(jnp.int32)

    vmem = pl.BlockSpec(memory_space=pltpu.MemorySpace.VMEM)
    smem = pl.BlockSpec(memory_space=pltpu.MemorySpace.SMEM)

    cost = pl.CostEstimate(
        flops=int(2 * (S + T) * Bp * Hp * H4p            # h @ W_hh (enc + dec)
                  + 2 * T * Bp * Hp * Vp                  # h @ fc_w
                  + 2 * (T - 1) * Bp * Vp * H4p),         # pred_oh @ dec_m (worst case)
        transcendentals=int((S + T) * Bp * (2 * H4p + Hp)),
        bytes_accessed=int(4 * (S * Bp * H4p + T * Bp * H4p + 2 * Hp * H4p
                                + Vp * H4p + Hp * Vp + Vp + 2 * T * Bp * Vp)),
    )

    out_tbv = pl.pallas_call(
        seq2seq_kernel,
        out_shape=jax.ShapeDtypeStruct((T, Bp, Vp), jnp.float32),
        in_specs=[
            vmem, vmem, smem,            # xproj, gates_tf, tf flags
            vmem, vmem,                  # encoder / decoder W_hh
            vmem,                        # dec_m (greedy path)
            vmem, vmem,                  # output projection (padded)
        ],
        out_specs=vmem,
        scratch_shapes=[pltpu.VMEM((Bp, H4p), jnp.float32)],
        cost_estimate=cost,
    )(xproj, gates_tf, tf_flags, e_whh_p, d_whh_p, dec_m_p, fc_w_p, fc_b_p)

    return jnp.transpose(out_tbv[:, :B, :V], (1, 0, 2))               # [B, T, V]


# ----------------------------- reference (pure JAX) --------------------------


def reference_forward(params, src, trg, tf_flags):
    B, S, D = src.shape
    T = trg.shape[1]
    H = params["e_whh_t"].shape[0]

    def cell(x, h, c, wih_t, whh_t, b):
        gates = x @ wih_t + h @ whh_t + b
        i = jax.nn.sigmoid(gates[:, 0 * H:1 * H])
        f = jax.nn.sigmoid(gates[:, 1 * H:2 * H])
        g = jnp.tanh(gates[:, 2 * H:3 * H])
        o = jax.nn.sigmoid(gates[:, 3 * H:4 * H])
        c = f * c + i * g
        return o * jnp.tanh(c), c

    h = jnp.zeros((B, H), jnp.float32)
    c = jnp.zeros((B, H), jnp.float32)
    for t in range(S):
        h, c = cell(src[:, t, :], h, c,
                    params["e_wih_t"], params["e_whh_t"], params["e_b"])

    outs = []
    inp = trg[:, 0]
    for t in range(T):
        x = params["emb"][inp]                                        # [B, E]
        h, c = cell(x, h, c, params["d_wih_t"], params["d_whh_t"], params["d_b"])
        logits = h @ params["fc_w_t"] + params["fc_b"]
        outs.append(logits)
        pred = jnp.argmax(logits, axis=-1).astype(jnp.int32)
        inp = jnp.where(tf_flags[t] == 1, trg[:, t], pred)
    return jnp.stack(outs, axis=1)                                    # [B, T, V]


# ----------------------------- params / main ----------------------------------


def make_params(key, input_dim, hidden_dim, emb_dim, output_dim):
    ks = jax.random.split(key, 10)
    s = 0.1
    H4 = 4 * hidden_dim
    return {
        # encoder LSTM (weights stored pre-transposed)
        "e_wih_t": s * jax.random.normal(ks[0], (input_dim, H4), jnp.float32),
        "e_whh_t": s * jax.random.normal(ks[1], (hidden_dim, H4), jnp.float32),
        "e_b":     s * jax.random.normal(ks[2], (1, H4), jnp.float32),
        # decoder embedding + LSTM
        "emb":     s * jax.random.normal(ks[3], (output_dim, emb_dim), jnp.float32),
        "d_wih_t": s * jax.random.normal(ks[4], (emb_dim, H4), jnp.float32),
        "d_whh_t": s * jax.random.normal(ks[5], (hidden_dim, H4), jnp.float32),
        "d_b":     s * jax.random.normal(ks[6], (1, H4), jnp.float32),
        # decoder output projection
        "fc_w_t":  s * jax.random.normal(ks[7], (hidden_dim, output_dim), jnp.float32),
        "fc_b":    s * jax.random.normal(ks[8], (1, output_dim), jnp.float32),
    }


if __name__ == "__main__":
    B, S, D = 2, 8, 16          # batch, src_seq_len, EEG input_dim
    T, V, H, E = 6, 16, 32, 16  # trg_seq_len, output_dim (vocab), hidden, emb_dim
    teacher_forcing_ratio = 0.5

    key = jax.random.PRNGKey(0)
    k_src, k_trg, k_tf, k_par = jax.random.split(key, 4)

    src = jax.random.normal(k_src, (B, S, D), jnp.float32)
    trg = jax.random.randint(k_trg, (B, T), 0, V, jnp.int32)
    # deterministic replacement for per-step torch.rand(1) < teacher_forcing_ratio
    tf_flags = (jax.random.uniform(k_tf, (T,)) < teacher_forcing_ratio).astype(jnp.int32)

    params = make_params(k_par, D, H, E, V)

    out = encoder_decoder_forward(params, src, trg, tf_flags)
    jax.block_until_ready(out)

    ref = reference_forward(params, src, trg, tf_flags)
    assert out.shape == (B, T, V)
    max_diff = jnp.max(jnp.abs(out - ref))
    assert jnp.allclose(out, ref, atol=3e-3, rtol=3e-3), f"max abs diff = {max_diff}"

    print("KERNEL_OK")
</pallas_src>

<mosaic_0001>
module attributes {stable_mosaic.version = 11 : i64} {
  func.func @seq2seq_kernel(%arg0: memref<64x512xf32, #tpu.memory_space<vmem>>, %arg1: memref<6x8x512xf32, #tpu.memory_space<vmem>>, %arg2: memref<6xi32, #tpu.memory_space<smem>>, %arg3: memref<128x512xf32, #tpu.memory_space<vmem>>, %arg4: memref<128x512xf32, #tpu.memory_space<vmem>>, %arg5: memref<128x512xf32, #tpu.memory_space<vmem>>, %arg6: memref<128x128xf32, #tpu.memory_space<vmem>>, %arg7: memref<1x128xf32, #tpu.memory_space<vmem>>, %arg8: memref<6x8x128xf32, #tpu.memory_space<vmem>>, %arg9: memref<8x512xf32, #tpu.memory_space<vmem>>) attributes {dimension_semantics = [], scalar_prefetch = 0 : i64, scratch_operands = 1 : i64, tpu.core_type = #tpu.core_type<tc>} {
    %c0 = arith.constant 0 : index
    %c0_0 = arith.constant 0 : index
    %0 = vector.load %arg7[%c0, %c0_0] : memref<1x128xf32, #tpu.memory_space<vmem>>, vector<1x128xf32>
    %1 = vector.shape_cast %0 : vector<1x128xf32> to vector<1x128xf32>
    %2 = vector.broadcast %1 : vector<1x128xf32> to vector<8x128xf32>
    %3 = tpu.iota {dimensions = array<i32: 1>} : vector<8x128xi32>
    %cst = arith.constant 0.000000e+00 : f32
    %4 = vector.broadcast %cst : f32 to vector<8x128xf32>
    %cst_1 = arith.constant 0.000000e+00 : f32
    %5 = vector.broadcast %cst_1 : f32 to vector<8x128xf32>
    %c0_2 = arith.constant 0 : index
    %c0_3 = arith.constant 0 : index
    %6 = vector.load %arg0[%c0_2, %c0_3] : memref<64x512xf32, #tpu.memory_space<vmem>>, vector<8x512xf32>
    %c0_4 = arith.constant 0 : index
    %c0_5 = arith.constant 0 : index
    %7 = vector.load %arg3[%c0_4, %c0_5] : memref<128x512xf32, #tpu.memory_space<vmem>>, vector<128x512xf32>
    %cst_6 = arith.constant dense<0.000000e+00> : vector<8x512xf32>
    %8 = tpu.matmul %4, %7, %cst_6 {dimension_numbers = #tpu.dot_dimension_numbers<[1], [0], [0], [1], [0, 0, 1, 1], [], []>} : vector<8x128xf32>, vector<128x512xf32>, vector<8x512xf32> -> vector<8x512xf32>
    %9 = arith.addf %6, %8 : vector<8x512xf32>
    %10 = arith.negf %9 : vector<8x512xf32>
    %11 = math.exp %10 : vector<8x512xf32>
    %cst_7 = arith.constant 1.000000e+00 : f32
    %12 = vector.broadcast %cst_7 : f32 to vector<8x512xf32>
    %13 = arith.addf %12, %11 : vector<8x512xf32>
    %14 = arith.divf %12, %13 : vector<8x512xf32>
    %15 = math.tanh %9 : vector<8x512xf32>
    %16 = vector.extract_strided_slice %14 {offsets = [0, 0], sizes = [8, 128], strides = [1, 1]} : vector<8x512xf32> to vector<8x128xf32>
    %17 = vector.extract_strided_slice %14 {offsets = [0, 128], sizes = [8, 128], strides = [1, 1]} : vector<8x512xf32> to vector<8x128xf32>
    %18 = vector.extract_strided_slice %15 {offsets = [0, 256], sizes = [8, 128], strides = [1, 1]} : vector<8x512xf32> to vector<8x128xf32>
    %19 = vector.extract_strided_slice %14 {offsets = [0, 384], sizes = [8, 128], strides = [1, 1]} : vector<8x512xf32> to vector<8x128xf32>
    %20 = arith.mulf %17, %5 : vector<8x128xf32>
    %21 = arith.mulf %16, %18 : vector<8x128xf32>
    %22 = arith.addf %20, %21 : vector<8x128xf32>
    %23 = math.tanh %22 : vector<8x128xf32>
    %24 = arith.mulf %19, %23 : vector<8x128xf32>
    %c8 = arith.constant 8 : index
    %c0_8 = arith.constant 0 : index
    %25 = vector.load %arg0[%c8, %c0_8] : memref<64x512xf32, #tpu.memory_space<vmem>>, vector<8x512xf32>
    %c0_9 = arith.constant 0 : index
    %c0_10 = arith.constant 0 : index
    %26 = vector.load %arg3[%c0_9, %c0_10] : memref<128x512xf32, #tpu.memory_space<vmem>>, vector<128x512xf32>
    %cst_11 = arith.constant dense<0.000000e+00> : vector<8x512xf32>
    %27 = tpu.matmul %24, %26, %cst_11 {dimension_numbers = #tpu.dot_dimension_numbers<[1], [0], [0], [1], [0, 0, 1, 1], [], []>} : vector<8x128xf32>, vector<128x512xf32>, vector<8x512xf32> -> vector<8x512xf32>
    %28 = arith.addf %25, %27 : vector<8x512xf32>
    %29 = arith.negf %28 : vector<8x512xf32>
    %30 = math.exp %29 : vector<8x512xf32>
    %cst_12 = arith.constant 1.000000e+00 : f32
    %31 = vector.broadcast %cst_12 : f32 to vector<8x512xf32>
    %32 = arith.addf %31, %30 : vector<8x512xf32>
    %33 = arith.divf %31, %32 : vector<8x512xf32>
    %34 = math.tanh %28 : vector<8x512xf32>
    %35 = vector.extract_strided_slice %33 {offsets = [0, 0], sizes = [8, 128], strides = [1, 1]} : vector<8x512xf32> to vector<8x128xf32>
    %36 = vector.extract_strided_slice %33 {offsets = [0, 128], sizes = [8, 128], strides = [1, 1]} : vector<8x512xf32> to vector<8x128xf32>
    %37 = vector.extract_strided_slice %34 {offsets = [0, 256], sizes = [8, 128], strides = [1, 1]} : vector<8x512xf32> to vector<8x128xf32>
    %38 = vector.extract_strided_slice %33 {offsets = [0, 384], sizes = [8, 128], strides = [1, 1]} : vector<8x512xf32> to vector<8x128xf32>
    %39 = arith.mulf %36, %22 : vector<8x128xf32>
    %40 = arith.mulf %35, %37 : vector<8x128xf32>
    %41 = arith.addf %39, %40 : vector<8x128xf32>
    %42 = math.tanh %41 : vector<8x128xf32>
    %43 = arith.mulf %38, %42 : vector<8x128xf32>
    %c16 = arith.constant 16 : index
    %c0_13 = arith.constant 0 : index
    %44 = vector.load %arg0[%c16, %c0_13] : memref<64x512xf32, #tpu.memory_space<vmem>>, vector<8x512xf32>
    %c0_14 = arith.constant 0 : index
    %c0_15 = arith.constant 0 : index
    %45 = vector.load %arg3[%c0_14, %c0_15] : memref<128x512xf32, #tpu.memory_space<vmem>>, vector<128x512xf32>
    %cst_16 = arith.constant dense<0.000000e+00> : vector<8x512xf32>
    %46 = tpu.matmul %43, %45, %cst_16 {dimension_numbers = #tpu.dot_dimension_numbers<[1], [0], [0], [1], [0, 0, 1, 1], [], []>} : vector<8x128xf32>, vector<128x512xf32>, vector<8x512xf32> -> vector<8x512xf32>
    %47 = arith.addf %44, %46 : vector<8x512xf32>
    %48 = arith.negf %47 : vector<8x512xf32>
    %49 = math.exp %48 : vector<8x512xf32>
    %cst_17 = arith.constant 1.000000e+00 : f32
    %50 = vector.broadcast %cst_17 : f32 to vector<8x512xf32>
    %51 = arith.addf %50, %49 : vector<8x512xf32>
    %52 = arith.divf %50, %51 : vector<8x512xf32>
    %53 = math.tanh %47 : vector<8x512xf32>
    %54 = vector.extract_strided_slice %52 {offsets = [0, 0], sizes = [8, 128], strides = [1, 1]} : vector<8x512xf32> to vector<8x128xf32>
    %55 = vector.extract_strided_slice %52 {offsets = [0, 128], sizes = [8, 128], strides = [1, 1]} : vector<8x512xf32> to vector<8x128xf32>
    %56 = vector.extract_strided_slice %53 {offsets = [0, 256], sizes = [8, 128], strides = [1, 1]} : vector<8x512xf32> to vector<8x128xf32>
    %57 = vector.extract_strided_slice %52 {offsets = [0, 384], sizes = [8, 128], strides = [1, 1]} : vector<8x512xf32> to vector<8x128xf32>
    %58 = arith.mulf %55, %41 : vector<8x128xf32>
    %59 = arith.mulf %54, %56 : vector<8x128xf32>
    %60 = arith.addf %58, %59 : vector<8x128xf32>
    %61 = math.tanh %60 : vector<8x128xf32>
    %62 = arith.mulf %57, %61 : vector<8x128xf32>
    %c24 = arith.constant 24 : index
    %c0_18 = arith.constant 0 : index
    %63 = vector.load %arg0[%c24, %c0_18] : memref<64x512xf32, #tpu.memory_space<vmem>>, vector<8x512xf32>
    %c0_19 = arith.constant 0 : index
    %c0_20 = arith.constant 0 : index
    %64 = vector.load %arg3[%c0_19, %c0_20] : memref<128x512xf32, #tpu.memory_space<vmem>>, vector<128x512xf32>
    %cst_21 = arith.constant dense<0.000000e+00> : vector<8x512xf32>
    %65 = tpu.matmul %62, %64, %cst_21 {dimension_numbers = #tpu.dot_dimension_numbers<[1], [0], [0], [1], [0, 0, 1, 1], [], []>} : vector<8x128xf32>, vector<128x512xf32>, vector<8x512xf32> -> vector<8x512xf32>
    %66 = arith.addf %63, %65 : vector<8x512xf32>
    %67 = arith.negf %66 : vector<8x512xf32>
    %68 = math.exp %67 : vector<8x512xf32>
    %cst_22 = arith.constant 1.000000e+00 : f32
    %69 = vector.broadcast %cst_22 : f32 to vector<8x512xf32>
    %70 = arith.addf %69, %68 : vector<8x512xf32>
    %71 = arith.divf %69, %70 : vector<8x512xf32>
    %72 = math.tanh %66 : vector<8x512xf32>
    %73 = vector.extract_strided_slice %71 {offsets = [0, 0], sizes = [8, 128], strides = [1, 1]} : vector<8x512xf32> to vector<8x128xf32>
    %74 = vector.extract_strided_slice %71 {offsets = [0, 128], sizes = [8, 128], strides = [1, 1]} : vector<8x512xf32> to vector<8x128xf32>
    %75 = vector.extract_strided_slice %72 {offsets = [0, 256], sizes = [8, 128], strides = [1, 1]} : vector<8x512xf32> to vector<8x128xf32>
    %76 = vector.extract_strided_slice %71 {offsets = [0, 384], sizes = [8, 128], strides = [1, 1]} : vector<8x512xf32> to vector<8x128xf32>
    %77 = arith.mulf %74, %60 : vector<8x128xf32>
    %78 = arith.mulf %73, %75 : vector<8x128xf32>
    %79 = arith.addf %77, %78 : vector<8x128xf32>
    %80 = math.tanh %79 : vector<8x128xf32>
    %81 = arith.mulf %76, %80 : vector<8x128xf32>
    %c32 = arith.constant 32 : index
    %c0_23 = arith.constant 0 : index
    %82 = vector.load %arg0[%c32, %c0_23] : memref<64x512xf32, #tpu.memory_space<vmem>>, vector<8x512xf32>
    %c0_24 = arith.constant 0 : index
    %c0_25 = arith.constant 0 : index
    %83 = vector.load %arg3[%c0_24, %c0_25] : memref<128x512xf32, #tpu.memory_space<vmem>>, vector<128x512xf32>
    %cst_26 = arith.constant dense<0.000000e+00> : vector<8x512xf32>
    %84 = tpu.matmul %81, %83, %cst_26 {dimension_numbers = #tpu.dot_dimension_numbers<[1], [0], [0], [1], [0, 0, 1, 1], [], []>} : vector<8x128xf32>, vector<128x512xf32>, vector<8x512xf32> -> vector<8x512xf32>
    %85 = arith.addf %82, %84 : vector<8x512xf32>
    %86 = arith.negf %85 : vector<8x512xf32>
    %87 = math.exp %86 : vector<8x512xf32>
    %cst_27 = arith.constant 1.000000e+00 : f32
    %88 = vector.broadcast %cst_27 : f32 to vector<8x512xf32>
    %89 = arith.addf %88, %87 : vector<8x512xf32>
    %90 = arith.divf %88, %89 : vector<8x512xf32>
    %91 = math.tanh %85 : vector<8x512xf32>
    %92 = vector.extract_strided_slice %90 {offsets = [0, 0], sizes = [8, 128], strides = [1, 1]} : vector<8x512xf32> to vector<8x128xf32>
    %93 = vector.extract_strided_slice %90 {offsets = [0, 128], sizes = [8, 128], strides = [1, 1]} : vector<8x512xf32> to vector<8x128xf32>
    %94 = vector.extract_strided_slice %91 {offsets = [0, 256], sizes = [8, 128], strides = [1, 1]} : vector<8x512xf32> to vector<8x128xf32>
    %95 = vector.extract_strided_slice %90 {offsets = [0, 384], sizes = [8, 128], strides = [1, 1]} : vector<8x512xf32> to vector<8x128xf32>
    %96 = arith.mulf %93, %79 : vector<8x128xf32>
    %97 = arith.mulf %92, %94 : vector<8x128xf32>
    %98 = arith.addf %96, %97 : vector<8x128xf32>
    %99 = math.tanh %98 : vector<8x128xf32>
    %100 = arith.mulf %95, %99 : vector<8x128xf32>
    %c40 = arith.constant 40 : index
    %c0_28 = arith.constant 0 : index
    %101 = vector.load %arg0[%c40, %c0_28] : memref<64x512xf32, #tpu.memory_space<vmem>>, vector<8x512xf32>
    %c0_29 = arith.constant 0 : index
    %c0_30 = arith.constant 0 : index
    %102 = vector.load %arg3[%c0_29, %c0_30] : memref<128x512xf32, #tpu.memory_space<vmem>>, vector<128x512xf32>
    %cst_31 = arith.constant dense<0.000000e+00> : vector<8x512xf32>
    %103 = tpu.matmul %100, %102, %cst_31 {dimension_numbers = #tpu.dot_dimension_numbers<[1], [0], [0], [1], [0, 0, 1, 1], [], []>} : vector<8x128xf32>, vector<128x512xf32>, vector<8x512xf32> -> vector<8x512xf32>
    %104 = arith.addf %101, %103 : vector<8x512xf32>
    %105 = arith.negf %104 : vector<8x512xf32>
    %106 = math.exp %105 : vector<8x512xf32>
    %cst_32 = arith.constant 1.000000e+00 : f32
    %107 = vector.broadcast %cst_32 : f32 to vector<8x512xf32>
    %108 = arith.addf %107, %106 : vector<8x512xf32>
    %109 = arith.divf %107, %108 : vector<8x512xf32>
    %110 = math.tanh %104 : vector<8x512xf32>
    %111 = vector.extract_strided_slice %109 {offsets = [0, 0], sizes = [8, 128], strides = [1, 1]} : vector<8x512xf32> to vector<8x128xf32>
    %112 = vector.extract_strided_slice %109 {offsets = [0, 128], sizes = [8, 128], strides = [1, 1]} : vector<8x512xf32> to vector<8x128xf32>
    %113 = vector.extract_strided_slice %110 {offsets = [0, 256], sizes = [8, 128], strides = [1, 1]} : vector<8x512xf32> to vector<8x128xf32>
    %114 = vector.extract_strided_slice %109 {offsets = [0, 384], sizes = [8, 128], strides = [1, 1]} : vector<8x512xf32> to vector<8x128xf32>
    %115 = arith.mulf %112, %98 : vector<8x128xf32>
    %116 = arith.mulf %111, %113 : vector<8x128xf32>
    %117 = arith.addf %115, %116 : vector<8x128xf32>
    %118 = math.tanh %117 : vector<8x128xf32>
    %119 = arith.mulf %114, %118 : vector<8x128xf32>
    %c48 = arith.constant 48 : index
    %c0_33 = arith.constant 0 : index
    %120 = vector.load %arg0[%c48, %c0_33] : memref<64x512xf32, #tpu.memory_space<vmem>>, vector<8x512xf32>
    %c0_34 = arith.constant 0 : index
    %c0_35 = arith.constant 0 : index
    %121 = vector.load %arg3[%c0_34, %c0_35] : memref<128x512xf32, #tpu.memory_space<vmem>>, vector<128x512xf32>
    %cst_36 = arith.constant dense<0.000000e+00> : vector<8x512xf32>
    %122 = tpu.matmul %119, %121, %cst_36 {dimension_numbers = #tpu.dot_dimension_numbers<[1], [0], [0], [1], [0, 0, 1, 1], [], []>} : vector<8x128xf32>, vector<128x512xf32>, vector<8x512xf32> -> vector<8x512xf32>
    %123 = arith.addf %120, %122 : vector<8x512xf32>
    %124 = arith.negf %123 : vector<8x512xf32>
    %125 = math.exp %124 : vector<8x512xf32>
    %cst_37 = arith.constant 1.000000e+00 : f32
    %126 = vector.broadcast %cst_37 : f32 to vector<8x512xf32>
    %127 = arith.addf %126, %125 : vector<8x512xf32>
    %128 = arith.divf %126, %127 : vector<8x512xf32>
    %129 = math.tanh %123 : vector<8x512xf32>
    %130 = vector.extract_strided_slice %128 {offsets = [0, 0], sizes = [8, 128], strides = [1, 1]} : vector<8x512xf32> to vector<8x128xf32>
    %131 = vector.extract_strided_slice %128 {offsets = [0, 128], sizes = [8, 128], strides = [1, 1]} : vector<8x512xf32> to vector<8x128xf32>
    %132 = vector.extract_strided_slice %129 {offsets = [0, 256], sizes = [8, 128], strides = [1, 1]} : vector<8x512xf32> to vector<8x128xf32>
    %133 = vector.extract_strided_slice %128 {offsets = [0, 384], sizes = [8, 128], strides = [1, 1]} : vector<8x512xf32> to vector<8x128xf32>
    %134 = arith.mulf %131, %117 : vector<8x128xf32>
    %135 = arith.mulf %130, %132 : vector<8x128xf32>
    %136 = arith.addf %134, %135 : vector<8x128xf32>
    %137 = math.tanh %136 : vector<8x128xf32>
    %138 = arith.mulf %133, %137 : vector<8x128xf32>
    %c56 = arith.constant 56 : index
    %c0_38 = arith.constant 0 : index
    %139 = vector.load %arg0[%c56, %c0_38] : memref<64x512xf32, #tpu.memory_space<vmem>>, vector<8x512xf32>
    %c0_39 = arith.constant 0 : index
    %c0_40 = arith.constant 0 : index
    %140 = vector.load %arg3[%c0_39, %c0_40] : memref<128x512xf32, #tpu.memory_space<vmem>>, vector<128x512xf32>
    %cst_41 = arith.constant dense<0.000000e+00> : vector<8x512xf32>
    %141 = tpu.matmul %138, %140, %cst_41 {dimension_numbers = #tpu.dot_dimension_numbers<[1], [0], [0], [1], [0, 0, 1, 1], [], []>} : vector<8x128xf32>, vector<128x512xf32>, vector<8x512xf32> -> vector<8x512xf32>
    %142 = arith.addf %139, %141 : vector<8x512xf32>
    %143 = arith.negf %142 : vector<8x512xf32>
    %144 = math.exp %143 : vector<8x512xf32>
    %cst_42 = arith.constant 1.000000e+00 : f32
    %145 = vector.broadcast %cst_42 : f32 to vector<8x512xf32>
    %146 = arith.addf %145, %144 : vector<8x512xf32>
    %147 = arith.divf %145, %146 : vector<8x512xf32>
    %148 = math.tanh %142 : vector<8x512xf32>
    %149 = vector.extract_strided_slice %147 {offsets = [0, 0], sizes = [8, 128], strides = [1, 1]} : vector<8x512xf32> to vector<8x128xf32>
    %150 = vector.extract_strided_slice %147 {offsets = [0, 128], sizes = [8, 128], strides = [1, 1]} : vector<8x512xf32> to vector<8x128xf32>
    %151 = vector.extract_strided_slice %148 {offsets = [0, 256], sizes = [8, 128], strides = [1, 1]} : vector<8x512xf32> to vector<8x128xf32>
    %152 = vector.extract_strided_slice %147 {offsets = [0, 384], sizes = [8, 128], strides = [1, 1]} : vector<8x512xf32> to vector<8x128xf32>
    %153 = arith.mulf %150, %136 : vector<8x128xf32>
    %154 = arith.mulf %149, %151 : vector<8x128xf32>
    %155 = arith.addf %153, %154 : vector<8x128xf32>
    %156 = math.tanh %155 : vector<8x128xf32>
    %157 = arith.mulf %152, %156 : vector<8x128xf32>
    %c0_43 = arith.constant 0 : index
    %c0_44 = arith.constant 0 : index
    %c0_45 = arith.constant 0 : index
    %158 = vector.load %arg1[%c0_43, %c0_44, %c0_45] : memref<6x8x512xf32, #tpu.memory_space<vmem>>, vector<1x8x512xf32>
    %159 = vector.shape_cast %158 : vector<1x8x512xf32> to vector<8x512xf32>
    %c0_46 = arith.constant 0 : index
    %c0_47 = arith.constant 0 : index
    %160 = vector.load %arg9[%c0_46, %c0_47] : memref<8x512xf32, #tpu.memory_space<vmem>>, vector<8x512xf32>
    tpu.vector_store %arg9[%c0_46, %c0_47], %159 {strides = array<i32>} : memref<8x512xf32, #tpu.memory_space<vmem>>, vector<8x512xf32>,
    %c0_48 = arith.constant 0 : index
    %c0_49 = arith.constant 0 : index
    %161 = vector.load %arg9[%c0_48, %c0_49] : memref<8x512xf32, #tpu.memory_space<vmem>>, vector<8x512xf32>
    %c0_50 = arith.constant 0 : index
    %c0_51 = arith.constant 0 : index
    %162 = vector.load %arg4[%c0_50, %c0_51] : memref<128x512xf32, #tpu.memory_space<vmem>>, vector<128x512xf32>
    %cst_52 = arith.constant dense<0.000000e+00> : vector<8x512xf32>
    %163 = tpu.matmul %157, %162, %cst_52 {dimension_numbers = #tpu.dot_dimension_numbers<[1], [0], [0], [1], [0, 0, 1, 1], [], []>} : vector<8x128xf32>, vector<128x512xf32>, vector<8x512xf32> -> vector<8x512xf32>
    %164 = arith.addf %161, %163 : vector<8x512xf32>
    %165 = arith.negf %164 : vector<8x512xf32>
    %166 = math.exp %165 : vector<8x512xf32>
    %cst_53 = arith.constant 1.000000e+00 : f32
    %167 = vector.broadcast %cst_53 : f32 to vector<8x512xf32>
    %168 = arith.addf %167, %166 : vector<8x512xf32>
    %169 = arith.divf %167, %168 : vector<8x512xf32>
    %170 = math.tanh %164 : vector<8x512xf32>
    %171 = vector.extract_strided_slice %169 {offsets = [0, 0], sizes = [8, 128], strides = [1, 1]} : vector<8x512xf32> to vector<8x128xf32>
    %172 = vector.extract_strided_slice %169 {offsets = [0, 128], sizes = [8, 128], strides = [1, 1]} : vector<8x512xf32> to vector<8x128xf32>
    %173 = vector.extract_strided_slice %170 {offsets = [0, 256], sizes = [8, 128], strides = [1, 1]} : vector<8x512xf32> to vector<8x128xf32>
    %174 = vector.extract_strided_slice %169 {offsets = [0, 384], sizes = [8, 128], strides = [1, 1]} : vector<8x512xf32> to vector<8x128xf32>
    %175 = arith.mulf %172, %155 : vector<8x128xf32>
    %176 = arith.mulf %171, %173 : vector<8x128xf32>
    %177 = arith.addf %175, %176 : vector<8x128xf32>
    %178 = math.tanh %177 : vector<8x128xf32>
    %179 = arith.mulf %174, %178 : vector<8x128xf32>
    %c0_54 = arith.constant 0 : index
    %c0_55 = arith.constant 0 : index
    %180 = vector.load %arg6[%c0_54, %c0_55] : memref<128x128xf32, #tpu.memory_space<vmem>>, vector<128x128xf32>
    %cst_56 = arith.constant dense<0.000000e+00> : vector<8x128xf32>
    %181 = tpu.matmul %179, %180, %cst_56 {dimension_numbers = #tpu.dot_dimension_numbers<[1], [0], [0], [1], [0, 0, 1, 1], [], []>} : vector<8x128xf32>, vector<128x128xf32>, vector<8x128xf32> -> vector<8x128xf32>
    %182 = arith.addf %181, %2 : vector<8x128xf32>
    %c0_57 = arith.constant 0 : index
    %c0_58 = arith.constant 0 : index
    %c0_59 = arith.constant 0 : index
    %183 = vector.load %arg8[%c0_57, %c0_58, %c0_59] : memref<6x8x128xf32, #tpu.memory_space<vmem>>, vector<1x8x128xf32>
    %184 = vector.shape_cast %183 : vector<1x8x128xf32> to vector<8x128xf32>
    %185 = vector.shape_cast %182 : vector<8x128xf32> to vector<1x8x128xf32>
    tpu.vector_store %arg8[%c0_57, %c0_58, %c0_59], %185 {strides = array<i32>} : memref<6x8x128xf32, #tpu.memory_space<vmem>>, vector<1x8x128xf32>,
    %c0_60 = arith.constant 0 : index
    %186 = memref.load %arg2[%c0_60] : memref<6xi32, #tpu.memory_space<smem>>
    %c1_i32 = arith.constant 1 : i32
    %187 = arith.cmpi eq, %186, %c1_i32 : i32
    %188 = arith.extui %187 : i1 to i32
    %c0_i32 = arith.constant 0 : i32
    %189 = arith.cmpi ne, %188, %c0_i32 : i32
    scf.if %189 {
      %c0_138 = arith.constant 0 : index
      %c0_139 = arith.constant 0 : index
      %c0_140 = arith.constant 0 : index
      %346 = vector.load %arg1[%c0_138, %c0_139, %c0_140] : memref<6x8x512xf32, #tpu.memory_space<vmem>>, vector<1x8x512xf32>
      %347 = vector.shape_cast %346 : vector<1x8x512xf32> to vector<8x512xf32>
      %c0_141 = arith.constant 0 : index
      %c0_142 = arith.constant 0 : index
      %348 = vector.load %arg9[%c0_141, %c0_142] : memref<8x512xf32, #tpu.memory_space<vmem>>, vector<8x512xf32>
      tpu.vector_store %arg9[%c0_141, %c0_142], %347 {strides = array<i32>} : memref<8x512xf32, #tpu.memory_space<vmem>>, vector<8x512xf32>,
    } else {
    }
    %c0_i32_61 = arith.constant 0 : i32
    %190 = arith.cmpi eq, %186, %c0_i32_61 : i32
    %191 = arith.extui %190 : i1 to i32
    %c0_i32_62 = arith.constant 0 : i32
    %192 = arith.cmpi ne, %191, %c0_i32_62 : i32
    scf.if %192 {
      %cst_138 = arith.constant dense<0xFF800000> : vector<8xf32>
      %346 = vector.multi_reduction <maximumf>, %182, %cst_138 [1] : vector<8x128xf32> to vector<8xf32>
      %347 = vector.shape_cast %346 : vector<8xf32> to vector<8x1xf32>
      %348 = vector.broadcast %347 : vector<8x1xf32> to vector<8x128xf32>
      %349 = arith.cmpf oge, %182, %348 : vector<8x128xf32>
      %c128_i32 = arith.constant 128 : i32
      %350 = vector.broadcast %c128_i32 : i32 to vector<8x128xi32>
      %351 = arith.select %349, %3, %350 : vector<8x128xi1>, vector<8x128xi32>
      %cst_139 = arith.constant dense<2147483647> : vector<8xi32>
      %352 = vector.multi_reduction <minsi>, %351, %cst_139 [1] : vector<8x128xi32> to vector<8xi32>
      %353 = vector.shape_cast %352 : vector<8xi32> to vector<8x1xi32>
      %354 = vector.broadcast %353 : vector<8x1xi32> to vector<8x128xi32>
      %355 = arith.cmpi eq, %3, %354 : vector<8x128xi32>
      %356 = arith.extui %355 : vector<8x128xi1> to vector<8x128xi32>
      %357 = arith.sitofp %356 : vector<8x128xi32> to vector<8x128xf32>
      %c0_140 = arith.constant 0 : index
      %c0_141 = arith.constant 0 : index
      %358 = vector.load %arg5[%c0_140, %c0_141] : memref<128x512xf32, #tpu.memory_space<vmem>>, vector<128x512xf32>
      %cst_142 = arith.constant dense<0.000000e+00> : vector<8x512xf32>
      %359 = tpu.matmul %357, %358, %cst_142 {dimension_numbers = #tpu.dot_dimension_numbers<[1], [0], [0], [1], [0, 0, 1, 1], [], []>} : vector<8x128xf32>, vector<128x512xf32>, vector<8x512xf32> -> vector<8x512xf32>
      %c0_143 = arith.constant 0 : index
      %c0_144 = arith.constant 0 : index
      %360 = vector.load %arg9[%c0_143, %c0_144] : memref<8x512xf32, #tpu.memory_space<vmem>>, vector<8x512xf32>
      tpu.vector_store %arg9[%c0_143, %c0_144], %359 {strides = array<i32>} : memref<8x512xf32, #tpu.memory_space<vmem>>, vector<8x512xf32>,
    } else {
    }
    %c0_63 = arith.constant 0 : index
    %c0_64 = arith.constant 0 : index
    %193 = vector.load %arg9[%c0_63, %c0_64] : memref<8x512xf32, #tpu.memory_space<vmem>>, vector<8x512xf32>
    %c0_65 = arith.constant 0 : index
    %c0_66 = arith.constant 0 : index
    %194 = vector.load %arg4[%c0_65, %c0_66] : memref<128x512xf32, #tpu.memory_space<vmem>>, vector<128x512xf32>
    %cst_67 = arith.constant dense<0.000000e+00> : vector<8x512xf32>
    %195 = tpu.matmul %179, %194, %cst_67 {dimension_numbers = #tpu.dot_dimension_numbers<[1], [0], [0], [1], [0, 0, 1, 1], [], []>} : vector<8x128xf32>, vector<128x512xf32>, vector<8x512xf32> -> vector<8x512xf32>
    %196 = arith.addf %193, %195 : vector<8x512xf32>
    %197 = arith.negf %196 : vector<8x512xf32>
    %198 = math.exp %197 : vector<8x512xf32>
    %cst_68 = arith.constant 1.000000e+00 : f32
    %199 = vector.broadcast %cst_68 : f32 to vector<8x512xf32>
    %200 = arith.addf %199, %198 : vector<8x512xf32>
    %201 = arith.divf %199, %200 : vector<8x512xf32>
    %202 = math.tanh %196 : vector<8x512xf32>
    %203 = vector.extract_strided_slice %201 {offsets = [0, 0], sizes = [8, 128], strides = [1, 1]} : vector<8x512xf32> to vector<8x128xf32>
    %204 = vector.extract_strided_slice %201 {offsets = [0, 128], sizes = [8, 128], strides = [1, 1]} : vector<8x512xf32> to vector<8x128xf32>
    %205 = vector.extract_strided_slice %202 {offsets = [0, 256], sizes = [8, 128], strides = [1, 1]} : vector<8x512xf32> to vector<8x128xf32>
    %206 = vector.extract_strided_slice %201 {offsets = [0, 384], sizes = [8, 128], strides = [1, 1]} : vector<8x512xf32> to vector<8x128xf32>
    %207 = arith.mulf %204, %177 : vector<8x128xf32>
    %208 = arith.mulf %203, %205 : vector<8x128xf32>
    %209 = arith.addf %207, %208 : vector<8x128xf32>
    %210 = math.tanh %209 : vector<8x128xf32>
    %211 = arith.mulf %206, %210 : vector<8x128xf32>
    %c0_69 = arith.constant 0 : index
    %c0_70 = arith.constant 0 : index
    %212 = vector.load %arg6[%c0_69, %c0_70] : memref<128x128xf32, #tpu.memory_space<vmem>>, vector<128x128xf32>
    %cst_71 = arith.constant dense<0.000000e+00> : vector<8x128xf32>
    %213 = tpu.matmul %211, %212, %cst_71 {dimension_numbers = #tpu.dot_dimension_numbers<[1], [0], [0], [1], [0, 0, 1, 1], [], []>} : vector<8x128xf32>, vector<128x128xf32>, vector<8x128xf32> -> vector<8x128xf32>
    %214 = arith.addf %213, %2 : vector<8x128xf32>
    %c1 = arith.constant 1 : index
    %c0_72 = arith.constant 0 : index
    %c0_73 = arith.constant 0 : index
    %215 = vector.load %arg8[%c1, %c0_72, %c0_73] : memref<6x8x128xf32, #tpu.memory_space<vmem>>, vector<1x8x128xf32>
    %216 = vector.shape_cast %215 : vector<1x8x128xf32> to vector<8x128xf32>
    %217 = vector.shape_cast %214 : vector<8x128xf32> to vector<1x8x128xf32>
    tpu.vector_store %arg8[%c1, %c0_72, %c0_73], %217 {strides = array<i32>} : memref<6x8x128xf32, #tpu.memory_space<vmem>>, vector<1x8x128xf32>,
    %c1_74 = arith.constant 1 : index
    %218 = memref.load %arg2[%c1_74] : memref<6xi32, #tpu.memory_space<smem>>
    %c1_i32_75 = arith.constant 1 : i32
    %219 = arith.cmpi eq, %218, %c1_i32_75 : i32
    %220 = arith.extui %219 : i1 to i32
    %c0_i32_76 = arith.constant 0 : i32
    %221 = arith.cmpi ne, %220, %c0_i32_76 : i32
    scf.if %221 {
      %c1_138 = arith.constant 1 : index
      %c0_139 = arith.constant 0 : index
      %c0_140 = arith.constant 0 : index
      %346 = vector.load %arg1[%c1_138, %c0_139, %c0_140] : memref<6x8x512xf32, #tpu.memory_space<vmem>>, vector<1x8x512xf32>
      %347 = vector.shape_cast %346 : vector<1x8x512xf32> to vector<8x512xf32>
      %c0_141 = arith.constant 0 : index
      %c0_142 = arith.constant 0 : index
      %348 = vector.load %arg9[%c0_141, %c0_142] : memref<8x512xf32, #tpu.memory_space<vmem>>, vector<8x512xf32>
      tpu.vector_store %arg9[%c0_141, %c0_142], %347 {strides = array<i32>} : memref<8x512xf32, #tpu.memory_space<vmem>>, vector<8x512xf32>,
    } else {
    }
    %c0_i32_77 = arith.constant 0 : i32
    %222 = arith.cmpi eq, %218, %c0_i32_77 : i32
    %223 = arith.extui %222 : i1 to i32
    %c0_i32_78 = arith.constant 0 : i32
    %224 = arith.cmpi ne, %223, %c0_i32_78 : i32
    scf.if %224 {
      %cst_138 = arith.constant dense<0xFF800000> : vector<8xf32>
      %346 = vector.multi_reduction <maximumf>, %214, %cst_138 [1] : vector<8x128xf32> to vector<8xf32>
      %347 = vector.shape_cast %346 : vector<8xf32> to vector<8x1xf32>
      %348 = vector.broadcast %347 : vector<8x1xf32> to vector<8x128xf32>
      %349 = arith.cmpf oge, %214, %348 : vector<8x128xf32>
      %c128_i32 = arith.constant 128 : i32
      %350 = vector.broadcast %c128_i32 : i32 to vector<8x128xi32>
      %351 = arith.select %349, %3, %350 : vector<8x128xi1>, vector<8x128xi32>
      %cst_139 = arith.constant dense<2147483647> : vector<8xi32>
      %352 = vector.multi_reduction <minsi>, %351, %cst_139 [1] : vector<8x128xi32> to vector<8xi32>
      %353 = vector.shape_cast %352 : vector<8xi32> to vector<8x1xi32>
      %354 = vector.broadcast %353 : vector<8x1xi32> to vector<8x128xi32>
      %355 = arith.cmpi eq, %3, %354 : vector<8x128xi32>
      %356 = arith.extui %355 : vector<8x128xi1> to vector<8x128xi32>
      %357 = arith.sitofp %356 : vector<8x128xi32> to vector<8x128xf32>
      %c0_140 = arith.constant 0 : index
      %c0_141 = arith.constant 0 : index
      %358 = vector.load %arg5[%c0_140, %c0_141] : memref<128x512xf32, #tpu.memory_space<vmem>>, vector<128x512xf32>
      %cst_142 = arith.constant dense<0.000000e+00> : vector<8x512xf32>
      %359 = tpu.matmul %357, %358, %cst_142 {dimension_numbers = #tpu.dot_dimension_numbers<[1], [0], [0], [1], [0, 0, 1, 1], [], []>} : vector<8x128xf32>, vector<128x512xf32>, vector<8x512xf32> -> vector<8x512xf32>
      %c0_143 = arith.constant 0 : index
      %c0_144 = arith.constant 0 : index
      %360 = vector.load %arg9[%c0_143, %c0_144] : memref<8x512xf32, #tpu.memory_space<vmem>>, vector<8x512xf32>
      tpu.vector_store %arg9[%c0_143, %c0_144], %359 {strides = array<i32>} : memref<8x512xf32, #tpu.memory_space<vmem>>, vector<8x512xf32>,
    } else {
    }
    %c0_79 = arith.constant 0 : index
    %c0_80 = arith.constant 0 : index
    %225 = vector.load %arg9[%c0_79, %c0_80] : memref<8x512xf32, #tpu.memory_space<vmem>>, vector<8x512xf32>
    %c0_81 = arith.constant 0 : index
    %c0_82 = arith.constant 0 : index
    %226 = vector.load %arg4[%c0_81, %c0_82] : memref<128x512xf32, #tpu.memory_space<vmem>>, vector<128x512xf32>
    %cst_83 = arith.constant dense<0.000000e+00> : vector<8x512xf32>
    %227 = tpu.matmul %211, %226, %cst_83 {dimension_numbers = #tpu.dot_dimension_numbers<[1], [0], [0], [1], [0, 0, 1, 1], [], []>} : vector<8x128xf32>, vector<128x512xf32>, vector<8x512xf32> -> vector<8x512xf32>
    %228 = arith.addf %225, %227 : vector<8x512xf32>
    %229 = arith.negf %228 : vector<8x512xf32>
    %230 = math.exp %229 : vector<8x512xf32>
    %cst_84 = arith.constant 1.000000e+00 : f32
    %231 = vector.broadcast %cst_84 : f32 to vector<8x512xf32>
    %232 = arith.addf %231, %230 : vector<8x512xf32>
    %233 = arith.divf %231, %232 : vector<8x512xf32>
    %234 = math.tanh %228 : vector<8x512xf32>
    %235 = vector.extract_strided_slice %233 {offsets = [0, 0], sizes = [8, 128], strides = [1, 1]} : vector<8x512xf32> to vector<8x128xf32>
    %236 = vector.extract_strided_slice %233 {offsets = [0, 128], sizes = [8, 128], strides = [1, 1]} : vector<8x512xf32> to vector<8x128xf32>
    %237 = vector.extract_strided_slice %234 {offsets = [0, 256], sizes = [8, 128], strides = [1, 1]} : vector<8x512xf32> to vector<8x128xf32>
    %238 = vector.extract_strided_slice %233 {offsets = [0, 384], sizes = [8, 128], strides = [1, 1]} : vector<8x512xf32> to vector<8x128xf32>
    %239 = arith.mulf %236, %209 : vector<8x128xf32>
    %240 = arith.mulf %235, %237 : vector<8x128xf32>
    %241 = arith.addf %239, %240 : vector<8x128xf32>
    %242 = math.tanh %241 : vector<8x128xf32>
    %243 = arith.mulf %238, %242 : vector<8x128xf32>
    %c0_85 = arith.constant 0 : index
    %c0_86 = arith.constant 0 : index
    %244 = vector.load %arg6[%c0_85, %c0_86] : memref<128x128xf32, #tpu.memory_space<vmem>>, vector<128x128xf32>
    %cst_87 = arith.constant dense<0.000000e+00> : vector<8x128xf32>
    %245 = tpu.matmul %243, %244, %cst_87 {dimension_numbers = #tpu.dot_dimension_numbers<[1], [0], [0], [1], [0, 0, 1, 1], [], []>} : vector<8x128xf32>, vector<128x128xf32>, vector<8x128xf32> -> vector<8x128xf32>
    %246 = arith.addf %245, %2 : vector<8x128xf32>
    %c2 = arith.constant 2 : index
    %c0_88 = arith.constant 0 : index
    %c0_89 = arith.constant 0 : index
    %247 = vector.load %arg8[%c2, %c0_88, %c0_89] : memref<6x8x128xf32, #tpu.memory_space<vmem>>, vector<1x8x128xf32>
    %248 = vector.shape_cast %247 : vector<1x8x128xf32> to vector<8x128xf32>
    %249 = vector.shape_cast %246 : vector<8x128xf32> to vector<1x8x128xf32>
    tpu.vector_store %arg8[%c2, %c0_88, %c0_89], %249 {strides = array<i32>} : memref<6x8x128xf32, #tpu.memory_space<vmem>>, vector<1x8x128xf32>,
    %c2_90 = arith.constant 2 : index
    %250 = memref.load %arg2[%c2_90] : memref<6xi32, #tpu.memory_space<smem>>
    %c1_i32_91 = arith.constant 1 : i32
    %251 = arith.cmpi eq, %250, %c1_i32_91 : i32
    %252 = arith.extui %251 : i1 to i32
    %c0_i32_92 = arith.constant 0 : i32
    %253 = arith.cmpi ne, %252, %c0_i32_92 : i32
    scf.if %253 {
      %c2_138 = arith.constant 2 : index
      %c0_139 = arith.constant 0 : index
      %c0_140 = arith.constant 0 : index
      %346 = vector.load %arg1[%c2_138, %c0_139, %c0_140] : memref<6x8x512xf32, #tpu.memory_space<vmem>>, vector<1x8x512xf32>
      %347 = vector.shape_cast %346 : vector<1x8x512xf32> to vector<8x512xf32>
      %c0_141 = arith.constant 0 : index
      %c0_142 = arith.constant 0 : index
      %348 = vector.load %arg9[%c0_141, %c0_142] : memref<8x512xf32, #tpu.memory_space<vmem>>, vector<8x512xf32>
      tpu.vector_store %arg9[%c0_141, %c0_142], %347 {strides = array<i32>} : memref<8x512xf32, #tpu.memory_space<vmem>>, vector<8x512xf32>,
    } else {
    }
    %c0_i32_93 = arith.constant 0 : i32
    %254 = arith.cmpi eq, %250, %c0_i32_93 : i32
    %255 = arith.extui %254 : i1 to i32
    %c0_i32_94 = arith.constant 0 : i32
    %256 = arith.cmpi ne, %255, %c0_i32_94 : i32
    scf.if %256 {
      %cst_138 = arith.constant dense<0xFF800000> : vector<8xf32>
      %346 = vector.multi_reduction <maximumf>, %246, %cst_138 [1] : vector<8x128xf32> to vector<8xf32>
      %347 = vector.shape_cast %346 : vector<8xf32> to vector<8x1xf32>
      %348 = vector.broadcast %347 : vector<8x1xf32> to vector<8x128xf32>
      %349 = arith.cmpf oge, %246, %348 : vector<8x128xf32>
      %c128_i32 = arith.constant 128 : i32
      %350 = vector.broadcast %c128_i32 : i32 to vector<8x128xi32>
      %351 = arith.select %349, %3, %350 : vector<8x128xi1>, vector<8x128xi32>
      %cst_139 = arith.constant dense<2147483647> : vector<8xi32>
      %352 = vector.multi_reduction <minsi>, %351, %cst_139 [1] : vector<8x128xi32> to vector<8xi32>
      %353 = vector.shape_cast %352 : vector<8xi32> to vector<8x1xi32>
      %354 = vector.broadcast %353 : vector<8x1xi32> to vector<8x128xi32>
      %355 = arith.cmpi eq, %3, %354 : vector<8x128xi32>
      %356 = arith.extui %355 : vector<8x128xi1> to vector<8x128xi32>
      %357 = arith.sitofp %356 : vector<8x128xi32> to vector<8x128xf32>
      %c0_140 = arith.constant 0 : index
      %c0_141 = arith.constant 0 : index
      %358 = vector.load %arg5[%c0_140, %c0_141] : memref<128x512xf32, #tpu.memory_space<vmem>>, vector<128x512xf32>
      %cst_142 = arith.constant dense<0.000000e+00> : vector<8x512xf32>
      %359 = tpu.matmul %357, %358, %cst_142 {dimension_numbers = #tpu.dot_dimension_numbers<[1], [0], [0], [1], [0, 0, 1, 1], [], []>} : vector<8x128xf32>, vector<128x512xf32>, vector<8x512xf32> -> vector<8x512xf32>
      %c0_143 = arith.constant 0 : index
      %c0_144 = arith.constant 0 : index
      %360 = vector.load %arg9[%c0_143, %c0_144] : memref<8x512xf32, #tpu.memory_space<vmem>>, vector<8x512xf32>
      tpu.vector_store %arg9[%c0_143, %c0_144], %359 {strides = array<i32>} : memref<8x512xf32, #tpu.memory_space<vmem>>, vector<8x512xf32>,
    } else {
    }
    %c0_95 = arith.constant 0 : index
    %c0_96 = arith.constant 0 : index
    %257 = vector.load %arg9[%c0_95, %c0_96] : memref<8x512xf32, #tpu.memory_space<vmem>>, vector<8x512xf32>
    %c0_97 = arith.constant 0 : index
    %c0_98 = arith.constant 0 : index
    %258 = vector.load %arg4[%c0_97, %c0_98] : memref<128x512xf32, #tpu.memory_space<vmem>>, vector<128x512xf32>
    %cst_99 = arith.constant dense<0.000000e+00> : vector<8x512xf32>
    %259 = tpu.matmul %243, %258, %cst_99 {dimension_numbers = #tpu.dot_dimension_numbers<[1], [0], [0], [1], [0, 0, 1, 1], [], []>} : vector<8x128xf32>, vector<128x512xf32>, vector<8x512xf32> -> vector<8x512xf32>
    %260 = arith.addf %257, %259 : vector<8x512xf32>
    %261 = arith.negf %260 : vector<8x512xf32>
    %262 = math.exp %261 : vector<8x512xf32>
    %cst_100 = arith.constant 1.000000e+00 : f32
    %263 = vector.broadcast %cst_100 : f32 to vector<8x512xf32>
    %264 = arith.addf %263, %262 : vector<8x512xf32>
    %265 = arith.divf %263, %264 : vector<8x512xf32>
    %266 = math.tanh %260 : vector<8x512xf32>
    %267 = vector.extract_strided_slice %265 {offsets = [0, 0], sizes = [8, 128], strides = [1, 1]} : vector<8x512xf32> to vector<8x128xf32>
    %268 = vector.extract_strided_slice %265 {offsets = [0, 128], sizes = [8, 128], strides = [1, 1]} : vector<8x512xf32> to vector<8x128xf32>
    %269 = vector.extract_strided_slice %266 {offsets = [0, 256], sizes = [8, 128], strides = [1, 1]} : vector<8x512xf32> to vector<8x128xf32>
    %270 = vector.extract_strided_slice %265 {offsets = [0, 384], sizes = [8, 128], strides = [1, 1]} : vector<8x512xf32> to vector<8x128xf32>
    %271 = arith.mulf %268, %241 : vector<8x128xf32>
    %272 = arith.mulf %267, %269 : vector<8x128xf32>
    %273 = arith.addf %271, %272 : vector<8x128xf32>
    %274 = math.tanh %273 : vector<8x128xf32>
    %275 = arith.mulf %270, %274 : vector<8x128xf32>
    %c0_101 = arith.constant 0 : index
    %c0_102 = arith.constant 0 : index
    %276 = vector.load %arg6[%c0_101, %c0_102] : memref<128x128xf32, #tpu.memory_space<vmem>>, vector<128x128xf32>
    %cst_103 = arith.constant dense<0.000000e+00> : vector<8x128xf32>
    %277 = tpu.matmul %275, %276, %cst_103 {dimension_numbers = #tpu.dot_dimension_numbers<[1], [0], [0], [1], [0, 0, 1, 1], [], []>} : vector<8x128xf32>, vector<128x128xf32>, vector<8x128xf32> -> vector<8x128xf32>
    %278 = arith.addf %277, %2 : vector<8x128xf32>
    %c3 = arith.constant 3 : index
    %c0_104 = arith.constant 0 : index
    %c0_105 = arith.constant 0 : index
    %279 = vector.load %arg8[%c3, %c0_104, %c0_105] : memref<6x8x128xf32, #tpu.memory_space<vmem>>, vector<1x8x128xf32>
    %280 = vector.shape_cast %279 : vector<1x8x128xf32> to vector<8x128xf32>
    %281 = vector.shape_cast %278 : vector<8x128xf32> to vector<1x8x128xf32>
    tpu.vector_store %arg8[%c3, %c0_104, %c0_105], %281 {strides = array<i32>} : memref<6x8x128xf32, #tpu.memory_space<vmem>>, vector<1x8x128xf32>,
    %c3_106 = arith.constant 3 : index
    %282 = memref.load %arg2[%c3_106] : memref<6xi32, #tpu.memory_space<smem>>
    %c1_i32_107 = arith.constant 1 : i32
    %283 = arith.cmpi eq, %282, %c1_i32_107 : i32
    %284 = arith.extui %283 : i1 to i32
    %c0_i32_108 = arith.constant 0 : i32
    %285 = arith.cmpi ne, %284, %c0_i32_108 : i32
    scf.if %285 {
      %c3_138 = arith.constant 3 : index
      %c0_139 = arith.constant 0 : index
      %c0_140 = arith.constant 0 : index
      %346 = vector.load %arg1[%c3_138, %c0_139, %c0_140] : memref<6x8x512xf32, #tpu.memory_space<vmem>>, vector<1x8x512xf32>
      %347 = vector.shape_cast %346 : vector<1x8x512xf32> to vector<8x512xf32>
      %c0_141 = arith.constant 0 : index
      %c0_142 = arith.constant 0 : index
      %348 = vector.load %arg9[%c0_141, %c0_142] : memref<8x512xf32, #tpu.memory_space<vmem>>, vector<8x512xf32>
      tpu.vector_store %arg9[%c0_141, %c0_142], %347 {strides = array<i32>} : memref<8x512xf32, #tpu.memory_space<vmem>>, vector<8x512xf32>,
    } else {
    }
    %c0_i32_109 = arith.constant 0 : i32
    %286 = arith.cmpi eq, %282, %c0_i32_109 : i32
    %287 = arith.extui %286 : i1 to i32
    %c0_i32_110 = arith.constant 0 : i32
    %288 = arith.cmpi ne, %287, %c0_i32_110 : i32
    scf.if %288 {
      %cst_138 = arith.constant dense<0xFF800000> : vector<8xf32>
      %346 = vector.multi_reduction <maximumf>, %278, %cst_138 [1] : vector<8x128xf32> to vector<8xf32>
      %347 = vector.shape_cast %346 : vector<8xf32> to vector<8x1xf32>
      %348 = vector.broadcast %347 : vector<8x1xf32> to vector<8x128xf32>
      %349 = arith.cmpf oge, %278, %348 : vector<8x128xf32>
      %c128_i32 = arith.constant 128 : i32
      %350 = vector.broadcast %c128_i32 : i32 to vector<8x128xi32>
      %351 = arith.select %349, %3, %350 : vector<8x128xi1>, vector<8x128xi32>
      %cst_139 = arith.constant dense<2147483647> : vector<8xi32>
      %352 = vector.multi_reduction <minsi>, %351, %cst_139 [1] : vector<8x128xi32> to vector<8xi32>
      %353 = vector.shape_cast %352 : vector<8xi32> to vector<8x1xi32>
      %354 = vector.broadcast %353 : vector<8x1xi32> to vector<8x128xi32>
      %355 = arith.cmpi eq, %3, %354 : vector<8x128xi32>
      %356 = arith.extui %355 : vector<8x128xi1> to vector<8x128xi32>
      %357 = arith.sitofp %356 : vector<8x128xi32> to vector<8x128xf32>
      %c0_140 = arith.constant 0 : index
      %c0_141 = arith.constant 0 : index
      %358 = vector.load %arg5[%c0_140, %c0_141] : memref<128x512xf32, #tpu.memory_space<vmem>>, vector<128x512xf32>
      %cst_142 = arith.constant dense<0.000000e+00> : vector<8x512xf32>
      %359 = tpu.matmul %357, %358, %cst_142 {dimension_numbers = #tpu.dot_dimension_numbers<[1], [0], [0], [1], [0, 0, 1, 1], [], []>} : vector<8x128xf32>, vector<128x512xf32>, vector<8x512xf32> -> vector<8x512xf32>
      %c0_143 = arith.constant 0 : index
      %c0_144 = arith.constant 0 : index
      %360 = vector.load %arg9[%c0_143, %c0_144] : memref<8x512xf32, #tpu.memory_space<vmem>>, vector<8x512xf32>
      tpu.vector_store %arg9[%c0_143, %c0_144], %359 {strides = array<i32>} : memref<8x512xf32, #tpu.memory_space<vmem>>, vector<8x512xf32>,
    } else {
    }
    %c0_111 = arith.constant 0 : index
    %c0_112 = arith.constant 0 : index
    %289 = vector.load %arg9[%c0_111, %c0_112] : memref<8x512xf32, #tpu.memory_space<vmem>>, vector<8x512xf32>
    %c0_113 = arith.constant 0 : index
    %c0_114 = arith.constant 0 : index
    %290 = vector.load %arg4[%c0_113, %c0_114] : memref<128x512xf32, #tpu.memory_space<vmem>>, vector<128x512xf32>
    %cst_115 = arith.constant dense<0.000000e+00> : vector<8x512xf32>
    %291 = tpu.matmul %275, %290, %cst_115 {dimension_numbers = #tpu.dot_dimension_numbers<[1], [0], [0], [1], [0, 0, 1, 1], [], []>} : vector<8x128xf32>, vector<128x512xf32>, vector<8x512xf32> -> vector<8x512xf32>
    %292 = arith.addf %289, %291 : vector<8x512xf32>
    %293 = arith.negf %292 : vector<8x512xf32>
    %294 = math.exp %293 : vector<8x512xf32>
    %cst_116 = arith.constant 1.000000e+00 : f32
    %295 = vector.broadcast %cst_116 : f32 to vector<8x512xf32>
    %296 = arith.addf %295, %294 : vector<8x512xf32>
    %297 = arith.divf %295, %296 : vector<8x512xf32>
    %298 = math.tanh %292 : vector<8x512xf32>
    %299 = vector.extract_strided_slice %297 {offsets = [0, 0], sizes = [8, 128], strides = [1, 1]} : vector<8x512xf32> to vector<8x128xf32>
    %300 = vector.extract_strided_slice %297 {offsets = [0, 128], sizes = [8, 128], strides = [1, 1]} : vector<8x512xf32> to vector<8x128xf32>
    %301 = vector.extract_strided_slice %298 {offsets = [0, 256], sizes = [8, 128], strides = [1, 1]} : vector<8x512xf32> to vector<8x128xf32>
    %302 = vector.extract_strided_slice %297 {offsets = [0, 384], sizes = [8, 128], strides = [1, 1]} : vector<8x512xf32> to vector<8x128xf32>
    %303 = arith.mulf %300, %273 : vector<8x128xf32>
    %304 = arith.mulf %299, %301 : vector<8x128xf32>
    %305 = arith.addf %303, %304 : vector<8x128xf32>
    %306 = math.tanh %305 : vector<8x128xf32>
    %307 = arith.mulf %302, %306 : vector<8x128xf32>
    %c0_117 = arith.constant 0 : index
    %c0_118 = arith.constant 0 : index
    %308 = vector.load %arg6[%c0_117, %c0_118] : memref<128x128xf32, #tpu.memory_space<vmem>>, vector<128x128xf32>
    %cst_119 = arith.constant dense<0.000000e+00> : vector<8x128xf32>
    %309 = tpu.matmul %307, %308, %cst_119 {dimension_numbers = #tpu.dot_dimension_numbers<[1], [0], [0], [1], [0, 0, 1, 1], [], []>} : vector<8x128xf32>, vector<128x128xf32>, vector<8x128xf32> -> vector<8x128xf32>
    %310 = arith.addf %309, %2 : vector<8x128xf32>
    %c4 = arith.constant 4 : index
    %c0_120 = arith.constant 0 : index
    %c0_121 = arith.constant 0 : index
    %311 = vector.load %arg8[%c4, %c0_120, %c0_121] : memref<6x8x128xf32, #tpu.memory_space<vmem>>, vector<1x8x128xf32>
    %312 = vector.shape_cast %311 : vector<1x8x128xf32> to vector<8x128xf32>
    %313 = vector.shape_cast %310 : vector<8x128xf32> to vector<1x8x128xf32>
    tpu.vector_store %arg8[%c4, %c0_120, %c0_121], %313 {strides = array<i32>} : memref<6x8x128xf32, #tpu.memory_space<vmem>>, vector<1x8x128xf32>,
    %c4_122 = arith.constant 4 : index
    %314 = memref.load %arg2[%c4_122] : memref<6xi32, #tpu.memory_space<smem>>
    %c1_i32_123 = arith.constant 1 : i32
    %315 = arith.cmpi eq, %314, %c1_i32_123 : i32
    %316 = arith.extui %315 : i1 to i32
    %c0_i32_124 = arith.constant 0 : i32
    %317 = arith.cmpi ne, %316, %c0_i32_124 : i32
    scf.if %317 {
      %c4_138 = arith.constant 4 : index
      %c0_139 = arith.constant 0 : index
      %c0_140 = arith.constant 0 : index
      %346 = vector.load %arg1[%c4_138, %c0_139, %c0_140] : memref<6x8x512xf32, #tpu.memory_space<vmem>>, vector<1x8x512xf32>
      %347 = vector.shape_cast %346 : vector<1x8x512xf32> to vector<8x512xf32>
      %c0_141 = arith.constant 0 : index
      %c0_142 = arith.constant 0 : index
      %348 = vector.load %arg9[%c0_141, %c0_142] : memref<8x512xf32, #tpu.memory_space<vmem>>, vector<8x512xf32>
      tpu.vector_store %arg9[%c0_141, %c0_142], %347 {strides = array<i32>} : memref<8x512xf32, #tpu.memory_space<vmem>>, vector<8x512xf32>,
    } else {
    }
    %c0_i32_125 = arith.constant 0 : i32
    %318 = arith.cmpi eq, %314, %c0_i32_125 : i32
    %319 = arith.extui %318 : i1 to i32
    %c0_i32_126 = arith.constant 0 : i32
    %320 = arith.cmpi ne, %319, %c0_i32_126 : i32
    scf.if %320 {
      %cst_138 = arith.constant dense<0xFF800000> : vector<8xf32>
      %346 = vector.multi_reduction <maximumf>, %310, %cst_138 [1] : vector<8x128xf32> to vector<8xf32>
      %347 = vector.shape_cast %346 : vector<8xf32> to vector<8x1xf32>
      %348 = vector.broadcast %347 : vector<8x1xf32> to vector<8x128xf32>
      %349 = arith.cmpf oge, %310, %348 : vector<8x128xf32>
      %c128_i32 = arith.constant 128 : i32
      %350 = vector.broadcast %c128_i32 : i32 to vector<8x128xi32>
      %351 = arith.select %349, %3, %350 : vector<8x128xi1>, vector<8x128xi32>
      %cst_139 = arith.constant dense<2147483647> : vector<8xi32>
      %352 = vector.multi_reduction <minsi>, %351, %cst_139 [1] : vector<8x128xi32> to vector<8xi32>
      %353 = vector.shape_cast %352 : vector<8xi32> to vector<8x1xi32>
      %354 = vector.broadcast %353 : vector<8x1xi32> to vector<8x128xi32>
      %355 = arith.cmpi eq, %3, %354 : vector<8x128xi32>
      %356 = arith.extui %355 : vector<8x128xi1> to vector<8x128xi32>
      %357 = arith.sitofp %356 : vector<8x128xi32> to vector<8x128xf32>
      %c0_140 = arith.constant 0 : index
      %c0_141 = arith.constant 0 : index
      %358 = vector.load %arg5[%c0_140, %c0_141] : memref<128x512xf32, #tpu.memory_space<vmem>>, vector<128x512xf32>
      %cst_142 = arith.constant dense<0.000000e+00> : vector<8x512xf32>
      %359 = tpu.matmul %357, %358, %cst_142 {dimension_numbers = #tpu.dot_dimension_numbers<[1], [0], [0], [1], [0, 0, 1, 1], [], []>} : vector<8x128xf32>, vector<128x512xf32>, vector<8x512xf32> -> vector<8x512xf32>
      %c0_143 = arith.constant 0 : index
      %c0_144 = arith.constant 0 : index
      %360 = vector.load %arg9[%c0_143, %c0_144] : memref<8x512xf32, #tpu.memory_space<vmem>>, vector<8x512xf32>
      tpu.vector_store %arg9[%c0_143, %c0_144], %359 {strides = array<i32>} : memref<8x512xf32, #tpu.memory_space<vmem>>, vector<8x512xf32>,
    } else {
    }
    %c0_127 = arith.constant 0 : index
    %c0_128 = arith.constant 0 : index
    %321 = vector.load %arg9[%c0_127, %c0_128] : memref<8x512xf32, #tpu.memory_space<vmem>>, vector<8x512xf32>
    %c0_129 = arith.constant 0 : index
    %c0_130 = arith.constant 0 : index
    %322 = vector.load %arg4[%c0_129, %c0_130] : memref<128x512xf32, #tpu.memory_space<vmem>>, vector<128x512xf32>
    %cst_131 = arith.constant dense<0.000000e+00> : vector<8x512xf32>
    %323 = tpu.matmul %307, %322, %cst_131 {dimension_numbers = #tpu.dot_dimension_numbers<[1], [0], [0], [1], [0, 0, 1, 1], [], []>} : vector<8x128xf32>, vector<128x512xf32>, vector<8x512xf32> -> vector<8x512xf32>
    %324 = arith.addf %321, %323 : vector<8x512xf32>
    %325 = arith.negf %324 : vector<8x512xf32>
    %326 = math.exp %325 : vector<8x512xf32>
    %cst_132 = arith.constant 1.000000e+00 : f32
    %327 = vector.broadcast %cst_132 : f32 to vector<8x512xf32>
    %328 = arith.addf %327, %326 : vector<8x512xf32>
    %329 = arith.divf %327, %328 : vector<8x512xf32>
    %330 = math.tanh %324 : vector<8x512xf32>
    %331 = vector.extract_strided_slice %329 {offsets = [0, 0], sizes = [8, 128], strides = [1, 1]} : vector<8x512xf32> to vector<8x128xf32>
    %332 = vector.extract_strided_slice %329 {offsets = [0, 128], sizes = [8, 128], strides = [1, 1]} : vector<8x512xf32> to vector<8x128xf32>
    %333 = vector.extract_strided_slice %330 {offsets = [0, 256], sizes = [8, 128], strides = [1, 1]} : vector<8x512xf32> to vector<8x128xf32>
    %334 = vector.extract_strided_slice %329 {offsets = [0, 384], sizes = [8, 128], strides = [1, 1]} : vector<8x512xf32> to vector<8x128xf32>
    %335 = arith.mulf %332, %305 : vector<8x128xf32>
    %336 = arith.mulf %331, %333 : vector<8x128xf32>
    %337 = arith.addf %335, %336 : vector<8x128xf32>
    %338 = math.tanh %337 : vector<8x128xf32>
    %339 = arith.mulf %334, %338 : vector<8x128xf32>
    %c0_133 = arith.constant 0 : index
    %c0_134 = arith.constant 0 : index
    %340 = vector.load %arg6[%c0_133, %c0_134] : memref<128x128xf32, #tpu.memory_space<vmem>>, vector<128x128xf32>
    %cst_135 = arith.constant dense<0.000000e+00> : vector<8x128xf32>
    %341 = tpu.matmul %339, %340, %cst_135 {dimension_numbers = #tpu.dot_dimension_numbers<[1], [0], [0], [1], [0, 0, 1, 1], [], []>} : vector<8x128xf32>, vector<128x128xf32>, vector<8x128xf32> -> vector<8x128xf32>
    %342 = arith.addf %341, %2 : vector<8x128xf32>
    %c5 = arith.constant 5 : index
    %c0_136 = arith.constant 0 : index
    %c0_137 = arith.constant 0 : index
    %343 = vector.load %arg8[%c5, %c0_136, %c0_137] : memref<6x8x128xf32, #tpu.memory_space<vmem>>, vector<1x8x128xf32>
    %344 = vector.shape_cast %343 : vector<1x8x128xf32> to vector<8x128xf32>
    %345 = vector.shape_cast %342 : vector<8x128xf32> to vector<1x8x128xf32>
    tpu.vector_store %arg8[%c5, %c0_136, %c0_137], %345 {strides = array<i32>} : memref<6x8x128xf32, #tpu.memory_space<vmem>>, vector<1x8x128xf32>,
    return
  }
}

</mosaic_0001>

<bundles_post_ra>
// kernel: tpu_custom_call.1
= control target key start
LH: loop header
LB: loop body
LE: loop exit
PB: predicated region body
PF: predicated region fallthrough
CT: control target
= control target key end

     0   :  { %13 = vsyncpa [#allocation4], 0  ;;  %s6848_s0 = inlined_call_operand.hbm [shape: f32[64,512], index: 0, kind: input, shape index: {}]   ;;  %s6849_s1 = inlined_call_operand.hbm [shape: f32[6,8,512], index: 1, kind: input, shape index: {}]   ;;  %s6850_s2 = inlined_call_operand.vmem [shape: s32[6], index: 2, kind: input, shape index: {}]   ;;  %s6851_s3 = inlined_call_operand.hbm [shape: f32[128,512], index: 3, kind: input, shape index: {}]   ;;  %s6852_s4 = inlined_call_operand.hbm [shape: f32[128,512], index: 4, kind: input, shape index: {}]   ;;  %s6853_s5 = inlined_call_operand.hbm [shape: f32[128,512], index: 5, kind: input, shape index: {}]   ;;  %s6854_s6 = inlined_call_operand.hbm [shape: f32[128,128], index: 6, kind: input, shape index: {}]   ;;  %s6855_s7 = inlined_call_operand.vmem [shape: f32[1,128], index: 7, kind: input, shape index: {}]   ;;  %s6856_s8 = inlined_call_operand.hbm [shape: f32[6,8,128], index: 8, kind: output, shape index: {}]  }
   0x1   :  { %14 = vsyncpa [#allocation8], 0 }
   0x2   :  { %15 = vsyncpa [#allocation6], 0 }
   0x3   :  { %16 = vsyncpa [#allocation12], 0 }
   0x4   :  { %17 = vsyncpa [#allocation15], 0 }
   0x5   :  { %18 = vsyncpa [#allocation5], 0  ;;  %s5680_s27 = smov [#allocation7]   ;;  %s5681_s29 = smov [#allocation11]  }
   0x6   :  { %s36_s28 = sshll.u32 %s5680_s27, 4  ;;  %s70_s30 = sshll.u32 %s5681_s29, 4  ;;  %s37_s28 = int_to_ptr.vmem [resolvable:$true] %s36_s28  ;;  %s71_s30 = int_to_ptr.vmem [resolvable:$true] %s70_s30 }
   0x7   :  { %s5522_s9 = scalar_lea.vmem %s37_s28, 3072  ;;  %p5527_p1 = scmp.lt.s32.totalorder %s37_s28, %s37_s28 }
   0x8   :  { %p5523_p0 = scmp.ne.s32.totalorder %s37_s28, %s5522_s9  ;;  %p5528_p2 = scmp.lt.s32.totalorder %s5522_s9, %s5522_s9 }
   0xa   :  { %p5529_p3 = por %p5528_p2, %p5527_p1 }
   0xc   :  { %p5530_p4 = pnand %p5529_p3, %p5523_p0 }
   0xe   :  { %5533 = shalt.err (!%p5530_p4)
}
   0xf   :  { %s5682_s10 = smov 512   ;;  %s5683_s11 = smov 32  }
  0x10   :  { %42 = dma.hbm_to_vmem [thread:$0]  %s6849_s1, 3072, %s37_s28, [#allocation8], %s5682_s10, %s5682_s10, %s5683_s11  }
  0x11   :  { %s5542_s14 = scalar_lea.vmem %s71_s30, 8192  ;;  %p5547_p6 = scmp.lt.s32.totalorder %s71_s30, %s71_s30 }
  0x12   :  { %p5543_p5 = scmp.ne.s32.totalorder %s71_s30, %s5542_s14  ;;  %p5548_p7 = scmp.lt.s32.totalorder %s5542_s14, %s5542_s14 }
  0x14   :  { %p5549_p8 = por %p5548_p7, %p5547_p6 }
  0x16   :  { %p5550_p9 = pnand %p5549_p8, %p5543_p5 }
  0x18   :  { %5553 = shalt.err (!%p5550_p9)
}
  0x19   :  { %76 = dma.hbm_to_vmem [thread:$0]  %s6852_s4, 8192, %s71_s30, [#allocation12], %s5682_s10, %s5682_s10, %s5683_s11  }
  0x1a   :  { %s49_s19 = sshll.u32 %s6850_s2, 4  ;;  %s5684_s20 = smov [#allocation3]   ;;  %s50_s19 = int_to_ptr.vmem [resolvable:$true] %s49_s19 }
  0x1b   :  { %s24_s1 = sshll.u32 %s5684_s20, 4  ;;  %s25_s1 = int_to_ptr.vmem [resolvable:$true] %s24_s1 }
  0x1c   :  { %s5562_s21 = scalar_lea.vmem %s25_s1, 4096  ;;  %p5567_p11 = scmp.lt.s32.totalorder %s25_s1, %s25_s1 }
  0x1d   :  { %p5563_p10 = scmp.ne.s32.totalorder %s25_s1, %s5562_s21  ;;  %p5568_p12 = scmp.lt.s32.totalorder %s5562_s21, %s5562_s21 }
  0x1f   :  { %p5569_p13 = por %p5568_p12, %p5567_p11 }
  0x21   :  { %p5570_p0 = pnand %p5569_p13, %p5563_p10 }
  0x23   :  { %5573 = shalt.err (!%p5570_p0)
}
  0x24   :  { %30 = dma.hbm_to_vmem [thread:$0]  %s6848_s0, 4096, %s25_s1, [#allocation4], %s5682_s10, %s5682_s10, %s5683_s11  }
  0x25   :  { %s5574_s23 = scalar_lea.vmem %s50_s19, 16  ;;  %p5579_p2 = scmp.lt.s32.totalorder %s50_s19, %s50_s19 }
  0x26   :  { %p5575_p1 = scmp.ne.s32.totalorder %s50_s19, %s5574_s23  ;;  %p5580_p3 = scmp.lt.s32.totalorder %s5574_s23, %s5574_s23 }
  0x28   :  { %p5581_p4 = por %p5580_p3, %p5579_p2 }
  0x2a   :  { %p5582_p5 = pnand %p5581_p4, %p5575_p1 }
  0x2c   :  { %5585 = shalt.err (!%p5582_p5)
}
  0x2d   :  { %s5685_s2 = smov [#allocation9]   ;;  %s5686_s24 = smov [#allocation10]  }
  0x2e   :  { %52 = dma.vmem_to_smem %s50_s19, 16, %s5685_s2, [#allocation6]  }
  0x2f   :  { %s58_s25 = sshll.u32 %s5686_s24, 4  ;;  %s5687_s26 = smov [#allocation13]   ;;  %s59_s25 = int_to_ptr.vmem [resolvable:$true] %s58_s25 }
  0x30   :  { %s82_s27 = sshll.u32 %s5687_s26, 4  ;;  %s5594_s28 = scalar_lea.vmem %s59_s25, 8192  ;;  %s83_s27 = int_to_ptr.vmem [resolvable:$true] %s82_s27 }
  0x31   :  { %p5595_p6 = scmp.ne.s32.totalorder %s59_s25, %s5594_s28  ;;  %p5599_p7 = scmp.lt.s32.totalorder %s59_s25, %s59_s25 }
  0x32   :  { %p5600_p8 = scmp.lt.s32.totalorder %s5594_s28, %s5594_s28 }
  0x34   :  { %p5601_p9 = por %p5600_p8, %p5599_p7 }
  0x36   :  { %p5602_p10 = pnand %p5601_p9, %p5595_p6 }
  0x38   :  { %5605 = shalt.err (!%p5602_p10)
}
  0x39   :  { %64 = dma.hbm_to_vmem [thread:$0]  %s6851_s3, 8192, %s59_s25, [#allocation8], %s5682_s10, %s5682_s10, %s5683_s11  }
  0x3a   :  { %s5614_s30 = scalar_lea.vmem %s83_s27, 8192  ;;  %p5619_p12 = scmp.lt.s32.totalorder %s83_s27, %s83_s27 }
  0x3b   :  { %p5615_p11 = scmp.ne.s32.totalorder %s83_s27, %s5614_s30  ;;  %p5620_p13 = scmp.lt.s32.totalorder %s5614_s30, %s5614_s30 }
  0x3d   :  { %p5621_p0 = por %p5620_p13, %p5619_p12 }
  0x3f   :  { %p5622_p1 = pnand %p5621_p0, %p5615_p11 }
  0x41   :  { %5625 = shalt.err (!%p5622_p1)
}
  0x42   :  { %88 = dma.hbm_to_vmem [thread:$0]  %s6853_s5, 8192, %s83_s27, [#allocation12], %s5682_s10, %s5682_s10, %s5683_s11  }
  0x43   :  { %s5688_s13 = smov [#allocation14]  }
  0x44   :  { %s94_s14 = sshll.u32 %s5688_s13, 4  ;;  %s95_s14 = int_to_ptr.vmem [resolvable:$true] %s94_s14 }
  0x45   :  { %s5634_s15 = scalar_lea.vmem %s95_s14, 2048  ;;  %p5639_p3 = scmp.lt.s32.totalorder %s95_s14, %s95_s14 }
  0x46   :  { %p5635_p2 = scmp.ne.s32.totalorder %s95_s14, %s5634_s15  ;;  %p5640_p4 = scmp.lt.s32.totalorder %s5634_s15, %s5634_s15 }
  0x48   :  { %p5641_p5 = por %p5640_p4, %p5639_p3 }
  0x4a   :  { %p5642_p6 = pnand %p5641_p5, %p5635_p2 }
  0x4c   :  { %5645 = shalt.err (!%p5642_p6)
}
  0x4d   :  { %s5689_s3 = smov 128   ;;  %s5690_s16 = smov 8  }
  0x4e   :  { %100 = dma.hbm_to_vmem [thread:$0]  %s6854_s6, 2048, %s95_s14, [#allocation15], %s5689_s3, %s5689_s3, %s5690_s16  }
  0x4f   :  { %5666 = dma.done.wait [#allocation4], 4096  }
  0x50   :  { %5667 = vsyncadd [#allocation4], 4294963200 }
  0x51   :  { %5668 = dma.done.wait [#allocation8], 3072  }
  0x52   :  { %5669 = vsyncadd [#allocation8], 4294964224 }
  0x53   :  { %5670 = dma.done.wait [#allocation6], 16  }
  0x54   :  { %5671 = vsyncadd [#allocation6], 4294967280 }
  0x55   :  { %5672 = dma.done.wait [#allocation8], 8192  }
  0x56   :  { %5673 = vsyncadd [#allocation8], 4294959104 }
  0x57   :  { %5674 = dma.done.wait [#allocation12], 16384  }
  0x58   :  { %5675 = vsyncadd [#allocation12], 4294950912 }
  0x59   :  { %5676 = dma.done.wait [#allocation15], 2048  }
  0x5a   :  { %5677 = vsyncadd [#allocation15], 4294965248 }
  0x5b   :  { %124 = sfence }
  0x5c   :  { %v132_v0 = vlaneseq  ;;  %v5788_v1 = vld [vmem:[#allocation10 + $0x1e8] sm:$0xff]  ;;  %v5790_v2 = vld [vmem:[#allocation10 + $0x1e0] sm:$0xff]  ;;  %v6864_v5 = vmov 0.0   ;;  %v5813_v11 = vld [vmem:[#allocation10 + $0x1f8] sm:$0xff]  ;;  %vm5692_vm0 = vmmov 0   ;;  %s1923_s5 = sld [smem:[#allocation9]] }
  0x5d   :  { %6936 = vst [vmem:[#allocation24_spill] sm:$0xff] %v5788_v1  ;;  %v5792_v3 = vld [vmem:[#allocation10 + $0x1c8] sm:$0xff]  ;;  %202 = vmatprep.subr.mxu0 %v5788_v1  ;;  %v5795_v4 = vld [vmem:[#allocation10 + $0x1c0] sm:$0xff]  ;;  %266 = vmatprep.mubr.f32.mxu0 %v6864_v5  ;;  %6938 = vst [vmem:[#allocation26_spill] sm:$0xff] %v5813_v11 }
  0x5e   :  { %v5798_v6 = vand.u32 127, %v132_v0  ;;  %203 = vmatpush1.msra.mxu0 %v5790_v2  ;;  %v5801_v7 = vld [vmem:[#allocation10 + $0x1a8] sm:$0xff]  ;;  %337 = vmatprep.mubr.f32.mxu1 %v6864_v5  ;;  %v5805_v8 = vld [vmem:[#allocation10 + $0x1a0] sm:$0xff]  ;;  %v5819_v13 = vld [vmem:[#allocation10 + $0x1f0] sm:$0xff] }
  0x5f   :  { %204 = vmatprep.subr.mxu0 %v5792_v3  ;;  %v5808_v9 = vld [vmem:[#allocation10 + $0x188] sm:$0xff]  ;;  %v5811_v10 = vld [vmem:[#allocation10 + $0x180] sm:$0xff]  ;;  %273 = vmatprep.subr.mxu1 %v5813_v11  ;;  %v5825_v15 = vld [vmem:[#allocation10 + $0x1d8] sm:$0xff] }
  0x60   :  { %6937 = vst [vmem:[#allocation25_spill] sm:$0xff] %v5798_v6  ;;  %205 = vmatpush1.msra.mxu0 %v5795_v4  ;;  %v5816_v12 = vld [vmem:[#allocation10 + $0x168] sm:$0xff]  ;;  %v5822_v14 = vld [vmem:[#allocation10 + $0x160] sm:$0xff]  ;;  %274 = vmatpush1.msra.mxu1 %v5819_v13  ;;  %v5827_v16 = vld [vmem:[#allocation10 + $0x1d0] sm:$0xff] }
  0x61   :  { %206 = vmatprep.subr.mxu0 %v5801_v7  ;;  %v5830_v17 = vld [vmem:[#allocation10 + $0x148] sm:$0xff]  ;;  %275 = vmatprep.subr.mxu1 %v5825_v15  ;;  %v5833_v18 = vld [vmem:[#allocation10 + $0x1b8] sm:$0xff]  ;;  %v5836_v19 = vld [vmem:[#allocation10 + $0x140] sm:$0xff] }
  0x62   :  { %207 = vmatpush1.msra.mxu0 %v5805_v8  ;;  %276 = vmatpush1.msra.mxu1 %v5827_v16  ;;  %v5839_v20 = vld [vmem:[#allocation10 + $0x1b0] sm:$0xff]  ;;  %v5841_v21 = vld [vmem:[#allocation10 + $0x198] sm:$0xff]  ;;  %v5844_v22 = vld [vmem:[#allocation10 + $0x128] sm:$0xff]  ;;  %p4846_p7 = scmp.ne.s32.totalorder %s1923_s5, 1 }
  0x63   :  { %208 = vmatprep.subr.mxu0 %v5808_v9  ;;  %277 = vmatprep.subr.mxu1 %v5833_v18  ;;  %v5847_v23 = vld [vmem:[#allocation10 + $0x190] sm:$0xff]  ;;  %v5850_v24 = vld [vmem:[#allocation10 + $0x120] sm:$0xff]  ;;  %v5853_v25 = vld [vmem:[#allocation10 + $0x178] sm:$0xff] }
  0x64   :  { %209 = vmatpush1.msra.mxu0 %v5811_v10  ;;  %278 = vmatpush1.msra.mxu1 %v5839_v20  ;;  %v5856_v26 = vld [vmem:[#allocation10 + $0x108] sm:$0xff]  ;;  %v5859_v27 = vld [vmem:[#allocation10 + $0x170] sm:$0xff]  ;;  %v5862_v28 = vld [vmem:[#allocation10 + $0x100] sm:$0xff] }
  0x65   :  { %210 = vmatprep.subr.mxu0 %v5816_v12  ;;  %279 = vmatprep.subr.mxu1 %v5841_v21  ;;  %v5865_v29 = vld [vmem:[#allocation10 + $0x158] sm:$0xff]  ;;  %v5868_v30 = vld [vmem:[#allocation10 + $0xe8] sm:$0xff]  ;;  %v5871_v31 = vld [vmem:[#allocation10 + $0x150] sm:$0xff] }
  0x66   :  { %211 = vmatpush1.msra.mxu0 %v5822_v14  ;;  %280 = vmatpush1.msra.mxu1 %v5847_v23  ;;  %v5874_v32 = vld [vmem:[#allocation10 + $0xe0] sm:$0xff]  ;;  %v5877_v33 = vld [vmem:[#allocation10 + $0x138] sm:$0xff]  ;;  %v5880_v34 = vld [vmem:[#allocation10 + $0xc8] sm:$0xff] }
  0x67   :  { %212 = vmatprep.subr.mxu0 %v5830_v17  ;;  %281 = vmatprep.subr.mxu1 %v5853_v25  ;;  %v5883_v35 = vld [vmem:[#allocation10 + $0x130] sm:$0xff]  ;;  %v5886_v36 = vld [vmem:[#allocation10 + $0xc0] sm:$0xff]  ;;  %v5889_v37 = vld [vmem:[#allocation10 + $0x118] sm:$0xff] }
  0x68   :  { %213 = vmatpush1.msra.mxu0 %v5836_v19  ;;  %282 = vmatpush1.msra.mxu1 %v5859_v27  ;;  %v5892_v38 = vld [vmem:[#allocation10 + $0xa8] sm:$0xff]  ;;  %v5895_v39 = vld [vmem:[#allocation10 + $0x110] sm:$0xff]  ;;  %v5898_v40 = vld [vmem:[#allocation10 + $0xa0] sm:$0xff] }
  0x69   :  { %214 = vmatprep.subr.mxu0 %v5844_v22  ;;  %283 = vmatprep.subr.mxu1 %v5865_v29  ;;  %v5901_v41 = vld [vmem:[#allocation10 + $0xf8] sm:$0xff]  ;;  %v5904_v42 = vld [vmem:[#allocation10 + $0x88] sm:$0xff]  ;;  %v5907_v43 = vld [vmem:[#allocation10 + $0xf0] sm:$0xff] }
  0x6a   :  { %215 = vmatpush1.msra.mxu0 %v5850_v24  ;;  %284 = vmatpush1.msra.mxu1 %v5871_v31  ;;  %v5910_v44 = vld [vmem:[#allocation10 + $0x80] sm:$0xff]  ;;  %v5913_v45 = vld [vmem:[#allocation10 + $0xd8] sm:$0xff]  ;;  %v5916_v46 = vld [vmem:[#allocation10 + $0x68] sm:$0xff] }
  0x6b   :  { %216 = vmatprep.subr.mxu0 %v5856_v26  ;;  %285 = vmatprep.subr.mxu1 %v5877_v33  ;;  %6939 = vst [vmem:[#allocation27_spill] sm:$0xff] %v5910_v44  ;;  %6940 = vst [vmem:[#allocation28_spill] sm:$0xff] %v5916_v46  ;;  %v5919_v47 = vld [vmem:[#allocation10 + $0xd0] sm:$0xff]  ;;  %v5922_v48 = vld [vmem:[#allocation10 + $0x60] sm:$0xff] }
  0x6c   :  { %217 = vmatpush1.msra.mxu0 %v5862_v28  ;;  %286 = vmatpush1.msra.mxu1 %v5883_v35  ;;  %6941 = vst [vmem:[#allocation29_spill] sm:$0xff] %v5922_v48  ;;  %v5925_v49 = vld [vmem:[#allocation10 + $0xb8] sm:$0xff]  ;;  %v5928_v50 = vld [vmem:[#allocation10 + $0x48] sm:$0xff]  ;;  %v5931_v51 = vld [vmem:[#allocation10 + $0xb0] sm:$0xff] }
  0x6d   :  { %218 = vmatprep.subr.mxu0 %v5868_v30  ;;  %287 = vmatprep.subr.mxu1 %v5889_v37  ;;  %6942 = vst [vmem:[#allocation30_spill] sm:$0xff] %v5928_v50  ;;  %v5934_v52 = vld [vmem:[#allocation10 + $0x40] sm:$0xff]  ;;  %v5937_v53 = vld [vmem:[#allocation10 + $0x98] sm:$0xff]  ;;  %v5940_v54 = vld [vmem:[#allocation10 + $0x28] sm:$0xff] }
  0x6e   :  { %219 = vmatpush1.msra.mxu0 %v5874_v32  ;;  %288 = vmatpush1.msra.mxu1 %v5895_v39  ;;  %6943 = vst [vmem:[#allocation31_spill] sm:$0xff] %v5934_v52  ;;  %6944 = vst [vmem:[#allocation32_spill] sm:$0xff] %v5940_v54  ;;  %v5943_v55 = vld [vmem:[#allocation10 + $0x90] sm:$0xff]  ;;  %v5946_v56 = vld [vmem:[#allocation10 + $0x20] sm:$0xff] }
  0x6f   :  { %220 = vmatprep.subr.mxu0 %v5880_v34  ;;  %289 = vmatprep.subr.mxu1 %v5901_v41  ;;  %6945 = vst [vmem:[#allocation33_spill] sm:$0xff] %v5943_v55  ;;  %6946 = vst [vmem:[#allocation34_spill] sm:$0xff] %v5946_v56  ;;  %v5949_v57 = vld [vmem:[#allocation10 + $0x78] sm:$0xff]  ;;  %v5952_v58 = vld [vmem:[#allocation10 + $0x8] sm:$0xff] }
  0x70   :  { %221 = vmatpush1.msra.mxu0 %v5886_v36  ;;  %290 = vmatpush1.msra.mxu1 %v5907_v43  ;;  %6947 = vst [vmem:[#allocation35_spill] sm:$0xff] %v5949_v57  ;;  %6948 = vst [vmem:[#allocation36_spill] sm:$0xff] %v5952_v58  ;;  %v5955_v59 = vld [vmem:[#allocation10 + $0x70] sm:$0xff]  ;;  %v5958_v60 = vld [vmem:[#allocation10] sm:$0xff] }
  0x71   :  { %222 = vmatprep.subr.mxu0 %v5892_v38  ;;  %291 = vmatprep.subr.mxu1 %v5913_v45  ;;  %6949 = vst [vmem:[#allocation37_spill] sm:$0xff] %v5955_v59  ;;  %6950 = vst [vmem:[#allocation38_spill] sm:$0xff] %v5958_v60  ;;  %v5961_v61 = vld [vmem:[#allocation10 + $0x58] sm:$0xff]  ;;  %v5965_v62 = vld [vmem:[#allocation10 + $0x50] sm:$0xff] }
  0x72   :  { %223 = vmatpush1.msra.mxu0 %v5898_v40  ;;  %292 = vmatpush1.msra.mxu1 %v5919_v47  ;;  %6951 = vst [vmem:[#allocation39_spill] sm:$0xff] %v5961_v61  ;;  %6952 = vst [vmem:[#allocation40_spill] sm:$0xff] %v5965_v62  ;;  %v5969_v63 = vld [vmem:[#allocation10 + $0x38] sm:$0xff]  ;;  %v5973_v0 = vld [vmem:[#allocation10 + $0x30] sm:$0xff] }
  0x73   :  { %224 = vmatprep.subr.mxu0 %v5904_v42  ;;  %293 = vmatprep.subr.mxu1 %v5925_v49  ;;  %6953 = vst [vmem:[#allocation41_spill] sm:$0xff] %v5969_v63  ;;  %6954 = vst [vmem:[#allocation42_spill] sm:$0xff] %v5973_v0  ;;  %v5977_v6 = vld [vmem:[#allocation10 + $0x18] sm:$0xff] }
  0x74   :  { %225 = vmatpush1.msra.mxu0 %v5910_v44  ;;  %294 = vmatpush1.msra.mxu1 %v5931_v51  ;;  %6955 = vst [vmem:[#allocation43_spill] sm:$0xff] %v5977_v6 }
  0x75   :  { %226 = vmatprep.subr.mxu0 %v5916_v46  ;;  %295 = vmatprep.subr.mxu1 %v5937_v53 }
  0x76   :  { %227 = vmatpush1.msra.mxu0 %v5922_v48  ;;  %296 = vmatpush1.msra.mxu1 %v5943_v55 }
  0x77   :  { %228 = vmatprep.subr.mxu0 %v5928_v50  ;;  %297 = vmatprep.subr.mxu1 %v5949_v57 }
  0x78   :  { %229 = vmatpush1.msra.mxu0 %v5934_v52  ;;  %298 = vmatpush1.msra.mxu1 %v5955_v59 }
  0x79   :  { %230 = vmatprep.subr.mxu0 %v5940_v54  ;;  %299 = vmatprep.subr.mxu1 %v5961_v61 }
  0x7a   :  { %231 = vmatpush1.msra.mxu0 %v5946_v56  ;;  %300 = vmatpush1.msra.mxu1 %v5965_v62  ;;  %v5980_v56 = vld [vmem:[#allocation10 + $0x10] sm:$0xff] }
  0x7b   :  { %232 = vmatprep.subr.mxu0 %v5952_v58  ;;  %301 = vmatprep.subr.mxu1 %v5969_v63  ;;  %6956 = vst [vmem:[#allocation44_spill] sm:$0xff] %v5980_v56 }
  0x7c   :  { %233 = vmatpush1.msra.mxu0 %v5958_v60  ;;  %302 = vmatpush1.msra.mxu1 %v5973_v0 }
  0x7d   :  { %267 = vmatmul.mubr.f32.vlgmr.msra.gmra.mxu0 %v6864_v5  ;;  %376 = vmatprep.subr.mxu0 %v5788_v1 }
  0x7e   :  { %377 = vmatpush1.msra.mxu0 %v5790_v2  ;;  %303 = vmatprep.subr.mxu1 %v5977_v6 }
  0x7f   :  { %378 = vmatprep.subr.mxu0 %v5792_v3  ;;  %304 = vmatpush1.msra.mxu1 %v5980_v56 }
  0x80   :  { %379 = vmatpush1.msra.mxu0 %v5795_v4  ;;  %338 = vmatmul.mubr.f32.vlgmr.msra.gmra.mxu1 %v6864_v5  ;;  %v6957_v5 = vld [vmem:[#allocation34_spill] sm:$0xff] }
  0x81   :  { %447 = vmatprep.subr.mxu1 %v5813_v11  ;;  %380 = vmatprep.subr.mxu0 %v5801_v7 }
  0x82   :  { %448 = vmatpush1.msra.mxu1 %v5819_v13  ;;  %381 = vmatpush1.msra.mxu0 %v5805_v8 }
  0x83   :  { %449 = vmatprep.subr.mxu1 %v5825_v15  ;;  %382 = vmatprep.subr.mxu0 %v5808_v9 }
  0x84   :  { %450 = vmatpush1.msra.mxu1 %v5827_v16  ;;  %383 = vmatpush1.msra.mxu0 %v5811_v10 }
  0x85   :  { %451 = vmatprep.subr.mxu1 %v5833_v18  ;;  %384 = vmatprep.subr.mxu0 %v5816_v12 }
  0x86   :  { %452 = vmatpush1.msra.mxu1 %v5839_v20  ;;  %385 = vmatpush1.msra.mxu0 %v5822_v14 }
  0x87   :  { %453 = vmatprep.subr.mxu1 %v5841_v21  ;;  %386 = vmatprep.subr.mxu0 %v5830_v17 }
  0x88   :  { %454 = vmatpush1.msra.mxu1 %v5847_v23  ;;  %387 = vmatpush1.msra.mxu0 %v5836_v19 }
  0x89   :  { %455 = vmatprep.subr.mxu1 %v5853_v25  ;;  %388 = vmatprep.subr.mxu0 %v5844_v22 }
  0x8a   :  { %456 = vmatpush1.msra.mxu1 %v5859_v27  ;;  %389 = vmatpush1.msra.mxu0 %v5850_v24 }
  0x8b   :  { %457 = vmatprep.subr.mxu1 %v5865_v29  ;;  %390 = vmatprep.subr.mxu0 %v5856_v26 }
  0x8c   :  { %458 = vmatpush1.msra.mxu1 %v5871_v31  ;;  %391 = vmatpush1.msra.mxu0 %v5862_v28 }
  0x8d   :  { %459 = vmatprep.subr.mxu1 %v5877_v33  ;;  %392 = vmatprep.subr.mxu0 %v5868_v30 }
  0x8e   :  { %460 = vmatpush1.msra.mxu1 %v5883_v35  ;;  %393 = vmatpush1.msra.mxu0 %v5874_v32 }
  0x8f   :  { %461 = vmatprep.subr.mxu1 %v5889_v37  ;;  %394 = vmatprep.subr.mxu0 %v5880_v34 }
  0x90   :  { %462 = vmatpush1.msra.mxu1 %v5895_v39  ;;  %395 = vmatpush1.msra.mxu0 %v5886_v36 }
  0x91   :  { %463 = vmatprep.subr.mxu1 %v5901_v41  ;;  %396 = vmatprep.subr.mxu0 %v5892_v38 }
  0x92   :  { %464 = vmatpush1.msra.mxu1 %v5907_v43  ;;  %397 = vmatpush1.msra.mxu0 %v5898_v40 }
  0x93   :  { %465 = vmatprep.subr.mxu1 %v5913_v45  ;;  %398 = vmatprep.subr.mxu0 %v5904_v42 }
  0x94   :  { %466 = vmatpush1.msra.mxu1 %v5919_v47  ;;  %399 = vmatpush1.msra.mxu0 %v5910_v44 }
  0x95   :  { %467 = vmatprep.subr.mxu1 %v5925_v49  ;;  %400 = vmatprep.subr.mxu0 %v5916_v46 }
  0x96   :  { %468 = vmatpush1.msra.mxu1 %v5931_v51  ;;  %401 = vmatpush1.msra.mxu0 %v5922_v48 }
  0x97   :  { %469 = vmatprep.subr.mxu1 %v5937_v53  ;;  %402 = vmatprep.subr.mxu0 %v5928_v50  ;;  %v6958_v50 = vmov 0.0  }
  0x98   :  { %470 = vmatpush1.msra.mxu1 %v5943_v55  ;;  %403 = vmatpush1.msra.mxu0 %v5934_v52 }
  0x99   :  { %471 = vmatprep.subr.mxu1 %v5949_v57  ;;  %404 = vmatprep.subr.mxu0 %v5940_v54  ;;  %v135_v54 = vld [vmem:[#allocation3 + $0x8] sm:$0xff] }
  0x9a   :  { %472 = vmatpush1.msra.mxu1 %v5955_v59  ;;  %405 = vmatpush1.msra.mxu0 %v6957_v5  ;;  %v134_v5 = vld [vmem:[#allocation3] sm:$0xff] }
  0x9b   :  { %473 = vmatprep.subr.mxu1 %v5961_v61  ;;  %406 = vmatprep.subr.mxu0 %v5952_v58 }
  0x9c   :  { %474 = vmatpush1.msra.mxu1 %v5965_v62  ;;  %407 = vmatpush1.msra.mxu0 %v5958_v60 }
  0x9d   :  { %475 = vmatprep.subr.mxu1 %v5969_v63  ;;  %440 = vmatprep.mubr.f32.mxu0 %v6958_v50 }
  0x9e   :  { %476 = vmatpush1.msra.mxu1 %v5973_v0  ;;  %511 = vmatprep.mubr.f32.mxu1 %v6958_v50  ;;  %v136_v50 = vld [vmem:[#allocation3 + $0x10] sm:$0xff] }
  0x9f   :  { %477 = vmatprep.subr.mxu1 %v5977_v6  ;;  %550 = vmatprep.subr.mxu0 %v5788_v1  ;;  %v137_v6 = vld [vmem:[#allocation3 + $0x18] sm:$0xff] }
  0xa0   :  { %478 = vmatpush1.msra.mxu1 %v5980_v56 }
  0xa1   :  { %621 = vmatprep.subr.mxu1 %v5813_v11 }
 0x13d   :  { %v268_v58 = vpop.f32.mrf.mxu0 }
 0x13e   :  { %v344_v63 = vadd.f32 %v268_v58, %v134_v5 }
 0x13f   :  { %v270_v62 = vpop.f32.mrf.mxu0 }
 0x140   :  { %v4819_v60 = vmul.f32 -1.442695, %v344_v63  ;;  %v345_v52 = vadd.f32 %v270_v62, %v135_v54  ;;  %v339_v61 = vpop.f32.mrf.mxu1 }
 0x141   :  { %v346_v56 = vadd.f32 %v339_v61, %v136_v50  ;;  %v6961_v50 = vld [vmem:[#allocation35_spill] sm:$0xff] }
 0x142   :  { %5226 = vpow2.f32 %v4819_v60  ;;  %v4820_v0 = vmul.f32 -1.442695, %v345_v52  ;;  %v341_v59 = vpop.f32.mrf.mxu1  ;;  %v6965_v61 = vld [vmem:[#allocation39_spill] sm:$0xff] }
 0x143   :  { %v347_v48 = vadd.f32 %v341_v59, %v137_v6  ;;  %v6964_v59 = vld [vmem:[#allocation30_spill] sm:$0xff] }
 0x144   :  { %5228 = vpow2.f32 %v4820_v0 }
 0x145   :  { %v4821_v57 = vmul.f32 -1.442695, %v347_v48  ;;  %5230 = vtanh.f32 %v346_v56  ;;  %v6962_v56 = vld [vmem:[#allocation29_spill] sm:$0xff] }
 0x147   :  { %5232 = vpow2.f32 %v4821_v57  ;;  %v6963_v57 = vld [vmem:[#allocation37_spill] sm:$0xff] }
 0x14f   :  { %v5227_v1 = vpop.eup %5226 }
 0x150   :  { %v357_v46 = vadd.f32 1.0, %v5227_v1 }
 0x151   :  { %v5229_v11 = vpop.eup %5228 }
 0x152   :  { %5234 = vrcp.f32 %v357_v46  ;;  %v358_v5 = vadd.f32 1.0, %v5229_v11  ;;  %v5231_v58 = vpop.eup %5230  ;;  %v6959_v11 = vld [vmem:[#allocation33_spill] sm:$0xff]  ;;  %v6960_v46 = vld [vmem:[#allocation28_spill] sm:$0xff] }
 0x154   :  { %5236 = vrcp.f32 %v358_v5  ;;  %v5233_v54 = vpop.eup %5232  ;;  %v6966_v5 = vld [vmem:[#allocation31_spill] sm:$0xff] }
 0x155   :  { %v359_v62 = vadd.f32 1.0, %v5233_v54  ;;  %v6968_v54 = vld [vmem:[#allocation32_spill] sm:$0xff] }
 0x157   :  { %5238 = vrcp.f32 %v359_v62  ;;  %v6971_v62 = vld [vmem:[#allocation42_spill] sm:$0xff] }
 0x15f   :  { %v5235_v60 = vpop.eup %5234 }
 0x160   :  { %v368_v0 = vmul.f32 %v5235_v60, %v5231_v58  ;;  %v6967_v58 = vld [vmem:[#allocation40_spill] sm:$0xff]  ;;  %v6969_v60 = vld [vmem:[#allocation41_spill] sm:$0xff] }
 0x161   :  { %v5237_v52 = vpop.eup %5236 }
 0x162   :  { %v367_v63 = vmul.f32 0.0, %v5237_v52  ;;  %v6970_v52 = vld [vmem:[#allocation34_spill] sm:$0xff] }
 0x164   :  { %v6054_v55 = vadd.f32 %v368_v0, %v367_v63  ;;  %v5239_v6 = vpop.eup %5238  ;;  %v6972_v63 = vld [vmem:[#allocation36_spill] sm:$0xff]  ;;  %v6973_v0 = vld [vmem:[#allocation43_spill] sm:$0xff] }
 0x166   :  { %5240 = vtanh.f32 %v6054_v55 }
 0x173   :  { %v5241_v1 = vpop.eup %5240 }
 0x174   :  { %v371_v48 = vmul.f32 %v5241_v1, %v5239_v6  ;;  %v6974_v6 = vld [vmem:[#allocation38_spill] sm:$0xff]  ;;  %v6975_v1 = vmov 0.0  }
 0x176   :  { %441 = vmatmul.mubr.f32.vlgmr.msra.gmra.mxu0 %v371_v48  ;;  %512 = vmatmul.mubr.f32.vlgmr.msra.gmra.mxu1 %v371_v48  ;;  %v6976_v48 = vld [vmem:[#allocation44_spill] sm:$0xff] }
 0x177   :  { %551 = vmatpush1.msra.mxu0 %v5790_v2  ;;  %622 = vmatpush1.msra.mxu1 %v5819_v13 }
 0x178   :  { %552 = vmatprep.subr.mxu0 %v5792_v3  ;;  %623 = vmatprep.subr.mxu1 %v5825_v15 }
 0x179   :  { %553 = vmatpush1.msra.mxu0 %v5795_v4  ;;  %624 = vmatpush1.msra.mxu1 %v5827_v16 }
 0x17a   :  { %554 = vmatprep.subr.mxu0 %v5801_v7  ;;  %625 = vmatprep.subr.mxu1 %v5833_v18 }
 0x17b   :  { %555 = vmatpush1.msra.mxu0 %v5805_v8  ;;  %626 = vmatpush1.msra.mxu1 %v5839_v20 }
 0x17c   :  { %556 = vmatprep.subr.mxu0 %v5808_v9  ;;  %627 = vmatprep.subr.mxu1 %v5841_v21 }
 0x17d   :  { %557 = vmatpush1.msra.mxu0 %v5811_v10  ;;  %628 = vmatpush1.msra.mxu1 %v5847_v23 }
 0x17e   :  { %558 = vmatprep.subr.mxu0 %v5816_v12  ;;  %629 = vmatprep.subr.mxu1 %v5853_v25 }
 0x17f   :  { %559 = vmatpush1.msra.mxu0 %v5822_v14  ;;  %630 = vmatpush1.msra.mxu1 %v5859_v27 }
 0x180   :  { %560 = vmatprep.subr.mxu0 %v5830_v17  ;;  %631 = vmatprep.subr.mxu1 %v5865_v29 }
 0x181   :  { %561 = vmatpush1.msra.mxu0 %v5836_v19  ;;  %632 = vmatpush1.msra.mxu1 %v5871_v31 }
 0x182   :  { %562 = vmatprep.subr.mxu0 %v5844_v22  ;;  %633 = vmatprep.subr.mxu1 %v5877_v33 }
 0x183   :  { %563 = vmatpush1.msra.mxu0 %v5850_v24  ;;  %634 = vmatpush1.msra.mxu1 %v5883_v35 }
 0x184   :  { %564 = vmatprep.subr.mxu0 %v5856_v26  ;;  %635 = vmatprep.subr.mxu1 %v5889_v37 }
 0x185   :  { %565 = vmatpush1.msra.mxu0 %v5862_v28  ;;  %636 = vmatpush1.msra.mxu1 %v5895_v39 }
 0x186   :  { %566 = vmatprep.subr.mxu0 %v5868_v30  ;;  %637 = vmatprep.subr.mxu1 %v5901_v41 }
 0x187   :  { %567 = vmatpush1.msra.mxu0 %v5874_v32  ;;  %638 = vmatpush1.msra.mxu1 %v5907_v43 }
 0x188   :  { %568 = vmatprep.subr.mxu0 %v5880_v34  ;;  %639 = vmatprep.subr.mxu1 %v5913_v45 }
 0x189   :  { %569 = vmatpush1.msra.mxu0 %v5886_v36  ;;  %640 = vmatpush1.msra.mxu1 %v5919_v47 }
 0x18a   :  { %570 = vmatprep.subr.mxu0 %v5892_v38  ;;  %641 = vmatprep.subr.mxu1 %v5925_v49 }
 0x18b   :  { %571 = vmatpush1.msra.mxu0 %v5898_v40  ;;  %642 = vmatpush1.msra.mxu1 %v5931_v51 }
 0x18c   :  { %572 = vmatprep.subr.mxu0 %v5904_v42  ;;  %643 = vmatprep.subr.mxu1 %v5937_v53 }
 0x18d   :  { %573 = vmatpush1.msra.mxu0 %v5910_v44  ;;  %644 = vmatpush1.msra.mxu1 %v6959_v11 }
 0x18e   :  { %574 = vmatprep.subr.mxu0 %v6960_v46  ;;  %645 = vmatprep.subr.mxu1 %v6961_v50  ;;  %v374_v50 = vld [vmem:[#allocation3 + $0x30] sm:$0xff] }
 0x18f   :  { %575 = vmatpush1.msra.mxu0 %v6962_v56  ;;  %646 = vmatpush1.msra.mxu1 %v6963_v57  ;;  %v375_v57 = vld [vmem:[#allocation3 + $0x38] sm:$0xff] }
 0x190   :  { %576 = vmatprep.subr.mxu0 %v6964_v59  ;;  %647 = vmatprep.subr.mxu1 %v6965_v61 }
 0x191   :  { %577 = vmatpush1.msra.mxu0 %v6966_v5  ;;  %648 = vmatpush1.msra.mxu1 %v6967_v58  ;;  %v6977_v58 = vld [vmem:[#allocation24_spill] sm:$0xff]  ;;  %v373_v5 = vld [vmem:[#allocation3 + $0x28] sm:$0xff] }
 0x192   :  { %578 = vmatprep.subr.mxu0 %v6968_v54  ;;  %649 = vmatprep.subr.mxu1 %v6969_v60  ;;  %v6978_v54 = vld [vmem:[#allocation26_spill] sm:$0xff] }
 0x193   :  { %579 = vmatpush1.msra.mxu0 %v6970_v52  ;;  %650 = vmatpush1.msra.mxu1 %v6971_v62  ;;  %v372_v60 = vld [vmem:[#allocation3 + $0x20] sm:$0xff] }
 0x194   :  { %580 = vmatprep.subr.mxu0 %v6972_v63  ;;  %651 = vmatprep.subr.mxu1 %v6973_v0 }
 0x195   :  { %581 = vmatpush1.msra.mxu0 %v6974_v6  ;;  %614 = vmatprep.mubr.f32.mxu0 %v6975_v1 }
 0x196   :  { %652 = vmatpush1.msra.mxu1 %v6976_v48  ;;  %685 = vmatprep.mubr.f32.mxu1 %v6975_v1 }
 0x197   :  { %724 = vmatprep.subr.mxu0 %v6977_v58  ;;  %795 = vmatprep.subr.mxu1 %v6978_v54 }
 0x236   :  { %v442_v52 = vpop.f32.mrf.mxu0  ;;  %v513_v0 = vpop.f32.mrf.mxu1 }
 0x237   :  { %v518_v62 = vadd.f32 %v442_v52, %v372_v60  ;;  %v520_v58 = vadd.f32 %v513_v0, %v374_v50  ;;  %v6984_v0 = vld [vmem:[#allocation37_spill] sm:$0xff] }
 0x238   :  { %v444_v61 = vpop.f32.mrf.mxu0  ;;  %v515_v56 = vpop.f32.mrf.mxu1 }
 0x239   :  { %v4822_v63 = vmul.f32 -1.442695, %v518_v62  ;;  %v519_v59 = vadd.f32 %v444_v61, %v373_v5  ;;  %v521_v48 = vadd.f32 %v515_v56, %v375_v57 }
 0x23b   :  { %5242 = vpow2.f32 %v4822_v63  ;;  %v4823_v6 = vmul.f32 -1.442695, %v519_v59  ;;  %v4824_v1 = vmul.f32 -1.442695, %v521_v48  ;;  %v6987_v48 = vld [vmem:[#allocation31_spill] sm:$0xff] }
 0x23d   :  { %5244 = vpow2.f32 %v4823_v6  ;;  %v6985_v6 = vld [vmem:[#allocation30_spill] sm:$0xff] }
 0x23e   :  { %5246 = vpow2.f32 %v4824_v1  ;;  %v6986_v1 = vld [vmem:[#allocation39_spill] sm:$0xff] }
 0x248   :  { %v5243_v46 = vpop.eup %5242 }
 0x249   :  { %v531_v11 = vadd.f32 1.0, %v5243_v46 }
 0x24a   :  { %v5245_v54 = vpop.eup %5244 }
 0x24b   :  { %5248 = vrcp.f32 %v531_v11  ;;  %v532_v44 = vadd.f32 1.0, %v5245_v54  ;;  %v5247_v60 = vpop.eup %5246  ;;  %v6981_v11 = vld [vmem:[#allocation28_spill] sm:$0xff]  ;;  %v6983_v54 = vld [vmem:[#allocation29_spill] sm:$0xff] }
 0x24c   :  { %5250 = vtanh.f32 %v520_v58  ;;  %v533_v59 = vadd.f32 1.0, %v5247_v60  ;;  %v6982_v58 = vld [vmem:[#allocation35_spill] sm:$0xff]  ;;  %v6988_v60 = vld [vmem:[#allocation40_spill] sm:$0xff] }
 0x24d   :  { %5252 = vrcp.f32 %v532_v44  ;;  %v6979_v44 = vld [vmem:[#allocation27_spill] sm:$0xff] }
 0x24e   :  { %5254 = vrcp.f32 %v533_v59  ;;  %v6992_v59 = vld [vmem:[#allocation42_spill] sm:$0xff] }
 0x258   :  { %v5249_v61 = vpop.eup %5248 }
 0x259   :  { %v5251_v5 = vpop.eup %5250 }
 0x25a   :  { %v5253_v52 = vpop.eup %5252  ;;  %v542_v62 = vmul.f32 %v5251_v5, %v5249_v61  ;;  %v6989_v61 = vld [vmem:[#allocation32_spill] sm:$0xff]  ;;  %v6990_v5 = vld [vmem:[#allocation41_spill] sm:$0xff] }
 0x25b   :  { %v541_v63 = vmul.f32 %v5253_v52, %v6054_v55  ;;  %v5255_v46 = vpop.eup %5254  ;;  %v6980_v55 = vld [vmem:[#allocation33_spill] sm:$0xff]  ;;  %v6991_v52 = vld [vmem:[#allocation34_spill] sm:$0xff] }
 0x25d   :  { %v6124_v56 = vadd.f32 %v542_v62, %v541_v63  ;;  %v6993_v62 = vld [vmem:[#allocation36_spill] sm:$0xff]  ;;  %v6994_v63 = vld [vmem:[#allocation43_spill] sm:$0xff] }
 0x25f   :  { %5256 = vtanh.f32 %v6124_v56 }
 0x26c   :  { %v5257_v50 = vpop.eup %5256 }
 0x26d   :  { %v545_v57 = vmul.f32 %v5257_v50, %v5255_v46  ;;  %v6995_v46 = vld [vmem:[#allocation38_spill] sm:$0xff]  ;;  %v6996_v50 = vmov 0.0  }
 0x26f   :  { %615 = vmatmul.mubr.f32.vlgmr.msra.gmra.mxu0 %v545_v57  ;;  %686 = vmatmul.mubr.f32.vlgmr.msra.gmra.mxu1 %v545_v57  ;;  %v6997_v57 = vld [vmem:[#allocation44_spill] sm:$0xff] }
 0x270   :  { %725 = vmatpush1.msra.mxu0 %v5790_v2  ;;  %796 = vmatpush1.msra.mxu1 %v5819_v13 }
 0x271   :  { %726 = vmatprep.subr.mxu0 %v5792_v3  ;;  %797 = vmatprep.subr.mxu1 %v5825_v15 }
 0x272   :  { %727 = vmatpush1.msra.mxu0 %v5795_v4  ;;  %798 = vmatpush1.msra.mxu1 %v5827_v16 }
 0x273   :  { %728 = vmatprep.subr.mxu0 %v5801_v7  ;;  %799 = vmatprep.subr.mxu1 %v5833_v18 }
 0x274   :  { %729 = vmatpush1.msra.mxu0 %v5805_v8  ;;  %800 = vmatpush1.msra.mxu1 %v5839_v20 }
 0x275   :  { %730 = vmatprep.subr.mxu0 %v5808_v9  ;;  %801 = vmatprep.subr.mxu1 %v5841_v21 }
 0x276   :  { %731 = vmatpush1.msra.mxu0 %v5811_v10  ;;  %802 = vmatpush1.msra.mxu1 %v5847_v23 }
 0x277   :  { %732 = vmatprep.subr.mxu0 %v5816_v12  ;;  %803 = vmatprep.subr.mxu1 %v5853_v25 }
 0x278   :  { %733 = vmatpush1.msra.mxu0 %v5822_v14  ;;  %804 = vmatpush1.msra.mxu1 %v5859_v27 }
 0x279   :  { %734 = vmatprep.subr.mxu0 %v5830_v17  ;;  %805 = vmatprep.subr.mxu1 %v5865_v29 }
 0x27a   :  { %735 = vmatpush1.msra.mxu0 %v5836_v19  ;;  %806 = vmatpush1.msra.mxu1 %v5871_v31 }
 0x27b   :  { %736 = vmatprep.subr.mxu0 %v5844_v22  ;;  %807 = vmatprep.subr.mxu1 %v5877_v33 }
 0x27c   :  { %737 = vmatpush1.msra.mxu0 %v5850_v24  ;;  %808 = vmatpush1.msra.mxu1 %v5883_v35 }
 0x27d   :  { %738 = vmatprep.subr.mxu0 %v5856_v26  ;;  %809 = vmatprep.subr.mxu1 %v5889_v37 }
 0x27e   :  { %739 = vmatpush1.msra.mxu0 %v5862_v28  ;;  %810 = vmatpush1.msra.mxu1 %v5895_v39 }
 0x27f   :  { %740 = vmatprep.subr.mxu0 %v5868_v30  ;;  %811 = vmatprep.subr.mxu1 %v5901_v41 }
 0x280   :  { %741 = vmatpush1.msra.mxu0 %v5874_v32  ;;  %812 = vmatpush1.msra.mxu1 %v5907_v43 }
 0x281   :  { %742 = vmatprep.subr.mxu0 %v5880_v34  ;;  %813 = vmatprep.subr.mxu1 %v5913_v45 }
 0x282   :  { %743 = vmatpush1.msra.mxu0 %v5886_v36  ;;  %814 = vmatpush1.msra.mxu1 %v5919_v47 }
 0x283   :  { %744 = vmatprep.subr.mxu0 %v5892_v38  ;;  %815 = vmatprep.subr.mxu1 %v5925_v49 }
 0x284   :  { %745 = vmatpush1.msra.mxu0 %v5898_v40  ;;  %816 = vmatpush1.msra.mxu1 %v5931_v51 }
 0x285   :  { %746 = vmatprep.subr.mxu0 %v5904_v42  ;;  %817 = vmatprep.subr.mxu1 %v5937_v53 }
 0x286   :  { %747 = vmatpush1.msra.mxu0 %v6979_v44  ;;  %818 = vmatpush1.msra.mxu1 %v6980_v55 }
 0x287   :  { %748 = vmatprep.subr.mxu0 %v6981_v11  ;;  %819 = vmatprep.subr.mxu1 %v6982_v58  ;;  %v548_v58 = vld [vmem:[#allocation3 + $0x50] sm:$0xff] }
 0x288   :  { %749 = vmatpush1.msra.mxu0 %v6983_v54  ;;  %820 = vmatpush1.msra.mxu1 %v6984_v0  ;;  %v549_v0 = vld [vmem:[#allocation3 + $0x58] sm:$0xff] }
 0x289   :  { %750 = vmatprep.subr.mxu0 %v6985_v6  ;;  %821 = vmatprep.subr.mxu1 %v6986_v1 }
 0x28a   :  { %751 = vmatpush1.msra.mxu0 %v6987_v48  ;;  %822 = vmatpush1.msra.mxu1 %v6988_v60  ;;  %v6998_v60 = vld [vmem:[#allocation24_spill] sm:$0xff]  ;;  %v547_v48 = vld [vmem:[#allocation3 + $0x48] sm:$0xff] }
 0x28b   :  { %752 = vmatprep.subr.mxu0 %v6989_v61  ;;  %823 = vmatprep.subr.mxu1 %v6990_v5  ;;  %v6999_v61 = vld [vmem:[#allocation26_spill] sm:$0xff] }
 0x28c   :  { %753 = vmatpush1.msra.mxu0 %v6991_v52  ;;  %824 = vmatpush1.msra.mxu1 %v6992_v59  ;;  %v546_v5 = vld [vmem:[#allocation3 + $0x40] sm:$0xff] }
 0x28d   :  { %754 = vmatprep.subr.mxu0 %v6993_v62  ;;  %825 = vmatprep.subr.mxu1 %v6994_v63 }
 0x28e   :  { %755 = vmatpush1.msra.mxu0 %v6995_v46  ;;  %788 = vmatprep.mubr.f32.mxu0 %v6996_v50 }
 0x28f   :  { %826 = vmatpush1.msra.mxu1 %v6997_v57  ;;  %859 = vmatprep.mubr.f32.mxu1 %v6996_v50 }
 0x290   :  { %898 = vmatprep.subr.mxu0 %v6998_v60  ;;  %969 = vmatprep.subr.mxu1 %v6999_v61 }
 0x32f   :  { %v616_v52 = vpop.f32.mrf.mxu0  ;;  %v687_v63 = vpop.f32.mrf.mxu1 }
 0x330   :  { %v692_v59 = vadd.f32 %v616_v52, %v546_v5  ;;  %v694_v60 = vadd.f32 %v687_v63, %v548_v58 }
 0x331   :  { %v618_v1 = vpop.f32.mrf.mxu0  ;;  %v689_v54 = vpop.f32.mrf.mxu1 }
 0x332   :  { %v4825_v62 = vmul.f32 -1.442695, %v692_v59  ;;  %v693_v6 = vadd.f32 %v618_v1, %v547_v48  ;;  %v695_v57 = vadd.f32 %v689_v54, %v549_v0 }
 0x334   :  { %5258 = vpow2.f32 %v4825_v62  ;;  %v4826_v46 = vmul.f32 -1.442695, %v693_v6  ;;  %v4827_v50 = vmul.f32 -1.442695, %v695_v57 }
 0x336   :  { %5260 = vpow2.f32 %v4826_v46 }
 0x337   :  { %5262 = vpow2.f32 %v4827_v50 }
 0x341   :  { %v5259_v11 = vpop.eup %5258 }
 0x342   :  { %v705_v55 = vadd.f32 1.0, %v5259_v11 }
 0x343   :  { %v5261_v61 = vpop.eup %5260 }
 0x344   :  { %5264 = vrcp.f32 %v705_v55  ;;  %v706_v44 = vadd.f32 1.0, %v5261_v61  ;;  %v5263_v5 = vpop.eup %5262 }
 0x345   :  { %5266 = vtanh.f32 %v694_v60  ;;  %v707_v6 = vadd.f32 1.0, %v5263_v5 }
 0x346   :  { %5268 = vrcp.f32 %v706_v44 }
 0x347   :  { %5270 = vrcp.f32 %v707_v6  ;;  %v6275_v6 = vld [vmem:[#allocation10 + $0x1c8] sm:$0xff] }
 0x351   :  { %v5265_v1 = vpop.eup %5264 }
 0x352   :  { %v5267_v48 = vpop.eup %5266 }
 0x353   :  { %v5269_v52 = vpop.eup %5268  ;;  %v716_v59 = vmul.f32 %v5267_v48, %v5265_v1  ;;  %v6269_v48 = vld [vmem:[#allocation10 + $0x1e0] sm:$0xff] }
 0x354   :  { %v715_v62 = vmul.f32 %v5269_v52, %v6124_v56  ;;  %v5271_v11 = vpop.eup %5270  ;;  %v6272_v52 = vld [vmem:[#allocation10 + $0x1f0] sm:$0xff] }
 0x356   :  { %v6194_v54 = vadd.f32 %v716_v59, %v715_v62  ;;  %v6278_v59 = vld [vmem:[#allocation10 + $0x1d8] sm:$0xff]  ;;  %v6281_v62 = vld [vmem:[#allocation10 + $0x1c0] sm:$0xff] }
 0x358   :  { %5272 = vtanh.f32 %v6194_v54 }
 0x365   :  { %v5273_v58 = vpop.eup %5272 }
 0x366   :  { %v719_v0 = vmul.f32 %v5273_v58, %v5271_v11  ;;  %v6287_v11 = vld [vmem:[#allocation10 + $0x1a8] sm:$0xff]  ;;  %v6290_v58 = vld [vmem:[#allocation10 + $0x1b8] sm:$0xff] }
 0x368   :  { %789 = vmatmul.mubr.f32.vlgmr.msra.gmra.mxu0 %v719_v0  ;;  %860 = vmatmul.mubr.f32.vlgmr.msra.gmra.mxu1 %v719_v0  ;;  %v6293_v0 = vld [vmem:[#allocation10 + $0x1a0] sm:$0xff] }
 0x369   :  { %899 = vmatpush1.msra.mxu0 %v5790_v2  ;;  %970 = vmatpush1.msra.mxu1 %v5819_v13  ;;  %v7000_v2 = vld [vmem:[#allocation27_spill] sm:$0xff] }
 0x36a   :  { %900 = vmatprep.subr.mxu0 %v5792_v3  ;;  %971 = vmatprep.subr.mxu1 %v5825_v15  ;;  %v7001_v3 = vld [vmem:[#allocation33_spill] sm:$0xff]  ;;  %v7008_v13 = vld [vmem:[#allocation31_spill] sm:$0xff]  ;;  %v7010_v15 = vld [vmem:[#allocation32_spill] sm:$0xff] }
 0x36b   :  { %901 = vmatpush1.msra.mxu0 %v5795_v4  ;;  %972 = vmatpush1.msra.mxu1 %v5827_v16  ;;  %v7002_v4 = vld [vmem:[#allocation28_spill] sm:$0xff]  ;;  %v7011_v16 = vld [vmem:[#allocation41_spill] sm:$0xff] }
 0x36c   :  { %902 = vmatprep.subr.mxu0 %v5801_v7  ;;  %973 = vmatprep.subr.mxu1 %v5833_v18  ;;  %v7003_v7 = vld [vmem:[#allocation35_spill] sm:$0xff]  ;;  %v7013_v18 = vld [vmem:[#allocation42_spill] sm:$0xff] }
 0x36d   :  { %903 = vmatpush1.msra.mxu0 %v5805_v8  ;;  %974 = vmatpush1.msra.mxu1 %v5839_v20  ;;  %v7004_v8 = vld [vmem:[#allocation29_spill] sm:$0xff]  ;;  %v7015_v20 = vld [vmem:[#allocation43_spill] sm:$0xff] }
 0x36e   :  { %904 = vmatprep.subr.mxu0 %v5808_v9  ;;  %975 = vmatprep.subr.mxu1 %v5841_v21  ;;  %v7005_v9 = vld [vmem:[#allocation37_spill] sm:$0xff]  ;;  %v7016_v21 = vld [vmem:[#allocation38_spill] sm:$0xff] }
 0x36f   :  { %905 = vmatpush1.msra.mxu0 %v5811_v10  ;;  %976 = vmatpush1.msra.mxu1 %v5847_v23  ;;  %v7006_v10 = vld [vmem:[#allocation30_spill] sm:$0xff]  ;;  %v7018_v23 = vld [vmem:[#allocation44_spill] sm:$0xff] }
 0x370   :  { %906 = vmatprep.subr.mxu0 %v5816_v12  ;;  %977 = vmatprep.subr.mxu1 %v5853_v25  ;;  %v7007_v12 = vld [vmem:[#allocation39_spill] sm:$0xff]  ;;  %v7020_v25 = vld [vmem:[#allocation26_spill] sm:$0xff] }
 0x371   :  { %907 = vmatpush1.msra.mxu0 %v5822_v14  ;;  %978 = vmatpush1.msra.mxu1 %v5859_v27  ;;  %v7009_v14 = vld [vmem:[#allocation40_spill] sm:$0xff] }
 0x372   :  { %908 = vmatprep.subr.mxu0 %v5830_v17  ;;  %979 = vmatprep.subr.mxu1 %v5865_v29  ;;  %v7012_v17 = vld [vmem:[#allocation34_spill] sm:$0xff] }
 0x373   :  { %909 = vmatpush1.msra.mxu0 %v5836_v19  ;;  %980 = vmatpush1.msra.mxu1 %v5871_v31  ;;  %v7014_v19 = vld [vmem:[#allocation36_spill] sm:$0xff] }
 0x374   :  { %910 = vmatprep.subr.mxu0 %v5844_v22  ;;  %981 = vmatprep.subr.mxu1 %v5877_v33  ;;  %v7017_v22 = vmov 0.0  }
 0x375   :  { %911 = vmatpush1.msra.mxu0 %v5850_v24  ;;  %982 = vmatpush1.msra.mxu1 %v5883_v35  ;;  %v6261_v24 = vld [vmem:[#allocation10 + $0x1e8] sm:$0xff]  ;;  %v723_v35 = vld [vmem:[#allocation3 + $0x78] sm:$0xff] }
 0x376   :  { %912 = vmatprep.subr.mxu0 %v5856_v26  ;;  %983 = vmatprep.subr.mxu1 %v5889_v37  ;;  %7019 = vst [vmem:[#allocation24_spill] sm:$0xff] %v6261_v24  ;;  %v720_v26 = vld [vmem:[#allocation3 + $0x60] sm:$0xff] }
 0x377   :  { %913 = vmatpush1.msra.mxu0 %v5862_v28  ;;  %984 = vmatpush1.msra.mxu1 %v5895_v39  ;;  %v721_v28 = vld [vmem:[#allocation3 + $0x68] sm:$0xff] }
 0x378   :  { %914 = vmatprep.subr.mxu0 %v5868_v30  ;;  %985 = vmatprep.subr.mxu1 %v5901_v41 }
 0x379   :  { %915 = vmatpush1.msra.mxu0 %v5874_v32  ;;  %986 = vmatpush1.msra.mxu1 %v5907_v43 }
 0x37a   :  { %916 = vmatprep.subr.mxu0 %v5880_v34  ;;  %987 = vmatprep.subr.mxu1 %v5913_v45 }
 0x37b   :  { %917 = vmatpush1.msra.mxu0 %v5886_v36  ;;  %988 = vmatpush1.msra.mxu1 %v5919_v47 }
 0x37c   :  { %918 = vmatprep.subr.mxu0 %v5892_v38  ;;  %989 = vmatprep.subr.mxu1 %v5925_v49  ;;  %v722_v38 = vld [vmem:[#allocation3 + $0x70] sm:$0xff] }
 0x37d   :  { %919 = vmatpush1.msra.mxu0 %v5898_v40  ;;  %990 = vmatpush1.msra.mxu1 %v5931_v51 }
 0x37e   :  { %920 = vmatprep.subr.mxu0 %v5904_v42  ;;  %991 = vmatprep.subr.mxu1 %v5937_v53 }
 0x37f   :  { %921 = vmatpush1.msra.mxu0 %v7000_v2  ;;  %992 = vmatpush1.msra.mxu1 %v7001_v3  ;;  %v6296_v2 = vld [vmem:[#allocation10 + $0x1b0] sm:$0xff] }
 0x380   :  { %922 = vmatprep.subr.mxu0 %v7002_v4  ;;  %993 = vmatprep.subr.mxu1 %v7003_v7  ;;  %v6299_v4 = vld [vmem:[#allocation10 + $0x188] sm:$0xff] }
 0x381   :  { %923 = vmatpush1.msra.mxu0 %v7004_v8  ;;  %994 = vmatpush1.msra.mxu1 %v7005_v9  ;;  %v6302_v8 = vld [vmem:[#allocation10 + $0x198] sm:$0xff] }
 0x382   :  { %924 = vmatprep.subr.mxu0 %v7006_v10  ;;  %995 = vmatprep.subr.mxu1 %v7007_v12  ;;  %v6305_v10 = vld [vmem:[#allocation10 + $0x180] sm:$0xff] }
 0x383   :  { %925 = vmatpush1.msra.mxu0 %v7008_v13  ;;  %996 = vmatpush1.msra.mxu1 %v7009_v14  ;;  %v6308_v13 = vld [vmem:[#allocation10 + $0x190] sm:$0xff] }
 0x384   :  { %926 = vmatprep.subr.mxu0 %v7010_v15  ;;  %997 = vmatprep.subr.mxu1 %v7011_v16  ;;  %v6311_v15 = vld [vmem:[#allocation10 + $0x168] sm:$0xff] }
 0x385   :  { %927 = vmatpush1.msra.mxu0 %v7012_v17  ;;  %998 = vmatpush1.msra.mxu1 %v7013_v18 }
 0x386   :  { %928 = vmatprep.subr.mxu0 %v7014_v19  ;;  %999 = vmatprep.subr.mxu1 %v7015_v20 }
 0x387   :  { %929 = vmatpush1.msra.mxu0 %v7016_v21  ;;  %962 = vmatprep.mubr.f32.mxu0 %v7017_v22 }
 0x388   :  { %1000 = vmatpush1.msra.mxu1 %v7018_v23  ;;  %1033 = vmatprep.mubr.f32.mxu1 %v7017_v22 }
 0x389   :  { %1072 = vmatprep.subr.mxu0 %v6261_v24  ;;  %1143 = vmatprep.subr.mxu1 %v7020_v25  ;;  %v6314_v25 = vld [vmem:[#allocation10 + $0x178] sm:$0xff] }
 0x428   :  { %v790_v27 = vpop.f32.mrf.mxu0  ;;  %v861_v33 = vpop.f32.mrf.mxu1 }
 0x429   :  { %v866_v29 = vadd.f32 %v790_v27, %v720_v26  ;;  %v868_v41 = vadd.f32 %v861_v33, %v722_v38  ;;  %v6317_v26 = vld [vmem:[#allocation10 + $0x160] sm:$0xff]  ;;  %v6320_v27 = vld [vmem:[#allocation10 + $0x170] sm:$0xff]  ;;  %v6338_v33 = vld [vmem:[#allocation10 + $0x138] sm:$0xff] }
 0x42a   :  { %v792_v30 = vpop.f32.mrf.mxu0  ;;  %v863_v36 = vpop.f32.mrf.mxu1  ;;  %v6353_v38 = vld [vmem:[#allocation10 + $0x100] sm:$0xff] }
 0x42b   :  { %v4828_v31 = vmul.f32 -1.442695, %v866_v29  ;;  %v867_v32 = vadd.f32 %v792_v30, %v721_v28  ;;  %v869_v37 = vadd.f32 %v863_v36, %v723_v35  ;;  %v6323_v28 = vld [vmem:[#allocation10 + $0x148] sm:$0xff]  ;;  %v6326_v29 = vld [vmem:[#allocation10 + $0x158] sm:$0xff]  ;;  %v6329_v30 = vld [vmem:[#allocation10 + $0x140] sm:$0xff] }
 0x42c   :  { %v6344_v35 = vld [vmem:[#allocation10 + $0x130] sm:$0xff]  ;;  %v6347_v36 = vld [vmem:[#allocation10 + $0x108] sm:$0xff] }
 0x42d   :  { %5274 = vpow2.f32 %v4828_v31  ;;  %v4829_v34 = vmul.f32 -1.442695, %v867_v32  ;;  %v4830_v39 = vmul.f32 -1.442695, %v869_v37  ;;  %v6332_v31 = vld [vmem:[#allocation10 + $0x150] sm:$0xff]  ;;  %v6335_v32 = vld [vmem:[#allocation10 + $0x128] sm:$0xff] }
 0x42e   :  { %v6350_v37 = vld [vmem:[#allocation10 + $0x118] sm:$0xff] }
 0x42f   :  { %5276 = vpow2.f32 %v4829_v34  ;;  %v6341_v34 = vld [vmem:[#allocation10 + $0x120] sm:$0xff] }
 0x430   :  { %5278 = vpow2.f32 %v4830_v39  ;;  %v6356_v39 = vld [vmem:[#allocation10 + $0x110] sm:$0xff] }
 0x43a   :  { %v5275_v40 = vpop.eup %5274 }
 0x43b   :  { %v879_v42 = vadd.f32 1.0, %v5275_v40  ;;  %v6359_v40 = vld [vmem:[#allocation10 + $0xe8] sm:$0xff] }
 0x43c   :  { %v5277_v43 = vpop.eup %5276 }
 0x43d   :  { %5280 = vrcp.f32 %v879_v42  ;;  %v880_v45 = vadd.f32 1.0, %v5277_v43  ;;  %v5279_v56 = vpop.eup %5278  ;;  %v6365_v42 = vld [vmem:[#allocation10 + $0xe0] sm:$0xff]  ;;  %v6368_v43 = vld [vmem:[#allocation10 + $0xf0] sm:$0xff] }
 0x43e   :  { %5282 = vtanh.f32 %v868_v41  ;;  %v881_v63 = vadd.f32 1.0, %v5279_v56  ;;  %v6362_v41 = vld [vmem:[#allocation10 + $0xf8] sm:$0xff] }
 0x43f   :  { %5284 = vrcp.f32 %v880_v45  ;;  %v6371_v45 = vld [vmem:[#allocation10 + $0xc8] sm:$0xff]  ;;  %v6374_v56 = vld [vmem:[#allocation10 + $0xd8] sm:$0xff] }
 0x440   :  { %5286 = vrcp.f32 %v881_v63  ;;  %v6389_v63 = vld [vmem:[#allocation10 + $0x88] sm:$0xff] }
 0x44a   :  { %v5281_v44 = vpop.eup %5280 }
 0x44b   :  { %v5283_v55 = vpop.eup %5282 }
 0x44c   :  { %v5285_v61 = vpop.eup %5284  ;;  %v890_v46 = vmul.f32 %v5283_v55, %v5281_v44  ;;  %v6377_v44 = vld [vmem:[#allocation10 + $0xc0] sm:$0xff]  ;;  %v6381_v55 = vld [vmem:[#allocation10 + $0xa8] sm:$0xff] }
 0x44d   :  { %v889_v50 = vmul.f32 %v5285_v61, %v6194_v54  ;;  %v5287_v60 = vpop.eup %5286  ;;  %v6284_v54 = vld [vmem:[#allocation10 + $0x1d0] sm:$0xff]  ;;  %v6385_v61 = vld [vmem:[#allocation10 + $0xa0] sm:$0xff] }
 0x44f   :  { %v6266_v57 = vadd.f32 %v890_v46, %v889_v50  ;;  %v6393_v46 = vld [vmem:[#allocation10 + $0x80] sm:$0xff] }
 0x450   :  { %7021 = vst [vmem:[#allocation27_spill] sm:$0xff] %v6393_v46 }
 0x451   :  { %5288 = vtanh.f32 %v6266_v57 }
 0x45e   :  { %v5289_v5 = vpop.eup %5288 }
 0x45f   :  { %v893_v1 = vmul.f32 %v5289_v5, %v5287_v60  ;;  %v896_v5 = vld [vmem:[#allocation3 + $0x90] sm:$0xff] }
 0x461   :  { %963 = vmatmul.mubr.f32.vlgmr.msra.gmra.mxu0 %v893_v1  ;;  %1034 = vmatmul.mubr.f32.vlgmr.msra.gmra.mxu1 %v893_v1 }
 0x462   :  { %1073 = vmatpush1.msra.mxu0 %v6269_v48  ;;  %1144 = vmatpush1.msra.mxu1 %v6272_v52 }
 0x463   :  { %1074 = vmatprep.subr.mxu0 %v6275_v6  ;;  %1145 = vmatprep.subr.mxu1 %v6278_v59 }
 0x464   :  { %1075 = vmatpush1.msra.mxu0 %v6281_v62  ;;  %1146 = vmatpush1.msra.mxu1 %v6284_v54 }
 0x465   :  { %1076 = vmatprep.subr.mxu0 %v6287_v11  ;;  %1147 = vmatprep.subr.mxu1 %v6290_v58 }
 0x466   :  { %1077 = vmatpush1.msra.mxu0 %v6293_v0  ;;  %1148 = vmatpush1.msra.mxu1 %v6296_v2 }
 0x467   :  { %1078 = vmatprep.subr.mxu0 %v6299_v4  ;;  %1149 = vmatprep.subr.mxu1 %v6302_v8 }
 0x468   :  { %1079 = vmatpush1.msra.mxu0 %v6305_v10  ;;  %1150 = vmatpush1.msra.mxu1 %v6308_v13 }
 0x469   :  { %1080 = vmatprep.subr.mxu0 %v6311_v15  ;;  %1151 = vmatprep.subr.mxu1 %v6314_v25 }
 0x46a   :  { %1081 = vmatpush1.msra.mxu0 %v6317_v26  ;;  %1152 = vmatpush1.msra.mxu1 %v6320_v27 }
 0x46b   :  { %1082 = vmatprep.subr.mxu0 %v6323_v28  ;;  %1153 = vmatprep.subr.mxu1 %v6326_v29 }
 0x46c   :  { %1083 = vmatpush1.msra.mxu0 %v6329_v30  ;;  %1154 = vmatpush1.msra.mxu1 %v6332_v31 }
 0x46d   :  { %1084 = vmatprep.subr.mxu0 %v6335_v32  ;;  %1155 = vmatprep.subr.mxu1 %v6338_v33 }
 0x46e   :  { %1085 = vmatpush1.msra.mxu0 %v6341_v34  ;;  %1156 = vmatpush1.msra.mxu1 %v6344_v35 }
 0x46f   :  { %1086 = vmatprep.subr.mxu0 %v6347_v36  ;;  %1157 = vmatprep.subr.mxu1 %v6350_v37 }
 0x470   :  { %1087 = vmatpush1.msra.mxu0 %v6353_v38  ;;  %1158 = vmatpush1.msra.mxu1 %v6356_v39 }
 0x471   :  { %1088 = vmatprep.subr.mxu0 %v6359_v40  ;;  %1159 = vmatprep.subr.mxu1 %v6362_v41 }
 0x472   :  { %1089 = vmatpush1.msra.mxu0 %v6365_v42  ;;  %1160 = vmatpush1.msra.mxu1 %v6368_v43 }
 0x473   :  { %1090 = vmatprep.subr.mxu0 %v6371_v45  ;;  %1161 = vmatprep.subr.mxu1 %v6374_v56 }
 0x474   :  { %1091 = vmatpush1.msra.mxu0 %v6377_v44  ;;  %1162 = vmatpush1.msra.mxu1 %v5919_v47  ;;  %v6397_v47 = vld [vmem:[#allocation10 + $0x68] sm:$0xff] }
 0x475   :  { %1092 = vmatprep.subr.mxu0 %v6381_v55  ;;  %1163 = vmatprep.subr.mxu1 %v5925_v49  ;;  %7022 = vst [vmem:[#allocation33_spill] sm:$0xff] %v6397_v47  ;;  %v6401_v49 = vld [vmem:[#allocation10 + $0x60] sm:$0xff] }
 0x476   :  { %1093 = vmatpush1.msra.mxu0 %v6385_v61  ;;  %1164 = vmatpush1.msra.mxu1 %v5931_v51  ;;  %7023 = vst [vmem:[#allocation28_spill] sm:$0xff] %v6401_v49  ;;  %v6405_v51 = vld [vmem:[#allocation10 + $0x48] sm:$0xff] }
 0x477   :  { %1094 = vmatprep.subr.mxu0 %v6389_v63  ;;  %1165 = vmatprep.subr.mxu1 %v5937_v53  ;;  %7024 = vst [vmem:[#allocation35_spill] sm:$0xff] %v6405_v51  ;;  %v6409_v53 = vld [vmem:[#allocation10 + $0x40] sm:$0xff] }
 0x478   :  { %1095 = vmatpush1.msra.mxu0 %v6393_v46  ;;  %1166 = vmatpush1.msra.mxu1 %v7001_v3  ;;  %7025 = vst [vmem:[#allocation29_spill] sm:$0xff] %v6409_v53  ;;  %v6413_v3 = vld [vmem:[#allocation10 + $0x28] sm:$0xff] }
 0x479   :  { %1096 = vmatprep.subr.mxu0 %v6397_v47  ;;  %1167 = vmatprep.subr.mxu1 %v7003_v7  ;;  %7026 = vst [vmem:[#allocation37_spill] sm:$0xff] %v6413_v3  ;;  %v6426_v7 = vld [vmem:[#allocation10 + $0x1f8] sm:$0xff] }
 0x47a   :  { %1097 = vmatpush1.msra.mxu0 %v6401_v49  ;;  %1168 = vmatpush1.msra.mxu1 %v7005_v9  ;;  %7027 = vst [vmem:[#allocation30_spill] sm:$0xff] %v6426_v7  ;;  %v894_v9 = vld [vmem:[#allocation3 + $0x80] sm:$0xff] }
 0x47b   :  { %1098 = vmatprep.subr.mxu0 %v6405_v51  ;;  %1169 = vmatprep.subr.mxu1 %v7007_v12 }
 0x47c   :  { %1099 = vmatpush1.msra.mxu0 %v6409_v53  ;;  %1170 = vmatpush1.msra.mxu1 %v7009_v14  ;;  %v895_v14 = vld [vmem:[#allocation3 + $0x88] sm:$0xff] }
 0x47d   :  { %1100 = vmatprep.subr.mxu0 %v6413_v3  ;;  %1171 = vmatprep.subr.mxu1 %v7011_v16 }
 0x47e   :  { %1101 = vmatpush1.msra.mxu0 %v7012_v17  ;;  %1172 = vmatpush1.msra.mxu1 %v7013_v18 }
 0x47f   :  { %1102 = vmatprep.subr.mxu0 %v7014_v19  ;;  %1173 = vmatprep.subr.mxu1 %v7015_v20 }
 0x480   :  { %1103 = vmatpush1.msra.mxu0 %v7016_v21  ;;  %1136 = vmatprep.mubr.f32.mxu0 %v7017_v22 }
 0x481   :  { %1174 = vmatpush1.msra.mxu1 %v7018_v23  ;;  %1207 = vmatprep.mubr.f32.mxu1 %v7017_v22  ;;  %v897_v23 = vld [vmem:[#allocation3 + $0x98] sm:$0xff] }
 0x482   :  { %1246 = vmatprep.subr.mxu0 %v6261_v24  ;;  %1317 = vmatprep.subr.mxu1 %v6426_v7 }
 0x521   :  { %v964_v12 = vpop.f32.mrf.mxu0  ;;  %v1035_v20 = vpop.f32.mrf.mxu1 }
 0x522   :  { %v1040_v16 = vadd.f32 %v964_v12, %v894_v9  ;;  %v1042_v22 = vadd.f32 %v1035_v20, %v896_v5  ;;  %v6498_v5 = vld [vmem:[#allocation10 + $0x58] sm:$0xff] }
 0x523   :  { %v966_v17 = vpop.f32.mrf.mxu0  ;;  %v1037_v50 = vpop.f32.mrf.mxu1  ;;  %7031 = vst [vmem:[#allocation32_spill] sm:$0xff] %v6498_v5 }
 0x524   :  { %v4831_v18 = vmul.f32 -1.442695, %v1040_v16  ;;  %v1041_v19 = vadd.f32 %v966_v17, %v895_v14  ;;  %v1043_v60 = vadd.f32 %v1037_v50, %v897_v23  ;;  %v6490_v50 = vld [vmem:[#allocation10 + $0x78] sm:$0xff] }
 0x525   :  { %7029 = vst [vmem:[#allocation31_spill] sm:$0xff] %v6490_v50 }
 0x526   :  { %5290 = vpow2.f32 %v4831_v18  ;;  %v4832_v21 = vmul.f32 -1.442695, %v1041_v19  ;;  %v4833_v1 = vmul.f32 -1.442695, %v1043_v60  ;;  %v6494_v60 = vld [vmem:[#allocation10 + $0x70] sm:$0xff] }
 0x527   :  { %7030 = vst [vmem:[#allocation40_spill] sm:$0xff] %v6494_v60 }
 0x528   :  { %5292 = vpow2.f32 %v4832_v21 }
 0x529   :  { %5294 = vpow2.f32 %v4833_v1  ;;  %v7032_v1 = vld [vmem:[#allocation29_spill] sm:$0xff] }
 0x533   :  { %v5291_v24 = vpop.eup %5290 }
 0x534   :  { %v1053_v3 = vadd.f32 1.0, %v5291_v24 }
 0x535   :  { %v5293_v7 = vpop.eup %5292 }
 0x536   :  { %5296 = vrcp.f32 %v1053_v3  ;;  %v1054_v53 = vadd.f32 1.0, %v5293_v7  ;;  %v5295_v9 = vpop.eup %5294  ;;  %v6482_v3 = vld [vmem:[#allocation10 + $0x98] sm:$0xff]  ;;  %v6486_v7 = vld [vmem:[#allocation10 + $0x90] sm:$0xff] }
 0x537   :  { %5298 = vtanh.f32 %v1042_v22  ;;  %v1055_v17 = vadd.f32 1.0, %v5295_v9  ;;  %v6470_v22 = vld [vmem:[#allocation10 + $0xd0] sm:$0xff]  ;;  %7028 = vst [vmem:[#allocation39_spill] sm:$0xff] %v6486_v7 }
 0x538   :  { %5300 = vrcp.f32 %v1054_v53  ;;  %v6478_v53 = vld [vmem:[#allocation10 + $0xb0] sm:$0xff] }
 0x539   :  { %5302 = vrcp.f32 %v1055_v17  ;;  %v6502_v9 = vld [vmem:[#allocation10 + $0x50] sm:$0xff] }
 0x53a   :  { %7033 = vst [vmem:[#allocation41_spill] sm:$0xff] %v6502_v9  ;;  %v6512_v17 = vld [vmem:[#allocation10 + $0x30] sm:$0xff] }
 0x53b   :  { %7037 = vst [vmem:[#allocation36_spill] sm:$0xff] %v6512_v17 }
 0x543   :  { %v5297_v12 = vpop.eup %5296 }
 0x544   :  { %v5299_v14 = vpop.eup %5298 }
 0x545   :  { %v5301_v16 = vpop.eup %5300  ;;  %v1064_v18 = vmul.f32 %v5299_v14, %v5297_v12  ;;  %v7034_v12 = vld [vmem:[#allocation37_spill] sm:$0xff] }
 0x546   :  { %v1063_v19 = vmul.f32 %v5301_v16, %v6266_v57  ;;  %v5303_v24 = vpop.eup %5302  ;;  %v6474_v57 = vld [vmem:[#allocation10 + $0xb8] sm:$0xff]  ;;  %v6509_v16 = vld [vmem:[#allocation10 + $0x20] sm:$0xff] }
 0x547   :  { %v6506_v14 = vld [vmem:[#allocation10 + $0x38] sm:$0xff]  ;;  %7036 = vst [vmem:[#allocation42_spill] sm:$0xff] %v6509_v16 }
 0x548   :  { %v6430_v21 = vadd.f32 %v1064_v18, %v1063_v19  ;;  %7035 = vst [vmem:[#allocation34_spill] sm:$0xff] %v6506_v14  ;;  %v6515_v18 = vld [vmem:[#allocation10 + $0x8] sm:$0xff]  ;;  %v6518_v19 = vld [vmem:[#allocation10 + $0x18] sm:$0xff] }
 0x549   :  { %7038 = vst [vmem:[#allocation43_spill] sm:$0xff] %v6515_v18  ;;  %7039 = vst [vmem:[#allocation38_spill] sm:$0xff] %v6518_v19 }
 0x54a   :  { %5304 = vtanh.f32 %v6430_v21 }
 0x557   :  { %v5305_v20 = vpop.eup %5304 }
 0x558   :  { %v1067_v23 = vmul.f32 %v5305_v20, %v5303_v24  ;;  %v6521_v24 = vld [vmem:[#allocation10] sm:$0xff]  ;;  %v7041_v20 = vmov 0.0  }
 0x559   :  { %7040 = vst [vmem:[#allocation44_spill] sm:$0xff] %v6521_v24 }
 0x55a   :  { %1137 = vmatmul.mubr.f32.vlgmr.msra.gmra.mxu0 %v1067_v23  ;;  %1208 = vmatmul.mubr.f32.vlgmr.msra.gmra.mxu1 %v1067_v23  ;;  %v6525_v23 = vld [vmem:[#allocation10 + $0x10] sm:$0xff] }
 0x55b   :  { %1247 = vmatpush1.msra.mxu0 %v6269_v48  ;;  %1318 = vmatpush1.msra.mxu1 %v6272_v52  ;;  %7042 = vst [vmem:[#allocation26_spill] sm:$0xff] %v6525_v23 }
 0x55c   :  { %1248 = vmatprep.subr.mxu0 %v6275_v6  ;;  %1319 = vmatprep.subr.mxu1 %v6278_v59 }
 0x55d   :  { %1249 = vmatpush1.msra.mxu0 %v6281_v62  ;;  %1320 = vmatpush1.msra.mxu1 %v6284_v54 }
 0x55e   :  { %1250 = vmatprep.subr.mxu0 %v6287_v11  ;;  %1321 = vmatprep.subr.mxu1 %v6290_v58 }
 0x55f   :  { %1251 = vmatpush1.msra.mxu0 %v6293_v0  ;;  %1322 = vmatpush1.msra.mxu1 %v6296_v2 }
 0x560   :  { %1252 = vmatprep.subr.mxu0 %v6299_v4  ;;  %1323 = vmatprep.subr.mxu1 %v6302_v8 }
 0x561   :  { %1253 = vmatpush1.msra.mxu0 %v6305_v10  ;;  %1324 = vmatpush1.msra.mxu1 %v6308_v13 }
 0x562   :  { %1254 = vmatprep.subr.mxu0 %v6311_v15  ;;  %1325 = vmatprep.subr.mxu1 %v6314_v25 }
 0x563   :  { %1255 = vmatpush1.msra.mxu0 %v6317_v26  ;;  %1326 = vmatpush1.msra.mxu1 %v6320_v27 }
 0x564   :  { %1256 = vmatprep.subr.mxu0 %v6323_v28  ;;  %1327 = vmatprep.subr.mxu1 %v6326_v29 }
 0x565   :  { %1257 = vmatpush1.msra.mxu0 %v6329_v30  ;;  %1328 = vmatpush1.msra.mxu1 %v6332_v31 }
 0x566   :  { %1258 = vmatprep.subr.mxu0 %v6335_v32  ;;  %1329 = vmatprep.subr.mxu1 %v6338_v33 }
 0x567   :  { %1259 = vmatpush1.msra.mxu0 %v6341_v34  ;;  %1330 = vmatpush1.msra.mxu1 %v6344_v35 }
 0x568   :  { %1260 = vmatprep.subr.mxu0 %v6347_v36  ;;  %1331 = vmatprep.subr.mxu1 %v6350_v37 }
 0x569   :  { %1261 = vmatpush1.msra.mxu0 %v6353_v38  ;;  %1332 = vmatpush1.msra.mxu1 %v6356_v39 }
 0x56a   :  { %1262 = vmatprep.subr.mxu0 %v6359_v40  ;;  %1333 = vmatprep.subr.mxu1 %v6362_v41 }
 0x56b   :  { %1263 = vmatpush1.msra.mxu0 %v6365_v42  ;;  %1334 = vmatpush1.msra.mxu1 %v6368_v43 }
 0x56c   :  { %1264 = vmatprep.subr.mxu0 %v6371_v45  ;;  %1335 = vmatprep.subr.mxu1 %v6374_v56 }
 0x56d   :  { %1265 = vmatpush1.msra.mxu0 %v6377_v44  ;;  %1336 = vmatpush1.msra.mxu1 %v6470_v22 }
 0x56e   :  { %1266 = vmatprep.subr.mxu0 %v6381_v55  ;;  %1337 = vmatprep.subr.mxu1 %v6474_v57 }
 0x56f   :  { %1267 = vmatpush1.msra.mxu0 %v6385_v61  ;;  %1338 = vmatpush1.msra.mxu1 %v6478_v53 }
 0x570   :  { %1268 = vmatprep.subr.mxu0 %v6389_v63  ;;  %1339 = vmatprep.subr.mxu1 %v6482_v3 }
 0x571   :  { %1269 = vmatpush1.msra.mxu0 %v6393_v46  ;;  %1340 = vmatpush1.msra.mxu1 %v6486_v7 }
 0x572   :  { %1270 = vmatprep.subr.mxu0 %v6397_v47  ;;  %1341 = vmatprep.subr.mxu1 %v6490_v50  ;;  %v1070_v50 = vld [vmem:[#allocation3 + $0xb0] sm:$0xff] }
 0x573   :  { %1271 = vmatpush1.msra.mxu0 %v6401_v49  ;;  %1342 = vmatpush1.msra.mxu1 %v6494_v60  ;;  %v1071_v60 = vld [vmem:[#allocation3 + $0xb8] sm:$0xff] }
 0x574   :  { %1272 = vmatprep.subr.mxu0 %v6405_v51  ;;  %1343 = vmatprep.subr.mxu1 %v6498_v5 }
 0x575   :  { %1273 = vmatpush1.msra.mxu0 %v7032_v1  ;;  %1344 = vmatpush1.msra.mxu1 %v6502_v9 }
 0x576   :  { %1274 = vmatprep.subr.mxu0 %v7034_v12  ;;  %1345 = vmatprep.subr.mxu1 %v6506_v14  ;;  %v1069_v12 = vld [vmem:[#allocation3 + $0xa8] sm:$0xff] }
 0x577   :  { %1275 = vmatpush1.msra.mxu0 %v6509_v16  ;;  %1346 = vmatpush1.msra.mxu1 %v6512_v17  ;;  %v7043_v17 = vld [vmem:[#allocation24_spill] sm:$0xff]  ;;  %v7044_v16 = vld [vmem:[#allocation30_spill] sm:$0xff] }
 0x578   :  { %1276 = vmatprep.subr.mxu0 %v6515_v18  ;;  %1347 = vmatprep.subr.mxu1 %v6518_v19  ;;  %v1068_v18 = vld [vmem:[#allocation3 + $0xa0] sm:$0xff] }
 0x579   :  { %1277 = vmatpush1.msra.mxu0 %v6521_v24  ;;  %1310 = vmatprep.mubr.f32.mxu0 %v7041_v20 }
 0x57a   :  { %1348 = vmatpush1.msra.mxu1 %v6525_v23  ;;  %1381 = vmatprep.mubr.f32.mxu1 %v7041_v20 }
 0x57b   :  { %1420 = vmatprep.subr.mxu0 %v7043_v17  ;;  %1491 = vmatprep.subr.mxu1 %v7044_v16 }
 0x61a   :  { %v1138_v14 = vpop.f32.mrf.mxu0  ;;  %v1209_v24 = vpop.f32.mrf.mxu1 }
 0x61b   :  { %v1214_v19 = vadd.f32 %v1138_v14, %v1068_v18  ;;  %v1216_v17 = vadd.f32 %v1209_v24, %v1070_v50 }
 0x61c   :  { %v1140_v9 = vpop.f32.mrf.mxu0  ;;  %v1211_v49 = vpop.f32.mrf.mxu1 }
 0x61d   :  { %v4834_v1 = vmul.f32 -1.442695, %v1214_v19  ;;  %v1215_v5 = vadd.f32 %v1140_v9, %v1069_v12  ;;  %v1217_v23 = vadd.f32 %v1211_v49, %v1071_v60 }
 0x61f   :  { %5306 = vpow2.f32 %v4834_v1  ;;  %v4835_v51 = vmul.f32 -1.442695, %v1215_v5  ;;  %v4836_v20 = vmul.f32 -1.442695, %v1217_v23  ;;  %v1665_v23 = vld [vmem:[#allocation11 + $0x1f8] sm:$0xff] }
 0x621   :  { %5308 = vpow2.f32 %v4835_v51 }
 0x622   :  { %5310 = vpow2.f32 %v4836_v20  ;;  %v1663_v20 = vld [vmem:[#allocation11 + $0x1e8] sm:$0xff] }
 0x62c   :  { %v5307_v47 = vpop.eup %5306 }
 0x62d   :  { %v1227_v7 = vadd.f32 1.0, %v5307_v47 }
 0x62e   :  { %v5309_v16 = vpop.eup %5308 }
 0x62f   :  { %5312 = vrcp.f32 %v1227_v7  ;;  %v1228_v46 = vadd.f32 1.0, %v5309_v16  ;;  %v5311_v14 = vpop.eup %5310  ;;  %v1664_v16 = vld [vmem:[#allocation11 + $0x1f0] sm:$0xff] }
 0x630   :  { %5314 = vtanh.f32 %v1216_v17  ;;  %v1229_v5 = vadd.f32 1.0, %v5311_v14  ;;  %v1662_v17 = vld [vmem:[#allocation11 + $0x1e0] sm:$0xff]  ;;  %v1659_v14 = vld [vmem:[#allocation11 + $0x1c8] sm:$0xff] }
 0x631   :  { %5316 = vrcp.f32 %v1228_v46 }
 0x632   :  { %5318 = vrcp.f32 %v1229_v5  ;;  %v1655_v5 = vld [vmem:[#allocation11 + $0x1a8] sm:$0xff] }
 0x63c   :  { %v5313_v9 = vpop.eup %5312 }
 0x63d   :  { %v5315_v1 = vpop.eup %5314 }
 0x63e   :  { %v5317_v12 = vpop.eup %5316  ;;  %v1238_v51 = vmul.f32 %v5315_v1, %v5313_v9  ;;  %v1661_v9 = vld [vmem:[#allocation11 + $0x1d8] sm:$0xff]  ;;  %v1658_v1 = vld [vmem:[#allocation11 + $0x1c0] sm:$0xff] }
 0x63f   :  { %v1237_v18 = vmul.f32 %v5317_v12, %v6430_v21  ;;  %v5319_v47 = vpop.eup %5318  ;;  %v1660_v12 = vld [vmem:[#allocation11 + $0x1d0] sm:$0xff] }
 0x641   :  { %v6532_v49 = vadd.f32 %v1238_v51, %v1237_v18  ;;  %v1657_v51 = vld [vmem:[#allocation11 + $0x1b8] sm:$0xff]  ;;  %v1654_v18 = vld [vmem:[#allocation11 + $0x1a0] sm:$0xff] }
 0x643   :  { %5320 = vtanh.f32 %v6532_v49 }
 0x650   :  { %v5321_v50 = vpop.eup %5320 }
 0x651   :  { %v1241_v60 = vmul.f32 %v5321_v50, %v5319_v47  ;;  %v1651_v47 = vld [vmem:[#allocation11 + $0x188] sm:$0xff]  ;;  %v1653_v50 = vld [vmem:[#allocation11 + $0x198] sm:$0xff] }
 0x653   :  { %1311 = vmatmul.mubr.f32.vlgmr.msra.gmra.mxu0 %v1241_v60  ;;  %1382 = vmatmul.mubr.f32.vlgmr.msra.gmra.mxu1 %v1241_v60  ;;  %v1650_v60 = vld [vmem:[#allocation11 + $0x180] sm:$0xff] }
 0x654   :  { %1421 = vmatpush1.msra.mxu0 %v6269_v48  ;;  %1492 = vmatpush1.msra.mxu1 %v6272_v52  ;;  %v7045_v48 = vld [vmem:[#allocation27_spill] sm:$0xff] }
 0x655   :  { %1422 = vmatprep.subr.mxu0 %v6275_v6  ;;  %1493 = vmatprep.subr.mxu1 %v6278_v59  ;;  %v7046_v52 = vld [vmem:[#allocation39_spill] sm:$0xff]  ;;  %v7047_v6 = vld [vmem:[#allocation33_spill] sm:$0xff] }
 0x656   :  { %1423 = vmatpush1.msra.mxu0 %v6281_v62  ;;  %1494 = vmatpush1.msra.mxu1 %v6284_v54  ;;  %v7048_v59 = vld [vmem:[#allocation31_spill] sm:$0xff]  ;;  %v7049_v62 = vld [vmem:[#allocation28_spill] sm:$0xff] }
 0x657   :  { %1424 = vmatprep.subr.mxu0 %v6287_v11  ;;  %1495 = vmatprep.subr.mxu1 %v6290_v58  ;;  %v7050_v54 = vld [vmem:[#allocation40_spill] sm:$0xff]  ;;  %v7051_v11 = vld [vmem:[#allocation35_spill] sm:$0xff] }
 0x658   :  { %1425 = vmatpush1.msra.mxu0 %v6293_v0  ;;  %1496 = vmatpush1.msra.mxu1 %v6296_v2  ;;  %v7052_v58 = vld [vmem:[#allocation32_spill] sm:$0xff]  ;;  %v7053_v0 = vld [vmem:[#allocation29_spill] sm:$0xff] }
 0x659   :  { %1426 = vmatprep.subr.mxu0 %v6299_v4  ;;  %1497 = vmatprep.subr.mxu1 %v6302_v8  ;;  %v7054_v2 = vld [vmem:[#allocation41_spill] sm:$0xff]  ;;  %v7056_v8 = vld [vmem:[#allocation34_spill] sm:$0xff] }
 0x65a   :  { %1427 = vmatpush1.msra.mxu0 %v6305_v10  ;;  %1498 = vmatpush1.msra.mxu1 %v6308_v13  ;;  %v7055_v4 = vld [vmem:[#allocation37_spill] sm:$0xff]  ;;  %v7057_v10 = vld [vmem:[#allocation42_spill] sm:$0xff]  ;;  %v7058_v13 = vld [vmem:[#allocation36_spill] sm:$0xff] }
 0x65b   :  { %1428 = vmatprep.subr.mxu0 %v6311_v15  ;;  %1499 = vmatprep.subr.mxu1 %v6314_v25  ;;  %v7059_v15 = vld [vmem:[#allocation43_spill] sm:$0xff]  ;;  %v7060_v25 = vld [vmem:[#allocation38_spill] sm:$0xff] }
 0x65c   :  { %1429 = vmatpush1.msra.mxu0 %v6317_v26  ;;  %1500 = vmatpush1.msra.mxu1 %v6320_v27  ;;  %v7061_v26 = vld [vmem:[#allocation44_spill] sm:$0xff]  ;;  %v7062_v27 = vmov 0.0  }
 0x65d   :  { %1430 = vmatprep.subr.mxu0 %v6323_v28  ;;  %1501 = vmatprep.subr.mxu1 %v6326_v29  ;;  %v7063_v28 = vld [vmem:[#allocation26_spill] sm:$0xff] }
 0x65e   :  { %1431 = vmatpush1.msra.mxu0 %v6329_v30  ;;  %1502 = vmatpush1.msra.mxu1 %v6332_v31  ;;  %v1242_v29 = vld [vmem:[#allocation3 + $0xc0] sm:$0xff]  ;;  %v1243_v31 = vld [vmem:[#allocation3 + $0xc8] sm:$0xff] }
 0x65f   :  { %1432 = vmatprep.subr.mxu0 %v6335_v32  ;;  %1503 = vmatprep.subr.mxu1 %v6338_v33 }
 0x660   :  { %1433 = vmatpush1.msra.mxu0 %v6341_v34  ;;  %1504 = vmatpush1.msra.mxu1 %v6344_v35 }
 0x661   :  { %1434 = vmatprep.subr.mxu0 %v6347_v36  ;;  %1505 = vmatprep.subr.mxu1 %v6350_v37 }
 0x662   :  { %1435 = vmatpush1.msra.mxu0 %v6353_v38  ;;  %1506 = vmatpush1.msra.mxu1 %v6356_v39  ;;  %v1245_v38 = vld [vmem:[#allocation3 + $0xd8] sm:$0xff] }
 0x663   :  { %1436 = vmatprep.subr.mxu0 %v6359_v40  ;;  %1507 = vmatprep.subr.mxu1 %v6362_v41  ;;  %v1244_v41 = vld [vmem:[#allocation3 + $0xd0] sm:$0xff] }
 0x664   :  { %1437 = vmatpush1.msra.mxu0 %v6365_v42  ;;  %1508 = vmatpush1.msra.mxu1 %v6368_v43 }
 0x665   :  { %1438 = vmatprep.subr.mxu0 %v6371_v45  ;;  %1509 = vmatprep.subr.mxu1 %v6374_v56 }
 0x666   :  { %1439 = vmatpush1.msra.mxu0 %v6377_v44  ;;  %1510 = vmatpush1.msra.mxu1 %v6470_v22 }
 0x667   :  { %1440 = vmatprep.subr.mxu0 %v6381_v55  ;;  %1511 = vmatprep.subr.mxu1 %v6474_v57 }
 0x668   :  { %1441 = vmatpush1.msra.mxu0 %v6385_v61  ;;  %1512 = vmatpush1.msra.mxu1 %v6478_v53 }
 0x669   :  { %1442 = vmatprep.subr.mxu0 %v6389_v63  ;;  %1513 = vmatprep.subr.mxu1 %v6482_v3 }
 0x66a   :  { %1443 = vmatpush1.msra.mxu0 %v7045_v48  ;;  %1514 = vmatpush1.msra.mxu1 %v7046_v52  ;;  %v1652_v48 = vld [vmem:[#allocation11 + $0x190] sm:$0xff]  ;;  %v1647_v52 = vld [vmem:[#allocation11 + $0x168] sm:$0xff] }
 0x66b   :  { %1444 = vmatprep.subr.mxu0 %v7047_v6  ;;  %1515 = vmatprep.subr.mxu1 %v7048_v59  ;;  %v1649_v6 = vld [vmem:[#allocation11 + $0x178] sm:$0xff]  ;;  %v1646_v59 = vld [vmem:[#allocation11 + $0x160] sm:$0xff] }
 0x66c   :  { %1445 = vmatpush1.msra.mxu0 %v7049_v62  ;;  %1516 = vmatpush1.msra.mxu1 %v7050_v54  ;;  %v1648_v62 = vld [vmem:[#allocation11 + $0x170] sm:$0xff]  ;;  %v1643_v54 = vld [vmem:[#allocation11 + $0x148] sm:$0xff] }
 0x66d   :  { %1446 = vmatprep.subr.mxu0 %v7051_v11  ;;  %1517 = vmatprep.subr.mxu1 %v7052_v58  ;;  %v1645_v11 = vld [vmem:[#allocation11 + $0x158] sm:$0xff]  ;;  %v1642_v58 = vld [vmem:[#allocation11 + $0x140] sm:$0xff] }
 0x66e   :  { %1447 = vmatpush1.msra.mxu0 %v7053_v0  ;;  %1518 = vmatpush1.msra.mxu1 %v7054_v2  ;;  %v1644_v0 = vld [vmem:[#allocation11 + $0x150] sm:$0xff]  ;;  %v1639_v2 = vld [vmem:[#allocation11 + $0x128] sm:$0xff] }
 0x66f   :  { %1448 = vmatprep.subr.mxu0 %v7055_v4  ;;  %1519 = vmatprep.subr.mxu1 %v7056_v8  ;;  %v1641_v4 = vld [vmem:[#allocation11 + $0x138] sm:$0xff]  ;;  %v1638_v8 = vld [vmem:[#allocation11 + $0x120] sm:$0xff] }
 0x670   :  { %1449 = vmatpush1.msra.mxu0 %v7057_v10  ;;  %1520 = vmatpush1.msra.mxu1 %v7058_v13  ;;  %v1640_v10 = vld [vmem:[#allocation11 + $0x130] sm:$0xff]  ;;  %v1635_v13 = vld [vmem:[#allocation11 + $0x108] sm:$0xff] }
 0x671   :  { %1450 = vmatprep.subr.mxu0 %v7059_v15  ;;  %1521 = vmatprep.subr.mxu1 %v7060_v25  ;;  %v1637_v15 = vld [vmem:[#allocation11 + $0x118] sm:$0xff]  ;;  %v1634_v25 = vld [vmem:[#allocation11 + $0x100] sm:$0xff] }
 0x672   :  { %1451 = vmatpush1.msra.mxu0 %v7061_v26  ;;  %1484 = vmatprep.mubr.f32.mxu0 %v7062_v27  ;;  %v1636_v26 = vld [vmem:[#allocation11 + $0x110] sm:$0xff] }
 0x673   :  { %1522 = vmatpush1.msra.mxu1 %v7063_v28  ;;  %1555 = vmatprep.mubr.f32.mxu1 %v7062_v27  ;;  %v1631_v28 = vld [vmem:[#allocation11 + $0xe8] sm:$0xff] }
 0x674   :  { %1666 = vmatprep.subr.mxu0 %v1663_v20  ;;  %1737 = vmatprep.subr.mxu1 %v1665_v23  ;;  %v1602_v20 = vld [vmem:[#allocation11] sm:$0xff]  ;;  %v1604_v23 = vld [vmem:[#allocation11 + $0x10] sm:$0xff] }
 0x713   :  { %v1312_v30 = vpop.f32.mrf.mxu0  ;;  %v1383_v36 = vpop.f32.mrf.mxu1 }
 0x714   :  { %v1388_v32 = vadd.f32 %v1312_v30, %v1242_v29  ;;  %v1390_v45 = vadd.f32 %v1383_v36, %v1244_v41  ;;  %v1633_v29 = vld [vmem:[#allocation11 + $0xf8] sm:$0xff]  ;;  %v1630_v30 = vld [vmem:[#allocation11 + $0xe0] sm:$0xff]  ;;  %v1623_v36 = vld [vmem:[#allocation11 + $0xa8] sm:$0xff] }
 0x715   :  { %v1314_v33 = vpop.f32.mrf.mxu0  ;;  %v1385_v39 = vpop.f32.mrf.mxu1  ;;  %v1621_v41 = vld [vmem:[#allocation11 + $0x98] sm:$0xff] }
 0x716   :  { %v4837_v34 = vmul.f32 -1.442695, %v1388_v32  ;;  %v1389_v35 = vadd.f32 %v1314_v33, %v1243_v31  ;;  %v1391_v40 = vadd.f32 %v1385_v39, %v1245_v38  ;;  %v1632_v31 = vld [vmem:[#allocation11 + $0xf0] sm:$0xff]  ;;  %v1627_v32 = vld [vmem:[#allocation11 + $0xc8] sm:$0xff]  ;;  %v1629_v33 = vld [vmem:[#allocation11 + $0xd8] sm:$0xff] }
 0x717   :  { %v1622_v38 = vld [vmem:[#allocation11 + $0xa0] sm:$0xff]  ;;  %v1624_v39 = vld [vmem:[#allocation11 + $0xb0] sm:$0xff] }
 0x718   :  { %5322 = vpow2.f32 %v4837_v34  ;;  %v4838_v37 = vmul.f32 -1.442695, %v1389_v35  ;;  %v4839_v42 = vmul.f32 -1.442695, %v1391_v40  ;;  %v1626_v34 = vld [vmem:[#allocation11 + $0xc0] sm:$0xff]  ;;  %v1628_v35 = vld [vmem:[#allocation11 + $0xd0] sm:$0xff] }
 0x719   :  { %v1619_v40 = vld [vmem:[#allocation11 + $0x88] sm:$0xff] }
 0x71a   :  { %5324 = vpow2.f32 %v4838_v37  ;;  %v1625_v37 = vld [vmem:[#allocation11 + $0xb8] sm:$0xff] }
 0x71b   :  { %5326 = vpow2.f32 %v4839_v42  ;;  %v1618_v42 = vld [vmem:[#allocation11 + $0x80] sm:$0xff] }
 0x725   :  { %v5323_v43 = vpop.eup %5322 }
 0x726   :  { %v1401_v56 = vadd.f32 1.0, %v5323_v43  ;;  %v1620_v43 = vld [vmem:[#allocation11 + $0x90] sm:$0xff] }
 0x727   :  { %v5325_v44 = vpop.eup %5324 }
 0x728   :  { %5328 = vrcp.f32 %v1401_v56  ;;  %v1402_v55 = vadd.f32 1.0, %v5325_v44  ;;  %v5327_v61 = vpop.eup %5326  ;;  %v1617_v56 = vld [vmem:[#allocation11 + $0x78] sm:$0xff]  ;;  %v1614_v44 = vld [vmem:[#allocation11 + $0x60] sm:$0xff] }
 0x729   :  { %5330 = vtanh.f32 %v1390_v45  ;;  %v1403_v22 = vadd.f32 1.0, %v5327_v61  ;;  %v1615_v45 = vld [vmem:[#allocation11 + $0x68] sm:$0xff] }
 0x72a   :  { %5332 = vrcp.f32 %v1402_v55  ;;  %v1616_v55 = vld [vmem:[#allocation11 + $0x70] sm:$0xff]  ;;  %v1611_v61 = vld [vmem:[#allocation11 + $0x48] sm:$0xff] }
 0x72b   :  { %5334 = vrcp.f32 %v1403_v22  ;;  %v1607_v22 = vld [vmem:[#allocation11 + $0x28] sm:$0xff] }
 0x735   :  { %v5329_v63 = vpop.eup %5328 }
 0x736   :  { %v5331_v46 = vpop.eup %5330 }
 0x737   :  { %v5333_v21 = vpop.eup %5332  ;;  %v1412_v57 = vmul.f32 %v5331_v46, %v5329_v63  ;;  %v1613_v63 = vld [vmem:[#allocation11 + $0x58] sm:$0xff]  ;;  %v1610_v46 = vld [vmem:[#allocation11 + $0x40] sm:$0xff] }
 0x738   :  { %v1411_v53 = vmul.f32 %v5333_v21, %v6532_v49  ;;  %v5335_v7 = vpop.eup %5334  ;;  %v1656_v49 = vld [vmem:[#allocation11 + $0x1b0] sm:$0xff] }
 0x739   :  { %v1612_v21 = vld [vmem:[#allocation11 + $0x50] sm:$0xff] }
 0x73a   :  { %v6600_v3 = vadd.f32 %v1412_v57, %v1411_v53  ;;  %v1609_v57 = vld [vmem:[#allocation11 + $0x38] sm:$0xff]  ;;  %v1606_v53 = vld [vmem:[#allocation11 + $0x20] sm:$0xff] }
 0x73c   :  { %5336 = vtanh.f32 %v6600_v3 }
 0x749   :  { %v5337_v19 = vpop.eup %5336 }
 0x74a   :  { %v1415_v24 = vmul.f32 %v5337_v19, %v5335_v7  ;;  %v1608_v7 = vld [vmem:[#allocation11 + $0x30] sm:$0xff]  ;;  %v1603_v19 = vld [vmem:[#allocation11 + $0x8] sm:$0xff] }
 0x74c   :  { %1485 = vmatmul.mubr.f32.vlgmr.msra.gmra.mxu0 %v1415_v24  ;;  %1556 = vmatmul.mubr.f32.vlgmr.msra.gmra.mxu1 %v1415_v24  ;;  %v1605_v24 = vld [vmem:[#allocation11 + $0x18] sm:$0xff] }
 0x74d   :  { %1730 = vmatprep.mubr.f32.mxu0 %v7062_v27  ;;  %1801 = vmatprep.mubr.f32.mxu1 %v7062_v27 }
 0x74e   :  { %1667 = vmatpush1.msra.mxu0 %v1662_v17  ;;  %1738 = vmatpush1.msra.mxu1 %v1664_v16  ;;  %v6605_v17 = vld [vmem:[#allocation7] sm:$0xff] }
 0x74f   :  { %1668 = vmatprep.subr.mxu0 %v1659_v14  ;;  %1739 = vmatprep.subr.mxu1 %v1661_v9  ;;  %1594 = vst [vmem:[#allocation2 + $0x10] sm:$0xff] %v6605_v17  ;;  %v1416_v16 = vld [vmem:[#allocation3 + $0xe0] sm:$0xff]  ;;  %v1417_v9 = vld [vmem:[#allocation3 + $0xe8] sm:$0xff] }
 0x750   :  { %1669 = vmatpush1.msra.mxu0 %v1658_v1  ;;  %1740 = vmatpush1.msra.mxu1 %v1660_v12 }
 0x751   :  { %1670 = vmatprep.subr.mxu0 %v1655_v5  ;;  %1741 = vmatprep.subr.mxu1 %v1657_v51 }
 0x752   :  { %1671 = vmatpush1.msra.mxu0 %v1654_v18  ;;  %1742 = vmatpush1.msra.mxu1 %v1656_v49 }
 0x753   :  { %1672 = vmatprep.subr.mxu0 %v1651_v47  ;;  %1743 = vmatprep.subr.mxu1 %v1653_v50  ;;  %v1419_v47 = vld [vmem:[#allocation3 + $0xf8] sm:$0xff] }
 0x754   :  { %1673 = vmatpush1.msra.mxu0 %v1650_v60  ;;  %1744 = vmatpush1.msra.mxu1 %v1652_v48  ;;  %v1418_v48 = vld [vmem:[#allocation3 + $0xf0] sm:$0xff] }
 0x755   :  { %1674 = vmatprep.subr.mxu0 %v1647_v52  ;;  %1745 = vmatprep.subr.mxu1 %v1649_v6 }
 0x756   :  { %1675 = vmatpush1.msra.mxu0 %v1646_v59  ;;  %1746 = vmatpush1.msra.mxu1 %v1648_v62 }
 0x757   :  { %1676 = vmatprep.subr.mxu0 %v1643_v54  ;;  %1747 = vmatprep.subr.mxu1 %v1645_v11 }
 0x758   :  { %1677 = vmatpush1.msra.mxu0 %v1642_v58  ;;  %1748 = vmatpush1.msra.mxu1 %v1644_v0 }
 0x759   :  { %1678 = vmatprep.subr.mxu0 %v1639_v2  ;;  %1749 = vmatprep.subr.mxu1 %v1641_v4 }
 0x75a   :  { %1679 = vmatpush1.msra.mxu0 %v1638_v8  ;;  %1750 = vmatpush1.msra.mxu1 %v1640_v10 }
 0x75b   :  { %1680 = vmatprep.subr.mxu0 %v1635_v13  ;;  %1751 = vmatprep.subr.mxu1 %v1637_v15 }
 0x75c   :  { %1681 = vmatpush1.msra.mxu0 %v1634_v25  ;;  %1752 = vmatpush1.msra.mxu1 %v1636_v26 }
 0x75d   :  { %1682 = vmatprep.subr.mxu0 %v1631_v28  ;;  %1753 = vmatprep.subr.mxu1 %v1633_v29  ;;  %v6613_v29 = vld [vmem:[#allocation7 + $0x10] sm:$0xff] }
 0x75e   :  { %1683 = vmatpush1.msra.mxu0 %v1630_v30  ;;  %1754 = vmatpush1.msra.mxu1 %v1632_v31  ;;  %1596 = vst [vmem:[#allocation2 + $0x18] sm:$0xff] %v6613_v29  ;;  %v1591_v30 = vld [vmem:[#allocation7 + $0x8] sm:$0xff]  ;;  %v1593_v31 = vld [vmem:[#allocation7 + $0x18] sm:$0xff] }
 0x75f   :  { %1684 = vmatprep.subr.mxu0 %v1627_v32  ;;  %1755 = vmatprep.subr.mxu1 %v1629_v33  ;;  %1595 = vst [vmem:[#allocation2] sm:$0xff] %v1591_v30  ;;  %1597 = vst [vmem:[#allocation2 + $0x8] sm:$0xff] %v1593_v31  ;;  %v1851_v32 = vld [vmem:[#allocation14 + $0x78] sm:$0xff]  ;;  %v1849_v33 = vld [vmem:[#allocation14 + $0x68] sm:$0xff] }
 0x760   :  { %1685 = vmatpush1.msra.mxu0 %v1626_v34  ;;  %1756 = vmatpush1.msra.mxu1 %v1628_v35  ;;  %v1848_v34 = vld [vmem:[#allocation14 + $0x60] sm:$0xff]  ;;  %v1847_v35 = vld [vmem:[#allocation14 + $0x58] sm:$0xff] }
 0x761   :  { %1686 = vmatprep.subr.mxu0 %v1623_v36  ;;  %1757 = vmatprep.subr.mxu1 %v1625_v37  ;;  %v1846_v36 = vld [vmem:[#allocation14 + $0x50] sm:$0xff]  ;;  %v1845_v37 = vld [vmem:[#allocation14 + $0x48] sm:$0xff] }
 0x762   :  { %1687 = vmatpush1.msra.mxu0 %v1622_v38  ;;  %1758 = vmatpush1.msra.mxu1 %v1624_v39  ;;  %v1844_v38 = vld [vmem:[#allocation14 + $0x40] sm:$0xff]  ;;  %v1843_v39 = vld [vmem:[#allocation14 + $0x38] sm:$0xff] }
 0x763   :  { %1688 = vmatprep.subr.mxu0 %v1619_v40  ;;  %1759 = vmatprep.subr.mxu1 %v1621_v41  ;;  %v1842_v40 = vld [vmem:[#allocation14 + $0x30] sm:$0xff]  ;;  %v1841_v41 = vld [vmem:[#allocation14 + $0x28] sm:$0xff] }
 0x764   :  { %1689 = vmatpush1.msra.mxu0 %v1618_v42  ;;  %1760 = vmatpush1.msra.mxu1 %v1620_v43  ;;  %v1840_v42 = vld [vmem:[#allocation14 + $0x20] sm:$0xff]  ;;  %v1839_v43 = vld [vmem:[#allocation14 + $0x18] sm:$0xff] }
 0x765   :  { %1690 = vmatprep.subr.mxu0 %v1615_v45  ;;  %1761 = vmatprep.subr.mxu1 %v1617_v56  ;;  %v1838_v45 = vld [vmem:[#allocation14 + $0x10] sm:$0xff]  ;;  %v1837_v56 = vld [vmem:[#allocation14 + $0x8] sm:$0xff] }
 0x766   :  { %1691 = vmatpush1.msra.mxu0 %v1614_v44  ;;  %1762 = vmatpush1.msra.mxu1 %v1616_v55  ;;  %v1836_v44 = vld [vmem:[#allocation14] sm:$0xff] }
 0x767   :  { %1692 = vmatprep.subr.mxu0 %v1611_v61  ;;  %1763 = vmatprep.subr.mxu1 %v1613_v63 }
 0x768   :  { %1693 = vmatpush1.msra.mxu0 %v1610_v46  ;;  %1764 = vmatpush1.msra.mxu1 %v1612_v21 }
 0x769   :  { %1694 = vmatprep.subr.mxu0 %v1607_v22  ;;  %1765 = vmatprep.subr.mxu1 %v1609_v57 }
 0x76a   :  { %1695 = vmatpush1.msra.mxu0 %v1606_v53  ;;  %1766 = vmatpush1.msra.mxu1 %v1608_v7 }
 0x76b   :  { %1696 = vmatprep.subr.mxu0 %v1603_v19  ;;  %1767 = vmatprep.subr.mxu1 %v1605_v24 }
 0x76c   :  { %1697 = vmatpush1.msra.mxu0 %v1602_v20  ;;  %1768 = vmatpush1.msra.mxu1 %v1604_v23 }
 0x76d   :  { %4992 = vmatprep.subr.mxu0 %v7062_v27 }
 0x80c   :  { %v1486_v14 = vpop.f32.mrf.mxu0  ;;  %v1557_v18 = vpop.f32.mrf.mxu1 }
 0x80d   :  { %v1562_v1 = vadd.f32 %v1486_v14, %v1416_v16  ;;  %v1564_v59 = vadd.f32 %v1557_v18, %v1418_v48 }
 0x80e   :  { %v1488_v12 = vpop.f32.mrf.mxu0  ;;  %v1559_v50 = vpop.f32.mrf.mxu1 }
 0x80f   :  { %v4840_v5 = vmul.f32 -1.442695, %v1562_v1  ;;  %v1563_v51 = vadd.f32 %v1488_v12, %v1417_v9  ;;  %v1565_v60 = vadd.f32 %v1559_v50, %v1419_v47 }
 0x811   :  { %5338 = vpow2.f32 %v4840_v5  ;;  %v4841_v49 = vmul.f32 -1.442695, %v1563_v51  ;;  %v4842_v52 = vmul.f32 -1.442695, %v1565_v60  ;;  %v6645_v60 = vld [vmem:[%s6855_s7] ss:$0 sm:$0xff] }
 0x813   :  { %5340 = vpow2.f32 %v4841_v49 }
 0x814   :  { %5342 = vpow2.f32 %v4842_v52 }
 0x81e   :  { %v5339_v6 = vpop.eup %5338 }
 0x81f   :  { %v1575_v62 = vadd.f32 1.0, %v5339_v6 }
 0x820   :  { %v5341_v54 = vpop.eup %5340 }
 0x821   :  { %5344 = vrcp.f32 %v1575_v62  ;;  %v1576_v11 = vadd.f32 1.0, %v5341_v54  ;;  %v5343_v58 = vpop.eup %5342 }
 0x822   :  { %5346 = vtanh.f32 %v1564_v59  ;;  %v1577_v8 = vadd.f32 1.0, %v5343_v58 }
 0x823   :  { %5348 = vrcp.f32 %v1576_v11 }
 0x824   :  { %5350 = vrcp.f32 %v1577_v8 }
 0x82e   :  { %v5345_v0 = vpop.eup %5344 }
 0x82f   :  { %v5347_v2 = vpop.eup %5346 }
 0x830   :  { %v5349_v4 = vpop.eup %5348  ;;  %v1586_v10 = vmul.f32 %v5347_v2, %v5345_v0 }
 0x831   :  { %v1585_v13 = vmul.f32 %v5349_v4, %v6600_v3  ;;  %v5351_v25 = vpop.eup %5350  ;;  %v1850_v3 = vld [vmem:[#allocation14 + $0x70] sm:$0xff] }
 0x833   :  { %v6610_v15 = vadd.f32 %v1586_v10, %v1585_v13 }
 0x835   :  { %5352 = vtanh.f32 %v6610_v15 }
 0x842   :  { %v5353_v26 = vpop.eup %5352 }
 0x843   :  { %v1589_v28 = vmul.f32 %v5353_v26, %v5351_v25 }
 0x845   :  { %1731 = vmatmul.mubr.f32.vlgmr.msra.gmra.mxu0 %v1589_v28  ;;  %1802 = vmatmul.mubr.f32.vlgmr.msra.gmra.mxu1 %v1589_v28 }
 0x846   :  { %4993 = vmatpush3.msra.mxu0 %v1851_v32  ;;  %5024 = vmatprep.mubr.msk.f32.mxu0 %vm5692_vm0, %v7062_v27 }
 0x847   :  { %4994 = vmatprep.subr.mxu0 %v7062_v27 }
 0x848   :  { %4995 = vmatpush3.msra.mxu0 %v1850_v3 }
 0x849   :  { %4996 = vmatprep.subr.mxu0 %v7062_v27 }
 0x84a   :  { %4997 = vmatpush3.msra.mxu0 %v1849_v33 }
 0x84b   :  { %4998 = vmatprep.subr.mxu0 %v7062_v27 }
 0x84c   :  { %4999 = vmatpush3.msra.mxu0 %v1848_v34 }
 0x84d   :  { %5000 = vmatprep.subr.mxu0 %v7062_v27 }
 0x84e   :  { %5001 = vmatpush3.msra.mxu0 %v1847_v35 }
 0x84f   :  { %5002 = vmatprep.subr.mxu0 %v7062_v27 }
 0x850   :  { %5003 = vmatpush3.msra.mxu0 %v1846_v36 }
 0x851   :  { %5004 = vmatprep.subr.mxu0 %v7062_v27 }
 0x852   :  { %5005 = vmatpush3.msra.mxu0 %v1845_v37 }
 0x853   :  { %5006 = vmatprep.subr.mxu0 %v7062_v27 }
 0x854   :  { %5007 = vmatpush3.msra.mxu0 %v1844_v38 }
 0x855   :  { %5008 = vmatprep.subr.mxu0 %v7062_v27 }
 0x856   :  { %5009 = vmatpush3.msra.mxu0 %v1843_v39 }
 0x857   :  { %5010 = vmatprep.subr.mxu0 %v7062_v27 }
 0x858   :  { %5011 = vmatpush3.msra.mxu0 %v1842_v40 }
 0x859   :  { %5012 = vmatprep.subr.mxu0 %v7062_v27 }
 0x85a   :  { %5013 = vmatpush3.msra.mxu0 %v1841_v41 }
 0x85b   :  { %5014 = vmatprep.subr.mxu0 %v7062_v27 }
 0x85c   :  { %5015 = vmatpush3.msra.mxu0 %v1840_v42 }
 0x85d   :  { %5016 = vmatprep.subr.mxu0 %v7062_v27 }
 0x85e   :  { %5017 = vmatpush3.msra.mxu0 %v1839_v43 }
 0x85f   :  { %5018 = vmatprep.subr.mxu0 %v7062_v27 }
 0x860   :  { %5019 = vmatpush3.msra.mxu0 %v1838_v45 }
 0x861   :  { %5020 = vmatprep.subr.mxu0 %v7062_v27 }
 0x862   :  { %5021 = vmatpush3.msra.mxu0 %v1837_v56 }
 0x863   :  { %5022 = vmatprep.subr.mxu0 %v7062_v27 }
 0x864   :  { %5023 = vmatpush3.msra.mxu0 %v1836_v44 }
 0x905   :  { %v1732_v55 = vpop.f32.mrf.mxu0  ;;  %v1803_v22 = vpop.f32.mrf.mxu1 }
 0x906   :  { %v1808_v61 = vadd.f32 %v1732_v55, %v6605_v17  ;;  %v1810_v20 = vadd.f32 %v1803_v22, %v6613_v29 }
 0x907   :  { %v1734_v63 = vpop.f32.mrf.mxu0  ;;  %v1805_v53 = vpop.f32.mrf.mxu1 }
 0x908   :  { %v4843_v46 = vmul.f32 -1.442695, %v1808_v61  ;;  %v1809_v21 = vadd.f32 %v1734_v63, %v1591_v30  ;;  %v1811_v7 = vadd.f32 %v1805_v53, %v1593_v31 }
 0x90a   :  { %5354 = vpow2.f32 %v4843_v46  ;;  %v4844_v57 = vmul.f32 -1.442695, %v1809_v21  ;;  %v4845_v19 = vmul.f32 -1.442695, %v1811_v7 }
 0x90c   :  { %5356 = vpow2.f32 %v4844_v57 }
 0x90d   :  { %5358 = vpow2.f32 %v4845_v19 }
 0x917   :  { %v5355_v24 = vpop.eup %5354 }
 0x918   :  { %v1821_v23 = vadd.f32 1.0, %v5355_v24 }
 0x919   :  { %v5357_v16 = vpop.eup %5356 }
 0x91a   :  { %5360 = vrcp.f32 %v1821_v23  ;;  %v1822_v27 = vadd.f32 1.0, %v5357_v16  ;;  %v5359_v17 = vpop.eup %5358 }
 0x91b   :  { %5362 = vtanh.f32 %v1810_v20  ;;  %v1823_v12 = vadd.f32 1.0, %v5359_v17 }
 0x91c   :  { %5364 = vrcp.f32 %v1822_v27 }
 0x91d   :  { %5366 = vrcp.f32 %v1823_v12 }
 0x927   :  { %v5361_v14 = vpop.eup %5360 }
 0x928   :  { %v5363_v9 = vpop.eup %5362 }
 0x929   :  { %v5365_v1 = vpop.eup %5364  ;;  %v1832_v5 = vmul.f32 %v5363_v9, %v5361_v14 }
 0x92a   :  { %v1831_v51 = vmul.f32 %v5365_v1, %v6610_v15  ;;  %v5367_v49 = vpop.eup %5366 }
 0x92c   :  { %v6636_v18 = vadd.f32 %v1832_v5, %v1831_v51 }
 0x92e   :  { %5368 = vtanh.f32 %v6636_v18 }
 0x93b   :  { %v5369_v47 = vpop.eup %5368 }
 0x93c   :  { %v6639_v50 = vmul.f32 %v5369_v47, %v5367_v49 }
 0x93e   :  { %5025 = vmatmul.mubr.f32.vlgmr.msra.gmra.mxu0 %v6639_v50 }
 0x9fd   :  { %1927 = sbr.rel (%p4846_p7) target bundleno = 2565 (0xa05), region = 65 }
 0x9fe   :  { %v1918_v48 = vpop.f32.mrf.mxu0 }
 0x9ff   :  { %v1919_v52 = vadd.f32 %v6645_v60, %v1918_v48 }
 0xa00   :  { %v5026_v6 = vpop.f32.mrf.mxu0 }
 0xa01   :  { %1922 = vst [vmem:[#allocation16] sm:$0xff] %v1919_v52 }
 0xa02   :  { %v1928_v59 = vld [vmem:[#allocation7] sm:$0xff]  ;;  %v1929_v62 = vld [vmem:[#allocation7 + $0x8] sm:$0xff]  ;;  %v1930_v54 = vld [vmem:[#allocation7 + $0x10] sm:$0xff] }
 0xa03   :  { %1932 = vst [vmem:[#allocation2 + $0x10] sm:$0xff] %v1928_v59  ;;  %1933 = vst [vmem:[#allocation2] sm:$0xff] %v1929_v62  ;;  %v1931_v11 = vld [vmem:[#allocation7 + $0x18] sm:$0xff] }
 0xa04   :  { %1934 = vst [vmem:[#allocation2 + $0x18] sm:$0xff] %v1930_v54  ;;  %1935 = vst [vmem:[#allocation2 + $0x8] sm:$0xff] %v1931_v11 }
 0xa05 PF:  { %p4847_p8 = scmp.ne.s32.totalorder %s1923_s5, 0 }
 0xa07   :  { %1939 = sbr.rel (%p4847_p8) target bundleno = 3195 (0xc7b), region = 69 }
 0xa0c   :  { %1940 = vmax.xlane.f32.xlu0 %v1919_v52  ;;  %v7064_v0 = vld [vmem:[#allocation25_spill] sm:$0xff]  ;;  %v2022_v10 = vld [vmem:[#allocation13 + $0x1e8] sm:$0xff]  ;;  %v2021_v15 = vld [vmem:[#allocation13 + $0x1e0] sm:$0xff] }
 0xa0d   :  { %v2024_v13 = vld [vmem:[#allocation13 + $0x1f8] sm:$0xff]  ;;  %2025 = vmatprep.subr.mxu0 %v2022_v10  ;;  %v2023_v25 = vld [vmem:[#allocation13 + $0x1f0] sm:$0xff]  ;;  %v2018_v26 = vld [vmem:[#allocation13 + $0x1c8] sm:$0xff] }
 0xa0e   :  { %2096 = vmatprep.subr.mxu1 %v2024_v13  ;;  %v2020_v28 = vld [vmem:[#allocation13 + $0x1d8] sm:$0xff]  ;;  %2026 = vmatpush1.msra.mxu0 %v2021_v15  ;;  %v2017_v29 = vld [vmem:[#allocation13 + $0x1c0] sm:$0xff]  ;;  %v2019_v30 = vld [vmem:[#allocation13 + $0x1d0] sm:$0xff] }
 0xa0f   :  { %2097 = vmatpush1.msra.mxu1 %v2023_v25  ;;  %v2014_v31 = vld [vmem:[#allocation13 + $0x1a8] sm:$0xff]  ;;  %2027 = vmatprep.subr.mxu0 %v2018_v26  ;;  %v2016_v32 = vld [vmem:[#allocation13 + $0x1b8] sm:$0xff]  ;;  %v2013_v3 = vld [vmem:[#allocation13 + $0x1a0] sm:$0xff] }
 0xa10   :  { %2098 = vmatprep.subr.mxu1 %v2020_v28  ;;  %v2015_v33 = vld [vmem:[#allocation13 + $0x1b0] sm:$0xff]  ;;  %2028 = vmatpush1.msra.mxu0 %v2017_v29  ;;  %v2010_v34 = vld [vmem:[#allocation13 + $0x188] sm:$0xff]  ;;  %v2012_v35 = vld [vmem:[#allocation13 + $0x198] sm:$0xff] }
 0xa11   :  { %2099 = vmatpush1.msra.mxu1 %v2019_v30  ;;  %2029 = vmatprep.subr.mxu0 %v2014_v31  ;;  %v2009_v36 = vld [vmem:[#allocation13 + $0x180] sm:$0xff]  ;;  %v2011_v37 = vld [vmem:[#allocation13 + $0x190] sm:$0xff]  ;;  %v2006_v38 = vld [vmem:[#allocation13 + $0x168] sm:$0xff]  ;;  %v5693_v31 = vmov 0.0  }
 0xa12   :  { %2100 = vmatprep.subr.mxu1 %v2016_v32  ;;  %2030 = vmatpush1.msra.mxu0 %v2013_v3  ;;  %v2008_v39 = vld [vmem:[#allocation13 + $0x178] sm:$0xff]  ;;  %v2005_v40 = vld [vmem:[#allocation13 + $0x160] sm:$0xff]  ;;  %v2007_v41 = vld [vmem:[#allocation13 + $0x170] sm:$0xff] }
 0xa13   :  { %2101 = vmatpush1.msra.mxu1 %v2015_v33  ;;  %2031 = vmatprep.subr.mxu0 %v2010_v34  ;;  %v2002_v42 = vld [vmem:[#allocation13 + $0x148] sm:$0xff]  ;;  %v2004_v43 = vld [vmem:[#allocation13 + $0x158] sm:$0xff]  ;;  %v2001_v45 = vld [vmem:[#allocation13 + $0x140] sm:$0xff] }
 0xa14   :  { %2102 = vmatprep.subr.mxu1 %v2012_v35  ;;  %2032 = vmatpush1.msra.mxu0 %v2009_v36  ;;  %v2003_v56 = vld [vmem:[#allocation13 + $0x150] sm:$0xff]  ;;  %v1998_v44 = vld [vmem:[#allocation13 + $0x128] sm:$0xff]  ;;  %v2000_v55 = vld [vmem:[#allocation13 + $0x138] sm:$0xff]  ;;  %v5694_v36 = vmov 1.0  }
 0xa15   :  { %2103 = vmatpush1.msra.mxu1 %v2011_v37  ;;  %2033 = vmatprep.subr.mxu0 %v2006_v38  ;;  %v1997_v61 = vld [vmem:[#allocation13 + $0x120] sm:$0xff]  ;;  %v1999_v63 = vld [vmem:[#allocation13 + $0x130] sm:$0xff]  ;;  %v1994_v46 = vld [vmem:[#allocation13 + $0x108] sm:$0xff] }
 0xa16   :  { %2104 = vmatprep.subr.mxu1 %v2008_v39  ;;  %2034 = vmatpush1.msra.mxu0 %v2005_v40  ;;  %v1996_v21 = vld [vmem:[#allocation13 + $0x118] sm:$0xff]  ;;  %v1993_v22 = vld [vmem:[#allocation13 + $0x100] sm:$0xff]  ;;  %v1995_v57 = vld [vmem:[#allocation13 + $0x110] sm:$0xff] }
 0xa17   :  { %2105 = vmatpush1.msra.mxu1 %v2007_v41  ;;  %2035 = vmatprep.subr.mxu0 %v2002_v42  ;;  %v1990_v53 = vld [vmem:[#allocation13 + $0xe8] sm:$0xff]  ;;  %v1992_v7 = vld [vmem:[#allocation13 + $0xf8] sm:$0xff]  ;;  %v1989_v19 = vld [vmem:[#allocation13 + $0xe0] sm:$0xff] }
 0xa18   :  { %2106 = vmatprep.subr.mxu1 %v2004_v43  ;;  %2036 = vmatpush1.msra.mxu0 %v2001_v45  ;;  %v1991_v24 = vld [vmem:[#allocation13 + $0xf0] sm:$0xff]  ;;  %v1986_v20 = vld [vmem:[#allocation13 + $0xc8] sm:$0xff]  ;;  %v1988_v23 = vld [vmem:[#allocation13 + $0xd8] sm:$0xff] }
 0xa19   :  { %2107 = vmatpush1.msra.mxu1 %v2003_v56  ;;  %2037 = vmatprep.subr.mxu0 %v1998_v44  ;;  %v1985_v16 = vld [vmem:[#allocation13 + $0xc0] sm:$0xff]  ;;  %v1987_v27 = vld [vmem:[#allocation13 + $0xd0] sm:$0xff]  ;;  %v1982_v17 = vld [vmem:[#allocation13 + $0xa8] sm:$0xff] }
 0xa1a   :  { %2108 = vmatprep.subr.mxu1 %v2000_v55  ;;  %2038 = vmatpush1.msra.mxu0 %v1997_v61  ;;  %v1984_v14 = vld [vmem:[#allocation13 + $0xb8] sm:$0xff]  ;;  %v1981_v9 = vld [vmem:[#allocation13 + $0xa0] sm:$0xff]  ;;  %v1983_v1 = vld [vmem:[#allocation13 + $0xb0] sm:$0xff] }
 0xa1b   :  { %2109 = vmatpush1.msra.mxu1 %v1999_v63  ;;  %2039 = vmatprep.subr.mxu0 %v1994_v46  ;;  %v1978_v12 = vld [vmem:[#allocation13 + $0x88] sm:$0xff]  ;;  %v1980_v5 = vld [vmem:[#allocation13 + $0x98] sm:$0xff]  ;;  %v1977_v51 = vld [vmem:[#allocation13 + $0x80] sm:$0xff] }
 0xa1c   :  { %2110 = vmatprep.subr.mxu1 %v1996_v21  ;;  %2040 = vmatpush1.msra.mxu0 %v1993_v22  ;;  %v1979_v49 = vld [vmem:[#allocation13 + $0x90] sm:$0xff]  ;;  %v1974_v47 = vld [vmem:[#allocation13 + $0x68] sm:$0xff]  ;;  %v1976_v48 = vld [vmem:[#allocation13 + $0x78] sm:$0xff] }
 0xa1d   :  { %2111 = vmatpush1.msra.mxu1 %v1995_v57  ;;  %2041 = vmatprep.subr.mxu0 %v1990_v53  ;;  %v1975_v6 = vld [vmem:[#allocation13 + $0x70] sm:$0xff]  ;;  %v1969_v10 = vld [vmem:[#allocation13 + $0x40] sm:$0xff]  ;;  %v1966_v15 = vld [vmem:[#allocation13 + $0x28] sm:$0xff] }
 0xa1e   :  { %2112 = vmatprep.subr.mxu1 %v1992_v7  ;;  %2042 = vmatpush1.msra.mxu0 %v1989_v19  ;;  %v1971_v13 = vld [vmem:[#allocation13 + $0x50] sm:$0xff]  ;;  %v1968_v25 = vld [vmem:[#allocation13 + $0x38] sm:$0xff]  ;;  %v1965_v26 = vld [vmem:[#allocation13 + $0x20] sm:$0xff] }
 0xa1f   :  { %2113 = vmatpush1.msra.mxu1 %v1991_v24  ;;  %2043 = vmatprep.subr.mxu0 %v1986_v20  ;;  %v1962_v28 = vld [vmem:[#allocation13 + $0x8] sm:$0xff]  ;;  %v1961_v29 = vld [vmem:[#allocation13] sm:$0xff]  ;;  %v1963_v30 = vld [vmem:[#allocation13 + $0x10] sm:$0xff] }
 0xa20   :  { %2114 = vmatprep.subr.mxu1 %v1988_v23  ;;  %2044 = vmatpush1.msra.mxu0 %v1985_v16 }
 0xa21   :  { %2115 = vmatpush1.msra.mxu1 %v1987_v27  ;;  %2045 = vmatprep.subr.mxu0 %v1982_v17 }
 0xa22   :  { %2116 = vmatprep.subr.mxu1 %v1984_v14  ;;  %2046 = vmatpush1.msra.mxu0 %v1981_v9 }
 0xa23   :  { %2117 = vmatpush1.msra.mxu1 %v1983_v1  ;;  %2047 = vmatprep.subr.mxu0 %v1978_v12 }
 0xa24   :  { %2118 = vmatprep.subr.mxu1 %v1980_v5  ;;  %2048 = vmatpush1.msra.mxu0 %v1977_v51 }
 0xa25   :  { %2119 = vmatpush1.msra.mxu1 %v1979_v49  ;;  %2049 = vmatprep.subr.mxu0 %v1974_v47 }
 0xa26   :  { %2120 = vmatprep.subr.mxu1 %v1976_v48  ;;  %2089 = vmatprep.mubr.f32.mxu0 %v5693_v31 }
 0xa27   :  { %2121 = vmatpush1.msra.mxu1 %v1975_v6  ;;  %2160 = vmatprep.mubr.f32.mxu1 %v5693_v31 }
 0xa95   :  { %v1941_v58 = vpop.xlane.xlu0 %1940 }
 0xa96   :  { %vm1942_vm1 = vcmp.ge.f32.partialorder %v1919_v52, %v1941_v58  ;;  %v1973_v52 = vld [vmem:[#allocation13 + $0x60] sm:$0xff]  ;;  %v1970_v58 = vld [vmem:[#allocation13 + $0x48] sm:$0xff] }
 0xa97   :  { %v6649_v2 = vsel %vm1942_vm1, %v7064_v0, 128  ;;  %2050 = vmatpush1.msra.mxu0 %v1973_v52 }
 0xa98   :  { %v1945_v4 = vshra.s32 %v6649_v2, 16  ;;  %v1944_v59 = vand.u32 65535, %v6649_v2  ;;  %2051 = vmatprep.subr.mxu0 %v1970_v58  ;;  %v1967_v2 = vld [vmem:[#allocation13 + $0x30] sm:$0xff] }
 0xa99   :  { %2052 = vmatpush1.msra.mxu0 %v1969_v10 }
 0xa9a   :  { %v6652_v8 = vcvt.s32.f32 %v1945_v4  ;;  %v1946_v54 = vcvt.s32.f32 %v1944_v59  ;;  %v1972_v4 = vld [vmem:[#allocation13 + $0x58] sm:$0xff]  ;;  %2053 = vmatprep.subr.mxu0 %v1966_v15 }
 0xa9b   :  { %2122 = vmatprep.subr.mxu1 %v1972_v4  ;;  %2054 = vmatpush1.msra.mxu0 %v1965_v26 }
 0xa9c   :  { %1948 = vmin.xlane.f32.xlu0 %v6652_v8  ;;  %2123 = vmatpush1.msra.mxu1 %v1971_v13 }
 0xa9d   :  { %2124 = vmatprep.subr.mxu1 %v1968_v25  ;;  %2055 = vmatprep.subr.mxu0 %v1962_v28 }
 0xa9e   :  { %2125 = vmatpush1.msra.mxu1 %v1967_v2  ;;  %2056 = vmatpush1.msra.mxu0 %v1961_v29 }
 0xb25   :  { %v1949_v62 = vpop.xlane.xlu0 %1948 }
 0xb26   :  { %vm1950_vm2 = vcmp.eq.f32.partialorder %v6652_v8, %v1949_v62  ;;  %v1964_v8 = vld [vmem:[#allocation13 + $0x18] sm:$0xff]  ;;  %v1955_v32 = vcvt.f32.s32 %v1949_v62 }
 0xb27   :  { %v1951_v11 = vsel %vm1950_vm2, %v1946_v54, inf  ;;  %2126 = vmatprep.subr.mxu1 %v1964_v8 }
 0xb28   :  { %1952 = vmin.xlane.f32.xlu1 %v1951_v11  ;;  %2127 = vmatpush1.msra.mxu1 %v1963_v30  ;;  %v1956_v33 = vshll.u32 %v1955_v32, 16 }
 0xbb1   :  { %v1953_v3 = vpop.xlane.xlu1 %1952 }
 0xbb2   :  { %v1954_v34 = vcvt.f32.s32 %v1953_v3 }
 0xbb4   :  { %v1957_v35 = vadd.s32 %v1956_v33, %v1954_v34 }
 0xbb6   :  { %vm1958_vm3 = vcmp.eq.s32.totalorder %v7064_v0, %v1957_v35 }
 0xbb7   :  { %4849 = vmatmul.mubr.msk.f32.vlgmr.msra.gmra.mxu0 %vm1958_vm3, %v5694_v36  ;;  %4850 = vmatmul.mubr.msk.f32.vlgmr.msra.gmra.mxu1 %vm1958_vm3, %v5694_v36 }
 0xc77   :  { %v2091_v37 = vpop.f32.mrf.mxu0  ;;  %v2162_v38 = vpop.f32.mrf.mxu1 }
 0xc78   :  { %2167 = vst [vmem:[#allocation2 + $0x10] sm:$0xff] %v2091_v37  ;;  %2169 = vst [vmem:[#allocation2 + $0x18] sm:$0xff] %v2162_v38 }
 0xc79   :  { %v2093_v39 = vpop.f32.mrf.mxu0  ;;  %v2164_v40 = vpop.f32.mrf.mxu1 }
 0xc7a   :  { %2168 = vst [vmem:[#allocation2] sm:$0xff] %v2093_v39  ;;  %2170 = vst [vmem:[#allocation2 + $0x8] sm:$0xff] %v2164_v40 }
 0xc7b PF:  { %v2236_v41 = vld [vmem:[#allocation11 + $0x1e8] sm:$0xff]  ;;  %v2235_v42 = vld [vmem:[#allocation11 + $0x1e0] sm:$0xff]  ;;  %v7065_v45 = vmov 0.0   ;;  %v2238_v63 = vld [vmem:[#allocation11 + $0x1f8] sm:$0xff]  ;;  %s4854_s7 = sld [smem:[#allocation9 + $0x1]] }
 0xc7c   :  { %v2232_v43 = vld [vmem:[#allocation11 + $0x1c8] sm:$0xff]  ;;  %2303 = vmatprep.mubr.f32.mxu0 %v7065_v45  ;;  %2374 = vmatprep.mubr.f32.mxu1 %v7065_v45  ;;  %v2231_v0 = vld [vmem:[#allocation11 + $0x1c0] sm:$0xff]  ;;  %v2237_v21 = vld [vmem:[#allocation11 + $0x1f0] sm:$0xff] }
 0xc7d   :  { %2239 = vmatprep.subr.mxu0 %v2236_v41  ;;  %v2228_v56 = vld [vmem:[#allocation11 + $0x1a8] sm:$0xff]  ;;  %v2227_v44 = vld [vmem:[#allocation11 + $0x1a0] sm:$0xff]  ;;  %2310 = vmatprep.subr.mxu1 %v2238_v63  ;;  %v2234_v57 = vld [vmem:[#allocation11 + $0x1d8] sm:$0xff] }
 0xc7e   :  { %2240 = vmatpush1.msra.mxu0 %v2235_v42  ;;  %v2224_v55 = vld [vmem:[#allocation11 + $0x188] sm:$0xff]  ;;  %v2223_v61 = vld [vmem:[#allocation11 + $0x180] sm:$0xff]  ;;  %2311 = vmatpush1.msra.mxu1 %v2237_v21  ;;  %v2233_v53 = vld [vmem:[#allocation11 + $0x1d0] sm:$0xff] }
 0xc7f   :  { %2241 = vmatprep.subr.mxu0 %v2232_v43  ;;  %v2220_v46 = vld [vmem:[#allocation11 + $0x168] sm:$0xff]  ;;  %v2219_v22 = vld [vmem:[#allocation11 + $0x160] sm:$0xff]  ;;  %2312 = vmatprep.subr.mxu1 %v2234_v57  ;;  %v2230_v19 = vld [vmem:[#allocation11 + $0x1b8] sm:$0xff] }
 0xc80   :  { %2242 = vmatpush1.msra.mxu0 %v2231_v0  ;;  %v2216_v7 = vld [vmem:[#allocation11 + $0x148] sm:$0xff]  ;;  %v2215_v24 = vld [vmem:[#allocation11 + $0x140] sm:$0xff]  ;;  %2313 = vmatpush1.msra.mxu1 %v2233_v53  ;;  %v2229_v20 = vld [vmem:[#allocation11 + $0x1b0] sm:$0xff] }
 0xc81   :  { %2243 = vmatprep.subr.mxu0 %v2228_v56  ;;  %v2226_v23 = vld [vmem:[#allocation11 + $0x198] sm:$0xff]  ;;  %v2212_v16 = vld [vmem:[#allocation11 + $0x128] sm:$0xff]  ;;  %2314 = vmatprep.subr.mxu1 %v2230_v19  ;;  %v2225_v27 = vld [vmem:[#allocation11 + $0x190] sm:$0xff]  ;;  %p4855_p9 = scmp.ne.s32.totalorder %s4854_s7, 1 }
 0xc82   :  { %2244 = vmatpush1.msra.mxu0 %v2227_v44  ;;  %v2211_v17 = vld [vmem:[#allocation11 + $0x120] sm:$0xff]  ;;  %2315 = vmatpush1.msra.mxu1 %v2229_v20  ;;  %v2222_v14 = vld [vmem:[#allocation11 + $0x178] sm:$0xff]  ;;  %v2208_v9 = vld [vmem:[#allocation11 + $0x108] sm:$0xff] }
 0xc83   :  { %2245 = vmatprep.subr.mxu0 %v2224_v55  ;;  %2316 = vmatprep.subr.mxu1 %v2226_v23  ;;  %v2221_v1 = vld [vmem:[#allocation11 + $0x170] sm:$0xff]  ;;  %v2207_v12 = vld [vmem:[#allocation11 + $0x100] sm:$0xff]  ;;  %v2218_v5 = vld [vmem:[#allocation11 + $0x158] sm:$0xff] }
 0xc84   :  { %2246 = vmatpush1.msra.mxu0 %v2223_v61  ;;  %2317 = vmatpush1.msra.mxu1 %v2225_v27  ;;  %v2204_v51 = vld [vmem:[#allocation11 + $0xe8] sm:$0xff]  ;;  %v2217_v49 = vld [vmem:[#allocation11 + $0x150] sm:$0xff]  ;;  %v2203_v47 = vld [vmem:[#allocation11 + $0xe0] sm:$0xff] }
 0xc85   :  { %2247 = vmatprep.subr.mxu0 %v2220_v46  ;;  %2318 = vmatprep.subr.mxu1 %v2222_v14  ;;  %v2214_v48 = vld [vmem:[#allocation11 + $0x138] sm:$0xff]  ;;  %v2200_v52 = vld [vmem:[#allocation11 + $0xc8] sm:$0xff]  ;;  %v2213_v6 = vld [vmem:[#allocation11 + $0x130] sm:$0xff] }
 0xc86   :  { %2248 = vmatpush1.msra.mxu0 %v2219_v22  ;;  %2319 = vmatpush1.msra.mxu1 %v2221_v1  ;;  %v2199_v59 = vld [vmem:[#allocation11 + $0xc0] sm:$0xff]  ;;  %v2210_v62 = vld [vmem:[#allocation11 + $0x118] sm:$0xff]  ;;  %v2196_v54 = vld [vmem:[#allocation11 + $0xa8] sm:$0xff] }
 0xc87   :  { %2249 = vmatprep.subr.mxu0 %v2216_v7  ;;  %2320 = vmatprep.subr.mxu1 %v2218_v5  ;;  %v2209_v11 = vld [vmem:[#allocation11 + $0x110] sm:$0xff]  ;;  %v2195_v58 = vld [vmem:[#allocation11 + $0xa0] sm:$0xff]  ;;  %v2206_v4 = vld [vmem:[#allocation11 + $0xf8] sm:$0xff] }
 0xc88   :  { %2250 = vmatpush1.msra.mxu0 %v2215_v24  ;;  %2321 = vmatpush1.msra.mxu1 %v2217_v49  ;;  %v2192_v10 = vld [vmem:[#allocation11 + $0x88] sm:$0xff]  ;;  %v2205_v13 = vld [vmem:[#allocation11 + $0xf0] sm:$0xff]  ;;  %v2191_v15 = vld [vmem:[#allocation11 + $0x80] sm:$0xff] }
 0xc89   :  { %2251 = vmatprep.subr.mxu0 %v2212_v16  ;;  %2322 = vmatprep.subr.mxu1 %v2214_v48  ;;  %v2202_v25 = vld [vmem:[#allocation11 + $0xd8] sm:$0xff]  ;;  %v2188_v26 = vld [vmem:[#allocation11 + $0x68] sm:$0xff]  ;;  %v2201_v2 = vld [vmem:[#allocation11 + $0xd0] sm:$0xff] }
 0xc8a   :  { %2252 = vmatpush1.msra.mxu0 %v2211_v17  ;;  %2323 = vmatpush1.msra.mxu1 %v2213_v6  ;;  %v2187_v28 = vld [vmem:[#allocation11 + $0x60] sm:$0xff]  ;;  %v2198_v8 = vld [vmem:[#allocation11 + $0xb8] sm:$0xff]  ;;  %v2184_v29 = vld [vmem:[#allocation11 + $0x48] sm:$0xff] }
 0xc8b   :  { %2253 = vmatprep.subr.mxu0 %v2208_v9  ;;  %2324 = vmatprep.subr.mxu1 %v2210_v62  ;;  %v2197_v30 = vld [vmem:[#allocation11 + $0xb0] sm:$0xff]  ;;  %v2183_v31 = vld [vmem:[#allocation11 + $0x40] sm:$0xff]  ;;  %v2194_v32 = vld [vmem:[#allocation11 + $0x98] sm:$0xff] }
 0xc8c   :  { %2254 = vmatpush1.msra.mxu0 %v2207_v12  ;;  %2325 = vmatpush1.msra.mxu1 %v2209_v11  ;;  %v2180_v3 = vld [vmem:[#allocation11 + $0x28] sm:$0xff]  ;;  %v2193_v33 = vld [vmem:[#allocation11 + $0x90] sm:$0xff]  ;;  %v2179_v34 = vld [vmem:[#allocation11 + $0x20] sm:$0xff] }
 0xc8d   :  { %2255 = vmatprep.subr.mxu0 %v2204_v51  ;;  %2326 = vmatprep.subr.mxu1 %v2206_v4  ;;  %v2190_v35 = vld [vmem:[#allocation11 + $0x78] sm:$0xff]  ;;  %v2176_v36 = vld [vmem:[#allocation11 + $0x8] sm:$0xff]  ;;  %v2189_v37 = vld [vmem:[#allocation11 + $0x70] sm:$0xff] }
 0xc8e   :  { %2256 = vmatpush1.msra.mxu0 %v2203_v47  ;;  %2327 = vmatpush1.msra.mxu1 %v2205_v13  ;;  %v2175_v38 = vld [vmem:[#allocation11] sm:$0xff]  ;;  %v2186_v39 = vld [vmem:[#allocation11 + $0x58] sm:$0xff]  ;;  %v2185_v40 = vld [vmem:[#allocation11 + $0x50] sm:$0xff] }
 0xc8f   :  { %2257 = vmatprep.subr.mxu0 %v2200_v52  ;;  %2328 = vmatprep.subr.mxu1 %v2202_v25  ;;  %v2182_v41 = vld [vmem:[#allocation11 + $0x38] sm:$0xff]  ;;  %v2181_v42 = vld [vmem:[#allocation11 + $0x30] sm:$0xff]  ;;  %v2422_v55 = vld [vmem:[#allocation14 + $0x68] sm:$0xff] }
 0xc90   :  { %2258 = vmatpush1.msra.mxu0 %v2199_v59  ;;  %2329 = vmatpush1.msra.mxu1 %v2201_v2  ;;  %v2178_v43 = vld [vmem:[#allocation11 + $0x18] sm:$0xff]  ;;  %v2177_v0 = vld [vmem:[#allocation11 + $0x10] sm:$0xff]  ;;  %v2421_v61 = vld [vmem:[#allocation14 + $0x60] sm:$0xff] }
 0xc91   :  { %2259 = vmatprep.subr.mxu0 %v2196_v54  ;;  %2330 = vmatprep.subr.mxu1 %v2198_v8  ;;  %v2424_v56 = vld [vmem:[#allocation14 + $0x78] sm:$0xff]  ;;  %v2423_v44 = vld [vmem:[#allocation14 + $0x70] sm:$0xff]  ;;  %v2418_v46 = vld [vmem:[#allocation14 + $0x48] sm:$0xff] }
 0xc92   :  { %2260 = vmatpush1.msra.mxu0 %v2195_v58  ;;  %2331 = vmatpush1.msra.mxu1 %v2197_v30  ;;  %v2420_v63 = vld [vmem:[#allocation14 + $0x58] sm:$0xff]  ;;  %v2417_v21 = vld [vmem:[#allocation14 + $0x40] sm:$0xff]  ;;  %v2415_v57 = vld [vmem:[#allocation14 + $0x30] sm:$0xff] }
 0xc93   :  { %2261 = vmatprep.subr.mxu0 %v2192_v10  ;;  %2332 = vmatprep.subr.mxu1 %v2194_v32  ;;  %v2416_v22 = vld [vmem:[#allocation14 + $0x38] sm:$0xff]  ;;  %v2414_v53 = vld [vmem:[#allocation14 + $0x28] sm:$0xff]  ;;  %v2413_v7 = vld [vmem:[#allocation14 + $0x20] sm:$0xff] }
 0xc94   :  { %2262 = vmatpush1.msra.mxu0 %v2191_v15  ;;  %2333 = vmatpush1.msra.mxu1 %v2193_v33  ;;  %v2412_v19 = vld [vmem:[#allocation14 + $0x18] sm:$0xff]  ;;  %v2411_v24 = vld [vmem:[#allocation14 + $0x10] sm:$0xff]  ;;  %v2410_v20 = vld [vmem:[#allocation14 + $0x8] sm:$0xff] }
 0xc95   :  { %2263 = vmatprep.subr.mxu0 %v2188_v26  ;;  %2334 = vmatprep.subr.mxu1 %v2190_v35  ;;  %v2409_v23 = vld [vmem:[#allocation14] sm:$0xff]  ;;  %v2171_v16 = vld [vmem:[#allocation2 + $0x10] sm:$0xff]  ;;  %v2174_v49 = vld [vmem:[#allocation2 + $0x8] sm:$0xff] }
 0xc96   :  { %2264 = vmatpush1.msra.mxu0 %v2187_v28  ;;  %2335 = vmatpush1.msra.mxu1 %v2189_v37  ;;  %v2172_v17 = vld [vmem:[#allocation2] sm:$0xff]  ;;  %v2173_v48 = vld [vmem:[#allocation2 + $0x18] sm:$0xff] }
 0xc97   :  { %2265 = vmatprep.subr.mxu0 %v2184_v29  ;;  %2336 = vmatprep.subr.mxu1 %v2186_v39 }
 0xc98   :  { %2266 = vmatpush1.msra.mxu0 %v2183_v31  ;;  %2337 = vmatpush1.msra.mxu1 %v2185_v40 }
 0xc99   :  { %2267 = vmatprep.subr.mxu0 %v2180_v3  ;;  %2338 = vmatprep.subr.mxu1 %v2182_v41 }
 0xc9a   :  { %2268 = vmatpush1.msra.mxu0 %v2179_v34  ;;  %2339 = vmatpush1.msra.mxu1 %v2181_v42 }
 0xc9b   :  { %2269 = vmatprep.subr.mxu0 %v2176_v36  ;;  %2340 = vmatprep.subr.mxu1 %v2178_v43 }
 0xc9c   :  { %2270 = vmatpush1.msra.mxu0 %v2175_v38  ;;  %2341 = vmatpush1.msra.mxu1 %v2177_v0 }
 0xc9d   :  { %2304 = vmatmul.mubr.f32.vlgmr.msra.gmra.mxu0 %v6639_v50  ;;  %5027 = vmatprep.subr.mxu0 %v7065_v45 }
 0xc9e   :  { %5059 = vmatprep.mubr.msk.f32.mxu0 %vm5692_vm0, %v7065_v45  ;;  %2375 = vmatmul.mubr.f32.vlgmr.msra.gmra.mxu1 %v6639_v50  ;;  %v2419_v50 = vld [vmem:[#allocation14 + $0x50] sm:$0xff] }
 0xc9f   :  { %5028 = vmatpush3.msra.mxu0 %v2424_v56 }
 0xca0   :  { %5029 = vmatprep.subr.mxu0 %v7065_v45 }
 0xca1   :  { %5030 = vmatpush3.msra.mxu0 %v2423_v44 }
 0xca2   :  { %5031 = vmatprep.subr.mxu0 %v7065_v45 }
 0xca3   :  { %5032 = vmatpush3.msra.mxu0 %v2422_v55 }
 0xca4   :  { %5033 = vmatprep.subr.mxu0 %v7065_v45 }
 0xca5   :  { %5034 = vmatpush3.msra.mxu0 %v2421_v61 }
 0xca6   :  { %5035 = vmatprep.subr.mxu0 %v7065_v45 }
 0xca7   :  { %5036 = vmatpush3.msra.mxu0 %v2420_v63 }
 0xca8   :  { %5037 = vmatprep.subr.mxu0 %v7065_v45 }
 0xca9   :  { %5038 = vmatpush3.msra.mxu0 %v2419_v50 }
 0xcaa   :  { %5039 = vmatprep.subr.mxu0 %v7065_v45 }
 0xcab   :  { %5040 = vmatpush3.msra.mxu0 %v2418_v46 }
 0xcac   :  { %5041 = vmatprep.subr.mxu0 %v7065_v45 }
 0xcad   :  { %5042 = vmatpush3.msra.mxu0 %v2417_v21 }
 0xcae   :  { %5043 = vmatprep.subr.mxu0 %v7065_v45 }
 0xcaf   :  { %5044 = vmatpush3.msra.mxu0 %v2416_v22 }
 0xcb0   :  { %5045 = vmatprep.subr.mxu0 %v7065_v45 }
 0xcb1   :  { %5046 = vmatpush3.msra.mxu0 %v2415_v57 }
 0xcb2   :  { %5047 = vmatprep.subr.mxu0 %v7065_v45 }
 0xcb3   :  { %5048 = vmatpush3.msra.mxu0 %v2414_v53 }
 0xcb4   :  { %5049 = vmatprep.subr.mxu0 %v7065_v45 }
 0xcb5   :  { %5050 = vmatpush3.msra.mxu0 %v2413_v7 }
 0xcb6   :  { %5051 = vmatprep.subr.mxu0 %v7065_v45 }
 0xcb7   :  { %5052 = vmatpush3.msra.mxu0 %v2412_v19 }
 0xcb8   :  { %5053 = vmatprep.subr.mxu0 %v7065_v45 }
 0xcb9   :  { %5054 = vmatpush3.msra.mxu0 %v2411_v24 }
 0xcba   :  { %5055 = vmatprep.subr.mxu0 %v7065_v45 }
 0xcbb   :  { %5056 = vmatpush3.msra.mxu0 %v2410_v20 }
 0xcbc   :  { %5057 = vmatprep.subr.mxu0 %v7065_v45 }
 0xcbd   :  { %5058 = vmatpush3.msra.mxu0 %v2409_v23 }
 0xd5d   :  { %v2305_v27 = vpop.f32.mrf.mxu0 }
 0xd5e   :  { %v2381_v14 = vadd.f32 %v2305_v27, %v2171_v16  ;;  %v2376_v51 = vpop.f32.mrf.mxu1 }
 0xd5f   :  { %v2307_v9 = vpop.f32.mrf.mxu0  ;;  %v2383_v6 = vadd.f32 %v2376_v51, %v2173_v48 }
 0xd60   :  { %v4851_v1 = vmul.f32 -1.442695, %v2381_v14  ;;  %v2382_v12 = vadd.f32 %v2307_v9, %v2172_v17  ;;  %v2378_v47 = vpop.f32.mrf.mxu1 }
 0xd61   :  { %v2384_v52 = vadd.f32 %v2378_v47, %v2174_v49 }
 0xd62   :  { %5434 = vpow2.f32 %v4851_v1  ;;  %v4852_v5 = vmul.f32 -1.442695, %v2382_v12 }
 0xd63   :  { %v4853_v59 = vmul.f32 -1.442695, %v2384_v52 }
 0xd64   :  { %5436 = vpow2.f32 %v4852_v5 }
 0xd65   :  { %5438 = vtanh.f32 %v2383_v6 }
 0xd66   :  { %5440 = vpow2.f32 %v4853_v59 }
 0xd6f   :  { %v5435_v62 = vpop.eup %5434 }
 0xd70   :  { %v2394_v45 = vadd.f32 1.0, %v5435_v62 }
 0xd71   :  { %v5437_v54 = vpop.eup %5436 }
 0xd72   :  { %5442 = vrcp.f32 %v2394_v45  ;;  %v2395_v11 = vadd.f32 1.0, %v5437_v54  ;;  %v5439_v58 = vpop.eup %5438 }
 0xd73   :  { %v5441_v4 = vpop.eup %5440 }
 0xd74   :  { %5444 = vrcp.f32 %v2395_v11  ;;  %v2396_v15 = vadd.f32 1.0, %v5441_v4 }
 0xd76   :  { %5446 = vrcp.f32 %v2396_v15 }
 0xd7f   :  { %v5443_v10 = vpop.eup %5442 }
 0xd80   :  { %v2405_v26 = vmul.f32 %v5443_v10, %v5439_v58 }
 0xd81   :  { %v5445_v13 = vpop.eup %5444 }
 0xd82   :  { %v2404_v25 = vmul.f32 %v5445_v13, %v6636_v18 }
 0xd83   :  { %v5447_v28 = vpop.eup %5446 }
 0xd84   :  { %v6681_v2 = vadd.f32 %v2405_v26, %v2404_v25 }
 0xd86   :  { %5448 = vtanh.f32 %v6681_v2 }
 0xd93   :  { %v5449_v8 = vpop.eup %5448 }
 0xd94   :  { %v6684_v29 = vmul.f32 %v5449_v8, %v5447_v28 }
 0xd96   :  { %5060 = vmatmul.mubr.f32.vlgmr.msra.gmra.mxu0 %v6684_v29 }
 0xe55   :  { %2501 = sbr.rel (%p4855_p9) target bundleno = 3677 (0xe5d), region = 73 }
 0xe56   :  { %v2491_v30 = vpop.f32.mrf.mxu0 }
 0xe57   :  { %v2492_v31 = vadd.f32 %v6645_v60, %v2491_v30 }
 0xe58   :  { %v5061_v32 = vpop.f32.mrf.mxu0 }
 0xe59   :  { %2496 = vst [vmem:[#allocation16 + $0x8] sm:$0xff] %v2492_v31 }
 0xe5a   :  { %v2503_v18 = vld [vmem:[#allocation7 + $0x20] sm:$0xff]  ;;  %v2504_v3 = vld [vmem:[#allocation7 + $0x28] sm:$0xff]  ;;  %v2505_v33 = vld [vmem:[#allocation7 + $0x30] sm:$0xff] }
 0xe5b   :  { %2507 = vst [vmem:[#allocation2 + $0x10] sm:$0xff] %v2503_v18  ;;  %2508 = vst [vmem:[#allocation2] sm:$0xff] %v2504_v3  ;;  %v2506_v34 = vld [vmem:[#allocation7 + $0x38] sm:$0xff] }
 0xe5c   :  { %2509 = vst [vmem:[#allocation2 + $0x18] sm:$0xff] %v2505_v33  ;;  %2510 = vst [vmem:[#allocation2 + $0x8] sm:$0xff] %v2506_v34 }
 0xe5d PF:  { %p4856_p10 = scmp.ne.s32.totalorder %s4854_s7, 0 }
 0xe5f   :  { %2514 = sbr.rel (%p4856_p10) target bundleno = 4307 (0x10d3), region = 77 }
 0xe64   :  { %2515 = vmax.xlane.f32.xlu0 %v2492_v31  ;;  %v7066_v36 = vld [vmem:[#allocation25_spill] sm:$0xff]  ;;  %v2597_v40 = vld [vmem:[#allocation13 + $0x1e8] sm:$0xff]  ;;  %v2596_v42 = vld [vmem:[#allocation13 + $0x1e0] sm:$0xff] }
 0xe65   :  { %v2599_v41 = vld [vmem:[#allocation13 + $0x1f8] sm:$0xff]  ;;  %2600 = vmatprep.subr.mxu0 %v2597_v40  ;;  %v2598_v43 = vld [vmem:[#allocation13 + $0x1f0] sm:$0xff]  ;;  %v2593_v0 = vld [vmem:[#allocation13 + $0x1c8] sm:$0xff] }
 0xe66   :  { %2671 = vmatprep.subr.mxu1 %v2599_v41  ;;  %v2595_v56 = vld [vmem:[#allocation13 + $0x1d8] sm:$0xff]  ;;  %2601 = vmatpush1.msra.mxu0 %v2596_v42  ;;  %v2592_v44 = vld [vmem:[#allocation13 + $0x1c0] sm:$0xff]  ;;  %v2594_v55 = vld [vmem:[#allocation13 + $0x1d0] sm:$0xff] }
 0xe67   :  { %2672 = vmatpush1.msra.mxu1 %v2598_v43  ;;  %v2589_v61 = vld [vmem:[#allocation13 + $0x1a8] sm:$0xff]  ;;  %2602 = vmatprep.subr.mxu0 %v2593_v0  ;;  %v2591_v63 = vld [vmem:[#allocation13 + $0x1b8] sm:$0xff]  ;;  %v2588_v50 = vld [vmem:[#allocation13 + $0x1a0] sm:$0xff] }
 0xe68   :  { %2673 = vmatprep.subr.mxu1 %v2595_v56  ;;  %v2590_v46 = vld [vmem:[#allocation13 + $0x1b0] sm:$0xff]  ;;  %2603 = vmatpush1.msra.mxu0 %v2592_v44  ;;  %v2585_v21 = vld [vmem:[#allocation13 + $0x188] sm:$0xff]  ;;  %v2587_v22 = vld [vmem:[#allocation13 + $0x198] sm:$0xff] }
 0xe69   :  { %2674 = vmatpush1.msra.mxu1 %v2594_v55  ;;  %2604 = vmatprep.subr.mxu0 %v2589_v61  ;;  %v2584_v57 = vld [vmem:[#allocation13 + $0x180] sm:$0xff]  ;;  %v2586_v53 = vld [vmem:[#allocation13 + $0x190] sm:$0xff]  ;;  %v2581_v7 = vld [vmem:[#allocation13 + $0x168] sm:$0xff]  ;;  %v5695_v61 = vmov 0.0  }
 0xe6a   :  { %2675 = vmatprep.subr.mxu1 %v2591_v63  ;;  %2605 = vmatpush1.msra.mxu0 %v2588_v50  ;;  %v2583_v19 = vld [vmem:[#allocation13 + $0x178] sm:$0xff]  ;;  %v2580_v24 = vld [vmem:[#allocation13 + $0x160] sm:$0xff]  ;;  %v2582_v20 = vld [vmem:[#allocation13 + $0x170] sm:$0xff] }
 0xe6b   :  { %2676 = vmatpush1.msra.mxu1 %v2590_v46  ;;  %2606 = vmatprep.subr.mxu0 %v2585_v21  ;;  %v2577_v23 = vld [vmem:[#allocation13 + $0x148] sm:$0xff]  ;;  %v2579_v16 = vld [vmem:[#allocation13 + $0x158] sm:$0xff]  ;;  %v2576_v27 = vld [vmem:[#allocation13 + $0x140] sm:$0xff] }
 0xe6c   :  { %2677 = vmatprep.subr.mxu1 %v2587_v22  ;;  %2607 = vmatpush1.msra.mxu0 %v2584_v57  ;;  %v2578_v17 = vld [vmem:[#allocation13 + $0x150] sm:$0xff]  ;;  %v2573_v14 = vld [vmem:[#allocation13 + $0x128] sm:$0xff]  ;;  %v2575_v9 = vld [vmem:[#allocation13 + $0x138] sm:$0xff]  ;;  %v5696_v57 = vmov 1.0  }
 0xe6d   :  { %2678 = vmatpush1.msra.mxu1 %v2586_v53  ;;  %2608 = vmatprep.subr.mxu0 %v2581_v7  ;;  %v2572_v1 = vld [vmem:[#allocation13 + $0x120] sm:$0xff]  ;;  %v2574_v12 = vld [vmem:[#allocation13 + $0x130] sm:$0xff]  ;;  %v2569_v5 = vld [vmem:[#allocation13 + $0x108] sm:$0xff] }
 0xe6e   :  { %2679 = vmatprep.subr.mxu1 %v2583_v19  ;;  %2609 = vmatpush1.msra.mxu0 %v2580_v24  ;;  %v2571_v51 = vld [vmem:[#allocation13 + $0x118] sm:$0xff]  ;;  %v2568_v49 = vld [vmem:[#allocation13 + $0x100] sm:$0xff]  ;;  %v2570_v47 = vld [vmem:[#allocation13 + $0x110] sm:$0xff] }
 0xe6f   :  { %2680 = vmatpush1.msra.mxu1 %v2582_v20  ;;  %2610 = vmatprep.subr.mxu0 %v2577_v23  ;;  %v2565_v48 = vld [vmem:[#allocation13 + $0xe8] sm:$0xff]  ;;  %v2567_v52 = vld [vmem:[#allocation13 + $0xf8] sm:$0xff]  ;;  %v2564_v6 = vld [vmem:[#allocation13 + $0xe0] sm:$0xff] }
 0xe70   :  { %2681 = vmatprep.subr.mxu1 %v2579_v16  ;;  %2611 = vmatpush1.msra.mxu0 %v2576_v27  ;;  %v2566_v59 = vld [vmem:[#allocation13 + $0xf0] sm:$0xff]  ;;  %v2561_v62 = vld [vmem:[#allocation13 + $0xc8] sm:$0xff]  ;;  %v2563_v45 = vld [vmem:[#allocation13 + $0xd8] sm:$0xff] }
 0xe71   :  { %2682 = vmatpush1.msra.mxu1 %v2578_v17  ;;  %2612 = vmatprep.subr.mxu0 %v2573_v14  ;;  %v2560_v54 = vld [vmem:[#allocation13 + $0xc0] sm:$0xff]  ;;  %v2562_v11 = vld [vmem:[#allocation13 + $0xd0] sm:$0xff]  ;;  %v2557_v58 = vld [vmem:[#allocation13 + $0xa8] sm:$0xff] }
 0xe72   :  { %2683 = vmatprep.subr.mxu1 %v2575_v9  ;;  %2613 = vmatpush1.msra.mxu0 %v2572_v1  ;;  %v2559_v4 = vld [vmem:[#allocation13 + $0xb8] sm:$0xff]  ;;  %v2556_v10 = vld [vmem:[#allocation13 + $0xa0] sm:$0xff]  ;;  %v2558_v13 = vld [vmem:[#allocation13 + $0xb0] sm:$0xff] }
 0xe73   :  { %2684 = vmatpush1.msra.mxu1 %v2574_v12  ;;  %2614 = vmatprep.subr.mxu0 %v2569_v5  ;;  %v2553_v15 = vld [vmem:[#allocation13 + $0x88] sm:$0xff]  ;;  %v2555_v25 = vld [vmem:[#allocation13 + $0x98] sm:$0xff]  ;;  %v2552_v26 = vld [vmem:[#allocation13 + $0x80] sm:$0xff] }
 0xe74   :  { %2685 = vmatprep.subr.mxu1 %v2571_v51  ;;  %2615 = vmatpush1.msra.mxu0 %v2568_v49  ;;  %v2554_v28 = vld [vmem:[#allocation13 + $0x90] sm:$0xff]  ;;  %v2549_v8 = vld [vmem:[#allocation13 + $0x68] sm:$0xff]  ;;  %v2551_v30 = vld [vmem:[#allocation13 + $0x78] sm:$0xff] }
 0xe75   :  { %2686 = vmatpush1.msra.mxu1 %v2570_v47  ;;  %2616 = vmatprep.subr.mxu0 %v2565_v48  ;;  %v2550_v32 = vld [vmem:[#allocation13 + $0x70] sm:$0xff]  ;;  %v2544_v40 = vld [vmem:[#allocation13 + $0x40] sm:$0xff]  ;;  %v2541_v42 = vld [vmem:[#allocation13 + $0x28] sm:$0xff] }
 0xe76   :  { %2687 = vmatprep.subr.mxu1 %v2567_v52  ;;  %2617 = vmatpush1.msra.mxu0 %v2564_v6  ;;  %v2546_v41 = vld [vmem:[#allocation13 + $0x50] sm:$0xff]  ;;  %v2543_v43 = vld [vmem:[#allocation13 + $0x38] sm:$0xff]  ;;  %v2540_v0 = vld [vmem:[#allocation13 + $0x20] sm:$0xff] }
 0xe77   :  { %2688 = vmatpush1.msra.mxu1 %v2566_v59  ;;  %2618 = vmatprep.subr.mxu0 %v2561_v62  ;;  %v2537_v56 = vld [vmem:[#allocation13 + $0x8] sm:$0xff]  ;;  %v2536_v44 = vld [vmem:[#allocation13] sm:$0xff]  ;;  %v2538_v55 = vld [vmem:[#allocation13 + $0x10] sm:$0xff] }
 0xe78   :  { %2689 = vmatprep.subr.mxu1 %v2563_v45  ;;  %2619 = vmatpush1.msra.mxu0 %v2560_v54 }
 0xe79   :  { %2690 = vmatpush1.msra.mxu1 %v2562_v11  ;;  %2620 = vmatprep.subr.mxu0 %v2557_v58 }
 0xe7a   :  { %2691 = vmatprep.subr.mxu1 %v2559_v4  ;;  %2621 = vmatpush1.msra.mxu0 %v2556_v10 }
 0xe7b   :  { %2692 = vmatpush1.msra.mxu1 %v2558_v13  ;;  %2622 = vmatprep.subr.mxu0 %v2553_v15 }
 0xe7c   :  { %2693 = vmatprep.subr.mxu1 %v2555_v25  ;;  %2623 = vmatpush1.msra.mxu0 %v2552_v26 }
 0xe7d   :  { %2694 = vmatpush1.msra.mxu1 %v2554_v28  ;;  %2624 = vmatprep.subr.mxu0 %v2549_v8 }
 0xe7e   :  { %2695 = vmatprep.subr.mxu1 %v2551_v30  ;;  %2664 = vmatprep.mubr.f32.mxu0 %v5695_v61 }
 0xe7f   :  { %2696 = vmatpush1.msra.mxu1 %v2550_v32  ;;  %2735 = vmatprep.mubr.f32.mxu1 %v5695_v61 }
 0xeed   :  { %v2516_v35 = vpop.xlane.xlu0 %2515 }
 0xeee   :  { %vm2517_vm4 = vcmp.ge.f32.partialorder %v2492_v31, %v2516_v35  ;;  %v2548_v31 = vld [vmem:[#allocation13 + $0x60] sm:$0xff]  ;;  %v2545_v35 = vld [vmem:[#allocation13 + $0x48] sm:$0xff] }
 0xeef   :  { %v6689_v37 = vsel %vm2517_vm4, %v7066_v36, 128  ;;  %2625 = vmatpush1.msra.mxu0 %v2548_v31 }
 0xef0   :  { %v2520_v38 = vshra.s32 %v6689_v37, 16  ;;  %v2519_v18 = vand.u32 65535, %v6689_v37  ;;  %2626 = vmatprep.subr.mxu0 %v2545_v35  ;;  %v2542_v37 = vld [vmem:[#allocation13 + $0x30] sm:$0xff] }
 0xef1   :  { %2627 = vmatpush1.msra.mxu0 %v2544_v40 }
 0xef2   :  { %v6692_v39 = vcvt.s32.f32 %v2520_v38  ;;  %v2521_v33 = vcvt.s32.f32 %v2519_v18  ;;  %v2547_v38 = vld [vmem:[#allocation13 + $0x58] sm:$0xff]  ;;  %2628 = vmatprep.subr.mxu0 %v2541_v42 }
 0xef3   :  { %2697 = vmatprep.subr.mxu1 %v2547_v38  ;;  %2629 = vmatpush1.msra.mxu0 %v2540_v0 }
 0xef4   :  { %2523 = vmin.xlane.f32.xlu0 %v6692_v39  ;;  %2698 = vmatpush1.msra.mxu1 %v2546_v41 }
 0xef5   :  { %2699 = vmatprep.subr.mxu1 %v2543_v43  ;;  %2630 = vmatprep.subr.mxu0 %v2537_v56 }
 0xef6   :  { %2700 = vmatpush1.msra.mxu1 %v2542_v37  ;;  %2631 = vmatpush1.msra.mxu0 %v2536_v44 }
 0xf7d   :  { %v2524_v3 = vpop.xlane.xlu0 %2523 }
 0xf7e   :  { %vm2525_vm5 = vcmp.eq.f32.partialorder %v6692_v39, %v2524_v3  ;;  %v2539_v39 = vld [vmem:[#allocation13 + $0x18] sm:$0xff]  ;;  %v2530_v63 = vcvt.f32.s32 %v2524_v3 }
 0xf7f   :  { %v2526_v34 = vsel %vm2525_vm5, %v2521_v33, inf  ;;  %2701 = vmatprep.subr.mxu1 %v2539_v39 }
 0xf80   :  { %2527 = vmin.xlane.f32.xlu1 %v2526_v34  ;;  %2702 = vmatpush1.msra.mxu1 %v2538_v55  ;;  %v2531_v46 = vshll.u32 %v2530_v63, 16 }
0x1009   :  { %v2528_v50 = vpop.xlane.xlu1 %2527 }
0x100a   :  { %v2529_v21 = vcvt.f32.s32 %v2528_v50 }
0x100c   :  { %v2532_v22 = vadd.s32 %v2531_v46, %v2529_v21 }
0x100e   :  { %vm2533_vm6 = vcmp.eq.s32.totalorder %v7066_v36, %v2532_v22 }
0x100f   :  { %4858 = vmatmul.mubr.msk.f32.vlgmr.msra.gmra.mxu0 %vm2533_vm6, %v5696_v57  ;;  %4859 = vmatmul.mubr.msk.f32.vlgmr.msra.gmra.mxu1 %vm2533_vm6, %v5696_v57 }
0x10cf   :  { %v2666_v53 = vpop.f32.mrf.mxu0  ;;  %v2737_v7 = vpop.f32.mrf.mxu1 }
0x10d0   :  { %2742 = vst [vmem:[#allocation2 + $0x10] sm:$0xff] %v2666_v53  ;;  %2744 = vst [vmem:[#allocation2 + $0x18] sm:$0xff] %v2737_v7 }
0x10d1   :  { %v2668_v19 = vpop.f32.mrf.mxu0  ;;  %v2739_v24 = vpop.f32.mrf.mxu1 }
0x10d2   :  { %2743 = vst [vmem:[#allocation2] sm:$0xff] %v2668_v19  ;;  %2745 = vst [vmem:[#allocation2 + $0x8] sm:$0xff] %v2739_v24 }
0x10d3 PF:  { %v2811_v20 = vld [vmem:[#allocation11 + $0x1e8] sm:$0xff]  ;;  %v2810_v23 = vld [vmem:[#allocation11 + $0x1e0] sm:$0xff]  ;;  %v7067_v27 = vmov 0.0   ;;  %v2813_v12 = vld [vmem:[#allocation11 + $0x1f8] sm:$0xff]  ;;  %s4863_s11 = sld [smem:[#allocation9 + $0x2]] }
0x10d4   :  { %v2807_v16 = vld [vmem:[#allocation11 + $0x1c8] sm:$0xff]  ;;  %2878 = vmatprep.mubr.f32.mxu0 %v7067_v27  ;;  %2949 = vmatprep.mubr.f32.mxu1 %v7067_v27  ;;  %v2806_v36 = vld [vmem:[#allocation11 + $0x1c0] sm:$0xff]  ;;  %v2812_v51 = vld [vmem:[#allocation11 + $0x1f0] sm:$0xff] }
0x10d5   :  { %2814 = vmatprep.subr.mxu0 %v2811_v20  ;;  %v2803_v17 = vld [vmem:[#allocation11 + $0x1a8] sm:$0xff]  ;;  %v2802_v14 = vld [vmem:[#allocation11 + $0x1a0] sm:$0xff]  ;;  %2885 = vmatprep.subr.mxu1 %v2813_v12  ;;  %v2809_v47 = vld [vmem:[#allocation11 + $0x1d8] sm:$0xff] }
0x10d6   :  { %2815 = vmatpush1.msra.mxu0 %v2810_v23  ;;  %v2799_v9 = vld [vmem:[#allocation11 + $0x188] sm:$0xff]  ;;  %v2798_v1 = vld [vmem:[#allocation11 + $0x180] sm:$0xff]  ;;  %2886 = vmatpush1.msra.mxu1 %v2812_v51  ;;  %v2808_v48 = vld [vmem:[#allocation11 + $0x1d0] sm:$0xff] }
0x10d7   :  { %2816 = vmatprep.subr.mxu0 %v2807_v16  ;;  %v2795_v5 = vld [vmem:[#allocation11 + $0x168] sm:$0xff]  ;;  %v2794_v49 = vld [vmem:[#allocation11 + $0x160] sm:$0xff]  ;;  %2887 = vmatprep.subr.mxu1 %v2809_v47  ;;  %v2805_v6 = vld [vmem:[#allocation11 + $0x1b8] sm:$0xff] }
0x10d8   :  { %2817 = vmatpush1.msra.mxu0 %v2806_v36  ;;  %v2791_v52 = vld [vmem:[#allocation11 + $0x148] sm:$0xff]  ;;  %v2790_v59 = vld [vmem:[#allocation11 + $0x140] sm:$0xff]  ;;  %2888 = vmatpush1.msra.mxu1 %v2808_v48  ;;  %v2804_v62 = vld [vmem:[#allocation11 + $0x1b0] sm:$0xff] }
0x10d9   :  { %2818 = vmatprep.subr.mxu0 %v2803_v17  ;;  %v2801_v45 = vld [vmem:[#allocation11 + $0x198] sm:$0xff]  ;;  %v2787_v54 = vld [vmem:[#allocation11 + $0x128] sm:$0xff]  ;;  %2889 = vmatprep.subr.mxu1 %v2805_v6  ;;  %v2800_v11 = vld [vmem:[#allocation11 + $0x190] sm:$0xff]  ;;  %p4864_p11 = scmp.ne.s32.totalorder %s4863_s11, 1 }
0x10da   :  { %2819 = vmatpush1.msra.mxu0 %v2802_v14  ;;  %v2786_v58 = vld [vmem:[#allocation11 + $0x120] sm:$0xff]  ;;  %2890 = vmatpush1.msra.mxu1 %v2804_v62  ;;  %v2797_v4 = vld [vmem:[#allocation11 + $0x178] sm:$0xff]  ;;  %v2783_v10 = vld [vmem:[#allocation11 + $0x108] sm:$0xff] }
0x10db   :  { %2820 = vmatprep.subr.mxu0 %v2799_v9  ;;  %2891 = vmatprep.subr.mxu1 %v2801_v45  ;;  %v2796_v13 = vld [vmem:[#allocation11 + $0x170] sm:$0xff]  ;;  %v2782_v15 = vld [vmem:[#allocation11 + $0x100] sm:$0xff]  ;;  %v2793_v25 = vld [vmem:[#allocation11 + $0x158] sm:$0xff] }
0x10dc   :  { %2821 = vmatpush1.msra.mxu0 %v2798_v1  ;;  %2892 = vmatpush1.msra.mxu1 %v2800_v11  ;;  %v2779_v26 = vld [vmem:[#allocation11 + $0xe8] sm:$0xff]  ;;  %v2792_v28 = vld [vmem:[#allocation11 + $0x150] sm:$0xff]  ;;  %v2778_v8 = vld [vmem:[#allocation11 + $0xe0] sm:$0xff] }
0x10dd   :  { %2822 = vmatprep.subr.mxu0 %v2795_v5  ;;  %2893 = vmatprep.subr.mxu1 %v2797_v4  ;;  %v2789_v30 = vld [vmem:[#allocation11 + $0x138] sm:$0xff]  ;;  %v2775_v31 = vld [vmem:[#allocation11 + $0xc8] sm:$0xff]  ;;  %v2788_v32 = vld [vmem:[#allocation11 + $0x130] sm:$0xff] }
0x10de   :  { %2823 = vmatpush1.msra.mxu0 %v2794_v49  ;;  %2894 = vmatpush1.msra.mxu1 %v2796_v13  ;;  %v2774_v18 = vld [vmem:[#allocation11 + $0xc0] sm:$0xff]  ;;  %v2785_v3 = vld [vmem:[#allocation11 + $0x118] sm:$0xff]  ;;  %v2771_v33 = vld [vmem:[#allocation11 + $0xa8] sm:$0xff] }
0x10df   :  { %2824 = vmatprep.subr.mxu0 %v2791_v52  ;;  %2895 = vmatprep.subr.mxu1 %v2793_v25  ;;  %v2784_v34 = vld [vmem:[#allocation11 + $0x110] sm:$0xff]  ;;  %v2770_v35 = vld [vmem:[#allocation11 + $0xa0] sm:$0xff]  ;;  %v2781_v38 = vld [vmem:[#allocation11 + $0xf8] sm:$0xff] }
0x10e0   :  { %2825 = vmatpush1.msra.mxu0 %v2790_v59  ;;  %2896 = vmatpush1.msra.mxu1 %v2792_v28  ;;  %v2767_v40 = vld [vmem:[#allocation11 + $0x88] sm:$0xff]  ;;  %v2780_v41 = vld [vmem:[#allocation11 + $0xf0] sm:$0xff]  ;;  %v2766_v42 = vld [vmem:[#allocation11 + $0x80] sm:$0xff] }
0x10e1   :  { %2826 = vmatprep.subr.mxu0 %v2787_v54  ;;  %2897 = vmatprep.subr.mxu1 %v2789_v30  ;;  %v2777_v43 = vld [vmem:[#allocation11 + $0xd8] sm:$0xff]  ;;  %v2763_v0 = vld [vmem:[#allocation11 + $0x68] sm:$0xff]  ;;  %v2776_v37 = vld [vmem:[#allocation11 + $0xd0] sm:$0xff] }
0x10e2   :  { %2827 = vmatpush1.msra.mxu0 %v2786_v58  ;;  %2898 = vmatpush1.msra.mxu1 %v2788_v32  ;;  %v2762_v56 = vld [vmem:[#allocation11 + $0x60] sm:$0xff]  ;;  %v2773_v39 = vld [vmem:[#allocation11 + $0xb8] sm:$0xff]  ;;  %v2759_v44 = vld [vmem:[#allocation11 + $0x48] sm:$0xff] }
0x10e3   :  { %2828 = vmatprep.subr.mxu0 %v2783_v10  ;;  %2899 = vmatprep.subr.mxu1 %v2785_v3  ;;  %v2772_v55 = vld [vmem:[#allocation11 + $0xb0] sm:$0xff]  ;;  %v2758_v61 = vld [vmem:[#allocation11 + $0x40] sm:$0xff]  ;;  %v2769_v63 = vld [vmem:[#allocation11 + $0x98] sm:$0xff] }
0x10e4   :  { %2829 = vmatpush1.msra.mxu0 %v2782_v15  ;;  %2900 = vmatpush1.msra.mxu1 %v2784_v34  ;;  %v2755_v50 = vld [vmem:[#allocation11 + $0x28] sm:$0xff]  ;;  %v2768_v46 = vld [vmem:[#allocation11 + $0x90] sm:$0xff]  ;;  %v2754_v21 = vld [vmem:[#allocation11 + $0x20] sm:$0xff] }
0x10e5   :  { %2830 = vmatprep.subr.mxu0 %v2779_v26  ;;  %2901 = vmatprep.subr.mxu1 %v2781_v38  ;;  %v2765_v22 = vld [vmem:[#allocation11 + $0x78] sm:$0xff]  ;;  %v2751_v57 = vld [vmem:[#allocation11 + $0x8] sm:$0xff]  ;;  %v2764_v53 = vld [vmem:[#allocation11 + $0x70] sm:$0xff] }
0x10e6   :  { %2831 = vmatpush1.msra.mxu0 %v2778_v8  ;;  %2902 = vmatpush1.msra.mxu1 %v2780_v41  ;;  %v2750_v7 = vld [vmem:[#allocation11] sm:$0xff]  ;;  %v2761_v19 = vld [vmem:[#allocation11 + $0x58] sm:$0xff]  ;;  %v2760_v24 = vld [vmem:[#allocation11 + $0x50] sm:$0xff] }
0x10e7   :  { %2832 = vmatprep.subr.mxu0 %v2775_v31  ;;  %2903 = vmatprep.subr.mxu1 %v2777_v43  ;;  %v2757_v20 = vld [vmem:[#allocation11 + $0x38] sm:$0xff]  ;;  %v2756_v23 = vld [vmem:[#allocation11 + $0x30] sm:$0xff]  ;;  %v2997_v9 = vld [vmem:[#allocation14 + $0x68] sm:$0xff] }
0x10e8   :  { %2833 = vmatpush1.msra.mxu0 %v2774_v18  ;;  %2904 = vmatpush1.msra.mxu1 %v2776_v37  ;;  %v2753_v16 = vld [vmem:[#allocation11 + $0x18] sm:$0xff]  ;;  %v2752_v36 = vld [vmem:[#allocation11 + $0x10] sm:$0xff]  ;;  %v2996_v1 = vld [vmem:[#allocation14 + $0x60] sm:$0xff] }
0x10e9   :  { %2834 = vmatprep.subr.mxu0 %v2771_v33  ;;  %2905 = vmatprep.subr.mxu1 %v2773_v39  ;;  %v2999_v17 = vld [vmem:[#allocation14 + $0x78] sm:$0xff]  ;;  %v2998_v14 = vld [vmem:[#allocation14 + $0x70] sm:$0xff]  ;;  %v2993_v5 = vld [vmem:[#allocation14 + $0x48] sm:$0xff] }
0x10ea   :  { %2835 = vmatpush1.msra.mxu0 %v2770_v35  ;;  %2906 = vmatpush1.msra.mxu1 %v2772_v55  ;;  %v2995_v12 = vld [vmem:[#allocation14 + $0x58] sm:$0xff]  ;;  %v2992_v51 = vld [vmem:[#allocation14 + $0x40] sm:$0xff]  ;;  %v2990_v47 = vld [vmem:[#allocation14 + $0x30] sm:$0xff] }
0x10eb   :  { %2836 = vmatprep.subr.mxu0 %v2767_v40  ;;  %2907 = vmatprep.subr.mxu1 %v2769_v63  ;;  %v2991_v49 = vld [vmem:[#allocation14 + $0x38] sm:$0xff]  ;;  %v2989_v48 = vld [vmem:[#allocation14 + $0x28] sm:$0xff]  ;;  %v2988_v52 = vld [vmem:[#allocation14 + $0x20] sm:$0xff] }
0x10ec   :  { %2837 = vmatpush1.msra.mxu0 %v2766_v42  ;;  %2908 = vmatpush1.msra.mxu1 %v2768_v46  ;;  %v2987_v6 = vld [vmem:[#allocation14 + $0x18] sm:$0xff]  ;;  %v2986_v59 = vld [vmem:[#allocation14 + $0x10] sm:$0xff]  ;;  %v2985_v62 = vld [vmem:[#allocation14 + $0x8] sm:$0xff] }
0x10ed   :  { %2838 = vmatprep.subr.mxu0 %v2763_v0  ;;  %2909 = vmatprep.subr.mxu1 %v2765_v22  ;;  %v2984_v45 = vld [vmem:[#allocation14] sm:$0xff]  ;;  %v2746_v54 = vld [vmem:[#allocation2 + $0x10] sm:$0xff]  ;;  %v2749_v28 = vld [vmem:[#allocation2 + $0x8] sm:$0xff] }
0x10ee   :  { %2839 = vmatpush1.msra.mxu0 %v2762_v56  ;;  %2910 = vmatpush1.msra.mxu1 %v2764_v53  ;;  %v2747_v58 = vld [vmem:[#allocation2] sm:$0xff]  ;;  %v2748_v30 = vld [vmem:[#allocation2 + $0x18] sm:$0xff] }
0x10ef   :  { %2840 = vmatprep.subr.mxu0 %v2759_v44  ;;  %2911 = vmatprep.subr.mxu1 %v2761_v19 }
0x10f0   :  { %2841 = vmatpush1.msra.mxu0 %v2758_v61  ;;  %2912 = vmatpush1.msra.mxu1 %v2760_v24 }
0x10f1   :  { %2842 = vmatprep.subr.mxu0 %v2755_v50  ;;  %2913 = vmatprep.subr.mxu1 %v2757_v20 }
0x10f2   :  { %2843 = vmatpush1.msra.mxu0 %v2754_v21  ;;  %2914 = vmatpush1.msra.mxu1 %v2756_v23 }
0x10f3   :  { %2844 = vmatprep.subr.mxu0 %v2751_v57  ;;  %2915 = vmatprep.subr.mxu1 %v2753_v16 }
0x10f4   :  { %2845 = vmatpush1.msra.mxu0 %v2750_v7  ;;  %2916 = vmatpush1.msra.mxu1 %v2752_v36 }
0x10f5   :  { %2879 = vmatmul.mubr.f32.vlgmr.msra.gmra.mxu0 %v6684_v29  ;;  %5062 = vmatprep.subr.mxu0 %v7067_v27 }
0x10f6   :  { %5094 = vmatprep.mubr.msk.f32.mxu0 %vm5692_vm0, %v7067_v27  ;;  %2950 = vmatmul.mubr.f32.vlgmr.msra.gmra.mxu1 %v6684_v29  ;;  %v2994_v29 = vld [vmem:[#allocation14 + $0x50] sm:$0xff] }
0x10f7   :  { %5063 = vmatpush3.msra.mxu0 %v2999_v17 }
0x10f8   :  { %5064 = vmatprep.subr.mxu0 %v7067_v27 }
0x10f9   :  { %5065 = vmatpush3.msra.mxu0 %v2998_v14 }
0x10fa   :  { %5066 = vmatprep.subr.mxu0 %v7067_v27 }
0x10fb   :  { %5067 = vmatpush3.msra.mxu0 %v2997_v9 }
0x10fc   :  { %5068 = vmatprep.subr.mxu0 %v7067_v27 }
0x10fd   :  { %5069 = vmatpush3.msra.mxu0 %v2996_v1 }
0x10fe   :  { %5070 = vmatprep.subr.mxu0 %v7067_v27 }
0x10ff   :  { %5071 = vmatpush3.msra.mxu0 %v2995_v12 }
0x1100   :  { %5072 = vmatprep.subr.mxu0 %v7067_v27 }
0x1101   :  { %5073 = vmatpush3.msra.mxu0 %v2994_v29 }
0x1102   :  { %5074 = vmatprep.subr.mxu0 %v7067_v27 }
0x1103   :  { %5075 = vmatpush3.msra.mxu0 %v2993_v5 }
0x1104   :  { %5076 = vmatprep.subr.mxu0 %v7067_v27 }
0x1105   :  { %5077 = vmatpush3.msra.mxu0 %v2992_v51 }
0x1106   :  { %5078 = vmatprep.subr.mxu0 %v7067_v27 }
0x1107   :  { %5079 = vmatpush3.msra.mxu0 %v2991_v49 }
0x1108   :  { %5080 = vmatprep.subr.mxu0 %v7067_v27 }
0x1109   :  { %5081 = vmatpush3.msra.mxu0 %v2990_v47 }
0x110a   :  { %5082 = vmatprep.subr.mxu0 %v7067_v27 }
0x110b   :  { %5083 = vmatpush3.msra.mxu0 %v2989_v48 }
0x110c   :  { %5084 = vmatprep.subr.mxu0 %v7067_v27 }
0x110d   :  { %5085 = vmatpush3.msra.mxu0 %v2988_v52 }
0x110e   :  { %5086 = vmatprep.subr.mxu0 %v7067_v27 }
0x110f   :  { %5087 = vmatpush3.msra.mxu0 %v2987_v6 }
0x1110   :  { %5088 = vmatprep.subr.mxu0 %v7067_v27 }
0x1111   :  { %5089 = vmatpush3.msra.mxu0 %v2986_v59 }
0x1112   :  { %5090 = vmatprep.subr.mxu0 %v7067_v27 }
0x1113   :  { %5091 = vmatpush3.msra.mxu0 %v2985_v62 }
0x1114   :  { %5092 = vmatprep.subr.mxu0 %v7067_v27 }
0x1115   :  { %5093 = vmatpush3.msra.mxu0 %v2984_v45 }
0x11b5   :  { %v2880_v11 = vpop.f32.mrf.mxu0 }
0x11b6   :  { %v2956_v4 = vadd.f32 %v2880_v11, %v2746_v54  ;;  %v2951_v26 = vpop.f32.mrf.mxu1 }
0x11b7   :  { %v2882_v10 = vpop.f32.mrf.mxu0  ;;  %v2958_v32 = vadd.f32 %v2951_v26, %v2748_v30 }
0x11b8   :  { %v4860_v13 = vmul.f32 -1.442695, %v2956_v4  ;;  %v2957_v15 = vadd.f32 %v2882_v10, %v2747_v58  ;;  %v2953_v8 = vpop.f32.mrf.mxu1 }
0x11b9   :  { %v2959_v31 = vadd.f32 %v2953_v8, %v2749_v28 }
0x11ba   :  { %5450 = vpow2.f32 %v4860_v13  ;;  %v4861_v25 = vmul.f32 -1.442695, %v2957_v15 }
0x11bb   :  { %v4862_v18 = vmul.f32 -1.442695, %v2959_v31 }
0x11bc   :  { %5452 = vpow2.f32 %v4861_v25 }
0x11bd   :  { %5454 = vtanh.f32 %v2958_v32 }
0x11be   :  { %5456 = vpow2.f32 %v4862_v18 }
0x11c7   :  { %v5451_v3 = vpop.eup %5450 }
0x11c8   :  { %v2969_v27 = vadd.f32 1.0, %v5451_v3 }
0x11c9   :  { %v5453_v33 = vpop.eup %5452 }
0x11ca   :  { %5458 = vrcp.f32 %v2969_v27  ;;  %v2970_v34 = vadd.f32 1.0, %v5453_v33  ;;  %v5455_v35 = vpop.eup %5454 }
0x11cb   :  { %v5457_v38 = vpop.eup %5456 }
0x11cc   :  { %5460 = vrcp.f32 %v2970_v34  ;;  %v2971_v42 = vadd.f32 1.0, %v5457_v38 }
0x11ce   :  { %5462 = vrcp.f32 %v2971_v42 }
0x11d7   :  { %v5459_v40 = vpop.eup %5458 }
0x11d8   :  { %v2980_v0 = vmul.f32 %v5459_v40, %v5455_v35 }
0x11d9   :  { %v5461_v41 = vpop.eup %5460 }
0x11da   :  { %v2979_v43 = vmul.f32 %v5461_v41, %v6681_v2 }
0x11db   :  { %v5463_v56 = vpop.eup %5462 }
0x11dc   :  { %v6721_v37 = vadd.f32 %v2980_v0, %v2979_v43 }
0x11de   :  { %5464 = vtanh.f32 %v6721_v37 }
0x11eb   :  { %v5465_v39 = vpop.eup %5464 }
0x11ec   :  { %v6724_v44 = vmul.f32 %v5465_v39, %v5463_v56 }
0x11ee   :  { %5095 = vmatmul.mubr.f32.vlgmr.msra.gmra.mxu0 %v6724_v44 }
0x12ad   :  { %3076 = sbr.rel (%p4864_p11) target bundleno = 4789 (0x12b5), region = 81 }
0x12ae   :  { %v3066_v55 = vpop.f32.mrf.mxu0 }
0x12af   :  { %v3067_v61 = vadd.f32 %v6645_v60, %v3066_v55 }
0x12b0   :  { %v5096_v63 = vpop.f32.mrf.mxu0 }
0x12b1   :  { %3071 = vst [vmem:[#allocation16 + $0x10] sm:$0xff] %v3067_v61 }
0x12b2   :  { %v3078_v2 = vld [vmem:[#allocation7 + $0x40] sm:$0xff]  ;;  %v3079_v50 = vld [vmem:[#allocation7 + $0x48] sm:$0xff]  ;;  %v3080_v46 = vld [vmem:[#allocation7 + $0x50] sm:$0xff] }
0x12b3   :  { %3082 = vst [vmem:[#allocation2 + $0x10] sm:$0xff] %v3078_v2  ;;  %3083 = vst [vmem:[#allocation2] sm:$0xff] %v3079_v50  ;;  %v3081_v21 = vld [vmem:[#allocation7 + $0x58] sm:$0xff] }
0x12b4   :  { %3084 = vst [vmem:[#allocation2 + $0x18] sm:$0xff] %v3080_v46  ;;  %3085 = vst [vmem:[#allocation2 + $0x8] sm:$0xff] %v3081_v21 }
0x12b5 PF:  { %p4865_p12 = scmp.ne.s32.totalorder %s4863_s11, 0 }
0x12b7   :  { %3089 = sbr.rel (%p4865_p12) target bundleno = 5419 (0x152b), region = 85 }
0x12bc   :  { %3090 = vmax.xlane.f32.xlu0 %v3067_v61  ;;  %v7068_v57 = vld [vmem:[#allocation25_spill] sm:$0xff]  ;;  %v3172_v24 = vld [vmem:[#allocation13 + $0x1e8] sm:$0xff]  ;;  %v3171_v23 = vld [vmem:[#allocation13 + $0x1e0] sm:$0xff] }
0x12bd   :  { %v3174_v20 = vld [vmem:[#allocation13 + $0x1f8] sm:$0xff]  ;;  %3175 = vmatprep.subr.mxu0 %v3172_v24  ;;  %v3173_v16 = vld [vmem:[#allocation13 + $0x1f0] sm:$0xff]  ;;  %v3168_v36 = vld [vmem:[#allocation13 + $0x1c8] sm:$0xff] }
0x12be   :  { %3246 = vmatprep.subr.mxu1 %v3174_v20  ;;  %v3170_v17 = vld [vmem:[#allocation13 + $0x1d8] sm:$0xff]  ;;  %3176 = vmatpush1.msra.mxu0 %v3171_v23  ;;  %v3167_v14 = vld [vmem:[#allocation13 + $0x1c0] sm:$0xff]  ;;  %v3169_v9 = vld [vmem:[#allocation13 + $0x1d0] sm:$0xff] }
0x12bf   :  { %3247 = vmatpush1.msra.mxu1 %v3173_v16  ;;  %v3164_v1 = vld [vmem:[#allocation13 + $0x1a8] sm:$0xff]  ;;  %3177 = vmatprep.subr.mxu0 %v3168_v36  ;;  %v3166_v12 = vld [vmem:[#allocation13 + $0x1b8] sm:$0xff]  ;;  %v3163_v29 = vld [vmem:[#allocation13 + $0x1a0] sm:$0xff] }
0x12c0   :  { %3248 = vmatprep.subr.mxu1 %v3170_v17  ;;  %v3165_v5 = vld [vmem:[#allocation13 + $0x1b0] sm:$0xff]  ;;  %3178 = vmatpush1.msra.mxu0 %v3167_v14  ;;  %v3160_v51 = vld [vmem:[#allocation13 + $0x188] sm:$0xff]  ;;  %v3162_v49 = vld [vmem:[#allocation13 + $0x198] sm:$0xff] }
0x12c1   :  { %3249 = vmatpush1.msra.mxu1 %v3169_v9  ;;  %3179 = vmatprep.subr.mxu0 %v3164_v1  ;;  %v3159_v47 = vld [vmem:[#allocation13 + $0x180] sm:$0xff]  ;;  %v3161_v48 = vld [vmem:[#allocation13 + $0x190] sm:$0xff]  ;;  %v3156_v52 = vld [vmem:[#allocation13 + $0x168] sm:$0xff]  ;;  %v5697_v1 = vmov 0.0  }
0x12c2   :  { %3250 = vmatprep.subr.mxu1 %v3166_v12  ;;  %3180 = vmatpush1.msra.mxu0 %v3163_v29  ;;  %v3158_v6 = vld [vmem:[#allocation13 + $0x178] sm:$0xff]  ;;  %v3155_v59 = vld [vmem:[#allocation13 + $0x160] sm:$0xff]  ;;  %v3157_v62 = vld [vmem:[#allocation13 + $0x170] sm:$0xff] }
0x12c3   :  { %3251 = vmatpush1.msra.mxu1 %v3165_v5  ;;  %3181 = vmatprep.subr.mxu0 %v3160_v51  ;;  %v3152_v45 = vld [vmem:[#allocation13 + $0x148] sm:$0xff]  ;;  %v3154_v54 = vld [vmem:[#allocation13 + $0x158] sm:$0xff]  ;;  %v3151_v11 = vld [vmem:[#allocation13 + $0x140] sm:$0xff] }
0x12c4   :  { %3252 = vmatprep.subr.mxu1 %v3162_v49  ;;  %3182 = vmatpush1.msra.mxu0 %v3159_v47  ;;  %v3153_v58 = vld [vmem:[#allocation13 + $0x150] sm:$0xff]  ;;  %v3148_v4 = vld [vmem:[#allocation13 + $0x128] sm:$0xff]  ;;  %v3150_v10 = vld [vmem:[#allocation13 + $0x138] sm:$0xff]  ;;  %v5698_v47 = vmov 1.0  }
0x12c5   :  { %3253 = vmatpush1.msra.mxu1 %v3161_v48  ;;  %3183 = vmatprep.subr.mxu0 %v3156_v52  ;;  %v3147_v13 = vld [vmem:[#allocation13 + $0x120] sm:$0xff]  ;;  %v3149_v15 = vld [vmem:[#allocation13 + $0x130] sm:$0xff]  ;;  %v3144_v25 = vld [vmem:[#allocation13 + $0x108] sm:$0xff] }
0x12c6   :  { %3254 = vmatprep.subr.mxu1 %v3158_v6  ;;  %3184 = vmatpush1.msra.mxu0 %v3155_v59  ;;  %v3146_v26 = vld [vmem:[#allocation13 + $0x118] sm:$0xff]  ;;  %v3143_v28 = vld [vmem:[#allocation13 + $0x100] sm:$0xff]  ;;  %v3145_v8 = vld [vmem:[#allocation13 + $0x110] sm:$0xff] }
0x12c7   :  { %3255 = vmatpush1.msra.mxu1 %v3157_v62  ;;  %3185 = vmatprep.subr.mxu0 %v3152_v45  ;;  %v3140_v30 = vld [vmem:[#allocation13 + $0xe8] sm:$0xff]  ;;  %v3142_v31 = vld [vmem:[#allocation13 + $0xf8] sm:$0xff]  ;;  %v3139_v32 = vld [vmem:[#allocation13 + $0xe0] sm:$0xff] }
0x12c8   :  { %3256 = vmatprep.subr.mxu1 %v3154_v54  ;;  %3186 = vmatpush1.msra.mxu0 %v3151_v11  ;;  %v3141_v18 = vld [vmem:[#allocation13 + $0xf0] sm:$0xff]  ;;  %v3136_v3 = vld [vmem:[#allocation13 + $0xc8] sm:$0xff]  ;;  %v3138_v27 = vld [vmem:[#allocation13 + $0xd8] sm:$0xff] }
0x12c9   :  { %3257 = vmatpush1.msra.mxu1 %v3153_v58  ;;  %3187 = vmatprep.subr.mxu0 %v3148_v4  ;;  %v3135_v33 = vld [vmem:[#allocation13 + $0xc0] sm:$0xff]  ;;  %v3137_v34 = vld [vmem:[#allocation13 + $0xd0] sm:$0xff]  ;;  %v3132_v35 = vld [vmem:[#allocation13 + $0xa8] sm:$0xff] }
0x12ca   :  { %3258 = vmatprep.subr.mxu1 %v3150_v10  ;;  %3188 = vmatpush1.msra.mxu0 %v3147_v13  ;;  %v3134_v38 = vld [vmem:[#allocation13 + $0xb8] sm:$0xff]  ;;  %v3131_v40 = vld [vmem:[#allocation13 + $0xa0] sm:$0xff]  ;;  %v3133_v41 = vld [vmem:[#allocation13 + $0xb0] sm:$0xff] }
0x12cb   :  { %3259 = vmatpush1.msra.mxu1 %v3149_v15  ;;  %3189 = vmatprep.subr.mxu0 %v3144_v25  ;;  %v3128_v42 = vld [vmem:[#allocation13 + $0x88] sm:$0xff]  ;;  %v3130_v43 = vld [vmem:[#allocation13 + $0x98] sm:$0xff]  ;;  %v3127_v0 = vld [vmem:[#allocation13 + $0x80] sm:$0xff] }
0x12cc   :  { %3260 = vmatprep.subr.mxu1 %v3146_v26  ;;  %3190 = vmatpush1.msra.mxu0 %v3143_v28  ;;  %v3129_v56 = vld [vmem:[#allocation13 + $0x90] sm:$0xff]  ;;  %v3124_v39 = vld [vmem:[#allocation13 + $0x68] sm:$0xff]  ;;  %v3126_v55 = vld [vmem:[#allocation13 + $0x78] sm:$0xff] }
0x12cd   :  { %3261 = vmatpush1.msra.mxu1 %v3145_v8  ;;  %3191 = vmatprep.subr.mxu0 %v3140_v30  ;;  %v3125_v63 = vld [vmem:[#allocation13 + $0x70] sm:$0xff]  ;;  %v3119_v24 = vld [vmem:[#allocation13 + $0x40] sm:$0xff]  ;;  %v3116_v23 = vld [vmem:[#allocation13 + $0x28] sm:$0xff] }
0x12ce   :  { %3262 = vmatprep.subr.mxu1 %v3142_v31  ;;  %3192 = vmatpush1.msra.mxu0 %v3139_v32  ;;  %v3121_v20 = vld [vmem:[#allocation13 + $0x50] sm:$0xff]  ;;  %v3118_v16 = vld [vmem:[#allocation13 + $0x38] sm:$0xff]  ;;  %v3115_v36 = vld [vmem:[#allocation13 + $0x20] sm:$0xff] }
0x12cf   :  { %3263 = vmatpush1.msra.mxu1 %v3141_v18  ;;  %3193 = vmatprep.subr.mxu0 %v3136_v3  ;;  %v3112_v17 = vld [vmem:[#allocation13 + $0x8] sm:$0xff]  ;;  %v3111_v14 = vld [vmem:[#allocation13] sm:$0xff]  ;;  %v3113_v9 = vld [vmem:[#allocation13 + $0x10] sm:$0xff] }
0x12d0   :  { %3264 = vmatprep.subr.mxu1 %v3138_v27  ;;  %3194 = vmatpush1.msra.mxu0 %v3135_v33 }
0x12d1   :  { %3265 = vmatpush1.msra.mxu1 %v3137_v34  ;;  %3195 = vmatprep.subr.mxu0 %v3132_v35 }
0x12d2   :  { %3266 = vmatprep.subr.mxu1 %v3134_v38  ;;  %3196 = vmatpush1.msra.mxu0 %v3131_v40 }
0x12d3   :  { %3267 = vmatpush1.msra.mxu1 %v3133_v41  ;;  %3197 = vmatprep.subr.mxu0 %v3128_v42 }
0x12d4   :  { %3268 = vmatprep.subr.mxu1 %v3130_v43  ;;  %3198 = vmatpush1.msra.mxu0 %v3127_v0 }
0x12d5   :  { %3269 = vmatpush1.msra.mxu1 %v3129_v56  ;;  %3199 = vmatprep.subr.mxu0 %v3124_v39 }
0x12d6   :  { %3270 = vmatprep.subr.mxu1 %v3126_v55  ;;  %3239 = vmatprep.mubr.f32.mxu0 %v5697_v1 }
0x12d7   :  { %3271 = vmatpush1.msra.mxu1 %v3125_v63  ;;  %3310 = vmatprep.mubr.f32.mxu1 %v5697_v1 }
0x1345   :  { %v3091_v22 = vpop.xlane.xlu0 %3090 }
0x1346   :  { %vm3092_vm7 = vcmp.ge.f32.partialorder %v3067_v61, %v3091_v22  ;;  %v3123_v61 = vld [vmem:[#allocation13 + $0x60] sm:$0xff]  ;;  %v3120_v22 = vld [vmem:[#allocation13 + $0x48] sm:$0xff] }
0x1347   :  { %v6729_v53 = vsel %vm3092_vm7, %v7068_v57, 128  ;;  %3200 = vmatpush1.msra.mxu0 %v3123_v61 }
0x1348   :  { %v3095_v7 = vshra.s32 %v6729_v53, 16  ;;  %v3094_v2 = vand.u32 65535, %v6729_v53  ;;  %3201 = vmatprep.subr.mxu0 %v3120_v22  ;;  %v3117_v53 = vld [vmem:[#allocation13 + $0x30] sm:$0xff] }
0x1349   :  { %3202 = vmatpush1.msra.mxu0 %v3119_v24 }
0x134a   :  { %v6732_v19 = vcvt.s32.f32 %v3095_v7  ;;  %v3096_v46 = vcvt.s32.f32 %v3094_v2  ;;  %v3122_v7 = vld [vmem:[#allocation13 + $0x58] sm:$0xff]  ;;  %3203 = vmatprep.subr.mxu0 %v3116_v23 }
0x134b   :  { %3272 = vmatprep.subr.mxu1 %v3122_v7  ;;  %3204 = vmatpush1.msra.mxu0 %v3115_v36 }
0x134c   :  { %3098 = vmin.xlane.f32.xlu0 %v6732_v19  ;;  %3273 = vmatpush1.msra.mxu1 %v3121_v20 }
0x134d   :  { %3274 = vmatprep.subr.mxu1 %v3118_v16  ;;  %3205 = vmatprep.subr.mxu0 %v3112_v17 }
0x134e   :  { %3275 = vmatpush1.msra.mxu1 %v3117_v53  ;;  %3206 = vmatpush1.msra.mxu0 %v3111_v14 }
0x13d5   :  { %v3099_v50 = vpop.xlane.xlu0 %3098 }
0x13d6   :  { %vm3100_vm8 = vcmp.eq.f32.partialorder %v6732_v19, %v3099_v50  ;;  %v3114_v19 = vld [vmem:[#allocation13 + $0x18] sm:$0xff]  ;;  %v3105_v12 = vcvt.f32.s32 %v3099_v50 }
0x13d7   :  { %v3101_v21 = vsel %vm3100_vm8, %v3096_v46, inf  ;;  %3276 = vmatprep.subr.mxu1 %v3114_v19 }
0x13d8   :  { %3102 = vmin.xlane.f32.xlu1 %v3101_v21  ;;  %3277 = vmatpush1.msra.mxu1 %v3113_v9  ;;  %v3106_v5 = vshll.u32 %v3105_v12, 16 }
0x1461   :  { %v3103_v29 = vpop.xlane.xlu1 %3102 }
0x1462   :  { %v3104_v51 = vcvt.f32.s32 %v3103_v29 }
0x1464   :  { %v3107_v49 = vadd.s32 %v3106_v5, %v3104_v51 }
0x1466   :  { %vm3108_vm9 = vcmp.eq.s32.totalorder %v7068_v57, %v3107_v49 }
0x1467   :  { %4867 = vmatmul.mubr.msk.f32.vlgmr.msra.gmra.mxu0 %vm3108_vm9, %v5698_v47  ;;  %4868 = vmatmul.mubr.msk.f32.vlgmr.msra.gmra.mxu1 %vm3108_vm9, %v5698_v47 }
0x1527   :  { %v3241_v48 = vpop.f32.mrf.mxu0  ;;  %v3312_v52 = vpop.f32.mrf.mxu1 }
0x1528   :  { %3317 = vst [vmem:[#allocation2 + $0x10] sm:$0xff] %v3241_v48  ;;  %3319 = vst [vmem:[#allocation2 + $0x18] sm:$0xff] %v3312_v52 }
0x1529   :  { %v3243_v6 = vpop.f32.mrf.mxu0  ;;  %v3314_v59 = vpop.f32.mrf.mxu1 }
0x152a   :  { %3318 = vst [vmem:[#allocation2] sm:$0xff] %v3243_v6  ;;  %3320 = vst [vmem:[#allocation2 + $0x8] sm:$0xff] %v3314_v59 }
0x152b PF:  { %v3386_v62 = vld [vmem:[#allocation11 + $0x1e8] sm:$0xff]  ;;  %v3385_v45 = vld [vmem:[#allocation11 + $0x1e0] sm:$0xff]  ;;  %v7069_v11 = vmov 0.0   ;;  %v3388_v15 = vld [vmem:[#allocation11 + $0x1f8] sm:$0xff]  ;;  %s4872_s19 = sld [smem:[#allocation9 + $0x3]] }
0x152c   :  { %v3382_v54 = vld [vmem:[#allocation11 + $0x1c8] sm:$0xff]  ;;  %3453 = vmatprep.mubr.f32.mxu0 %v7069_v11  ;;  %3524 = vmatprep.mubr.f32.mxu1 %v7069_v11  ;;  %v3381_v57 = vld [vmem:[#allocation11 + $0x1c0] sm:$0xff]  ;;  %v3387_v26 = vld [vmem:[#allocation11 + $0x1f0] sm:$0xff] }
0x152d   :  { %3389 = vmatprep.subr.mxu0 %v3386_v62  ;;  %v3378_v58 = vld [vmem:[#allocation11 + $0x1a8] sm:$0xff]  ;;  %v3377_v4 = vld [vmem:[#allocation11 + $0x1a0] sm:$0xff]  ;;  %3460 = vmatprep.subr.mxu1 %v3388_v15  ;;  %v3384_v8 = vld [vmem:[#allocation11 + $0x1d8] sm:$0xff] }
0x152e   :  { %3390 = vmatpush1.msra.mxu0 %v3385_v45  ;;  %v3374_v10 = vld [vmem:[#allocation11 + $0x188] sm:$0xff]  ;;  %v3373_v13 = vld [vmem:[#allocation11 + $0x180] sm:$0xff]  ;;  %3461 = vmatpush1.msra.mxu1 %v3387_v26  ;;  %v3383_v30 = vld [vmem:[#allocation11 + $0x1d0] sm:$0xff] }
0x152f   :  { %3391 = vmatprep.subr.mxu0 %v3382_v54  ;;  %v3370_v25 = vld [vmem:[#allocation11 + $0x168] sm:$0xff]  ;;  %v3369_v28 = vld [vmem:[#allocation11 + $0x160] sm:$0xff]  ;;  %3462 = vmatprep.subr.mxu1 %v3384_v8  ;;  %v3380_v32 = vld [vmem:[#allocation11 + $0x1b8] sm:$0xff] }
0x1530   :  { %3392 = vmatpush1.msra.mxu0 %v3381_v57  ;;  %v3366_v31 = vld [vmem:[#allocation11 + $0x148] sm:$0xff]  ;;  %v3365_v18 = vld [vmem:[#allocation11 + $0x140] sm:$0xff]  ;;  %3463 = vmatpush1.msra.mxu1 %v3383_v30  ;;  %v3379_v3 = vld [vmem:[#allocation11 + $0x1b0] sm:$0xff] }
0x1531   :  { %3393 = vmatprep.subr.mxu0 %v3378_v58  ;;  %v3376_v27 = vld [vmem:[#allocation11 + $0x198] sm:$0xff]  ;;  %v3362_v33 = vld [vmem:[#allocation11 + $0x128] sm:$0xff]  ;;  %3464 = vmatprep.subr.mxu1 %v3380_v32  ;;  %v3375_v34 = vld [vmem:[#allocation11 + $0x190] sm:$0xff]  ;;  %p4873_p13 = scmp.ne.s32.totalorder %s4872_s19, 1 }
0x1532   :  { %3394 = vmatpush1.msra.mxu0 %v3377_v4  ;;  %v3361_v35 = vld [vmem:[#allocation11 + $0x120] sm:$0xff]  ;;  %3465 = vmatpush1.msra.mxu1 %v3379_v3  ;;  %v3372_v38 = vld [vmem:[#allocation11 + $0x178] sm:$0xff]  ;;  %v3358_v40 = vld [vmem:[#allocation11 + $0x108] sm:$0xff] }
0x1533   :  { %3395 = vmatprep.subr.mxu0 %v3374_v10  ;;  %3466 = vmatprep.subr.mxu1 %v3376_v27  ;;  %v3371_v41 = vld [vmem:[#allocation11 + $0x170] sm:$0xff]  ;;  %v3357_v42 = vld [vmem:[#allocation11 + $0x100] sm:$0xff]  ;;  %v3368_v43 = vld [vmem:[#allocation11 + $0x158] sm:$0xff] }
0x1534   :  { %3396 = vmatpush1.msra.mxu0 %v3373_v13  ;;  %3467 = vmatpush1.msra.mxu1 %v3375_v34  ;;  %v3354_v0 = vld [vmem:[#allocation11 + $0xe8] sm:$0xff]  ;;  %v3367_v56 = vld [vmem:[#allocation11 + $0x150] sm:$0xff]  ;;  %v3353_v39 = vld [vmem:[#allocation11 + $0xe0] sm:$0xff] }
0x1535   :  { %3397 = vmatprep.subr.mxu0 %v3370_v25  ;;  %3468 = vmatprep.subr.mxu1 %v3372_v38  ;;  %v3364_v55 = vld [vmem:[#allocation11 + $0x138] sm:$0xff]  ;;  %v3350_v61 = vld [vmem:[#allocation11 + $0xc8] sm:$0xff]  ;;  %v3363_v63 = vld [vmem:[#allocation11 + $0x130] sm:$0xff] }
0x1536   :  { %3398 = vmatpush1.msra.mxu0 %v3369_v28  ;;  %3469 = vmatpush1.msra.mxu1 %v3371_v41  ;;  %v3349_v2 = vld [vmem:[#allocation11 + $0xc0] sm:$0xff]  ;;  %v3360_v50 = vld [vmem:[#allocation11 + $0x118] sm:$0xff]  ;;  %v3346_v46 = vld [vmem:[#allocation11 + $0xa8] sm:$0xff] }
0x1537   :  { %3399 = vmatprep.subr.mxu0 %v3366_v31  ;;  %3470 = vmatprep.subr.mxu1 %v3368_v43  ;;  %v3359_v21 = vld [vmem:[#allocation11 + $0x110] sm:$0xff]  ;;  %v3345_v22 = vld [vmem:[#allocation11 + $0xa0] sm:$0xff]  ;;  %v3356_v7 = vld [vmem:[#allocation11 + $0xf8] sm:$0xff] }
0x1538   :  { %3400 = vmatpush1.msra.mxu0 %v3365_v18  ;;  %3471 = vmatpush1.msra.mxu1 %v3367_v56  ;;  %v3342_v24 = vld [vmem:[#allocation11 + $0x88] sm:$0xff]  ;;  %v3355_v20 = vld [vmem:[#allocation11 + $0xf0] sm:$0xff]  ;;  %v3341_v23 = vld [vmem:[#allocation11 + $0x80] sm:$0xff] }
0x1539   :  { %3401 = vmatprep.subr.mxu0 %v3362_v33  ;;  %3472 = vmatprep.subr.mxu1 %v3364_v55  ;;  %v3352_v16 = vld [vmem:[#allocation11 + $0xd8] sm:$0xff]  ;;  %v3338_v36 = vld [vmem:[#allocation11 + $0x68] sm:$0xff]  ;;  %v3351_v53 = vld [vmem:[#allocation11 + $0xd0] sm:$0xff] }
0x153a   :  { %3402 = vmatpush1.msra.mxu0 %v3361_v35  ;;  %3473 = vmatpush1.msra.mxu1 %v3363_v63  ;;  %v3337_v17 = vld [vmem:[#allocation11 + $0x60] sm:$0xff]  ;;  %v3348_v19 = vld [vmem:[#allocation11 + $0xb8] sm:$0xff]  ;;  %v3334_v14 = vld [vmem:[#allocation11 + $0x48] sm:$0xff] }
0x153b   :  { %3403 = vmatprep.subr.mxu0 %v3358_v40  ;;  %3474 = vmatprep.subr.mxu1 %v3360_v50  ;;  %v3347_v9 = vld [vmem:[#allocation11 + $0xb0] sm:$0xff]  ;;  %v3333_v1 = vld [vmem:[#allocation11 + $0x40] sm:$0xff]  ;;  %v3344_v12 = vld [vmem:[#allocation11 + $0x98] sm:$0xff] }
0x153c   :  { %3404 = vmatpush1.msra.mxu0 %v3357_v42  ;;  %3475 = vmatpush1.msra.mxu1 %v3359_v21  ;;  %v3330_v29 = vld [vmem:[#allocation11 + $0x28] sm:$0xff]  ;;  %v3343_v5 = vld [vmem:[#allocation11 + $0x90] sm:$0xff]  ;;  %v3329_v51 = vld [vmem:[#allocation11 + $0x20] sm:$0xff] }
0x153d   :  { %3405 = vmatprep.subr.mxu0 %v3354_v0  ;;  %3476 = vmatprep.subr.mxu1 %v3356_v7  ;;  %v3340_v49 = vld [vmem:[#allocation11 + $0x78] sm:$0xff]  ;;  %v3326_v47 = vld [vmem:[#allocation11 + $0x8] sm:$0xff]  ;;  %v3339_v48 = vld [vmem:[#allocation11 + $0x70] sm:$0xff] }
0x153e   :  { %3406 = vmatpush1.msra.mxu0 %v3353_v39  ;;  %3477 = vmatpush1.msra.mxu1 %v3355_v20  ;;  %v3325_v52 = vld [vmem:[#allocation11] sm:$0xff]  ;;  %v3336_v6 = vld [vmem:[#allocation11 + $0x58] sm:$0xff]  ;;  %v3335_v59 = vld [vmem:[#allocation11 + $0x50] sm:$0xff] }
0x153f   :  { %3407 = vmatprep.subr.mxu0 %v3350_v61  ;;  %3478 = vmatprep.subr.mxu1 %v3352_v16  ;;  %v3332_v62 = vld [vmem:[#allocation11 + $0x38] sm:$0xff]  ;;  %v3331_v45 = vld [vmem:[#allocation11 + $0x30] sm:$0xff]  ;;  %v3572_v10 = vld [vmem:[#allocation14 + $0x68] sm:$0xff] }
0x1540   :  { %3408 = vmatpush1.msra.mxu0 %v3349_v2  ;;  %3479 = vmatpush1.msra.mxu1 %v3351_v53  ;;  %v3328_v54 = vld [vmem:[#allocation11 + $0x18] sm:$0xff]  ;;  %v3327_v57 = vld [vmem:[#allocation11 + $0x10] sm:$0xff]  ;;  %v3571_v13 = vld [vmem:[#allocation14 + $0x60] sm:$0xff] }
0x1541   :  { %3409 = vmatprep.subr.mxu0 %v3346_v46  ;;  %3480 = vmatprep.subr.mxu1 %v3348_v19  ;;  %v3574_v58 = vld [vmem:[#allocation14 + $0x78] sm:$0xff]  ;;  %v3573_v4 = vld [vmem:[#allocation14 + $0x70] sm:$0xff]  ;;  %v3568_v25 = vld [vmem:[#allocation14 + $0x48] sm:$0xff] }
0x1542   :  { %3410 = vmatpush1.msra.mxu0 %v3345_v22  ;;  %3481 = vmatpush1.msra.mxu1 %v3347_v9  ;;  %v3570_v15 = vld [vmem:[#allocation14 + $0x58] sm:$0xff]  ;;  %v3567_v26 = vld [vmem:[#allocation14 + $0x40] sm:$0xff]  ;;  %v3565_v8 = vld [vmem:[#allocation14 + $0x30] sm:$0xff] }
0x1543   :  { %3411 = vmatprep.subr.mxu0 %v3342_v24  ;;  %3482 = vmatprep.subr.mxu1 %v3344_v12  ;;  %v3566_v28 = vld [vmem:[#allocation14 + $0x38] sm:$0xff]  ;;  %v3564_v30 = vld [vmem:[#allocation14 + $0x28] sm:$0xff]  ;;  %v3563_v31 = vld [vmem:[#allocation14 + $0x20] sm:$0xff] }
0x1544   :  { %3412 = vmatpush1.msra.mxu0 %v3341_v23  ;;  %3483 = vmatpush1.msra.mxu1 %v3343_v5  ;;  %v3562_v32 = vld [vmem:[#allocation14 + $0x18] sm:$0xff]  ;;  %v3561_v18 = vld [vmem:[#allocation14 + $0x10] sm:$0xff]  ;;  %v3560_v3 = vld [vmem:[#allocation14 + $0x8] sm:$0xff] }
0x1545   :  { %3413 = vmatprep.subr.mxu0 %v3338_v36  ;;  %3484 = vmatprep.subr.mxu1 %v3340_v49  ;;  %v3559_v27 = vld [vmem:[#allocation14] sm:$0xff]  ;;  %v3321_v33 = vld [vmem:[#allocation2 + $0x10] sm:$0xff]  ;;  %v3324_v56 = vld [vmem:[#allocation2 + $0x8] sm:$0xff] }
0x1546   :  { %3414 = vmatpush1.msra.mxu0 %v3337_v17  ;;  %3485 = vmatpush1.msra.mxu1 %v3339_v48  ;;  %v3322_v35 = vld [vmem:[#allocation2] sm:$0xff]  ;;  %v3323_v55 = vld [vmem:[#allocation2 + $0x18] sm:$0xff] }
0x1547   :  { %3415 = vmatprep.subr.mxu0 %v3334_v14  ;;  %3486 = vmatprep.subr.mxu1 %v3336_v6 }
0x1548   :  { %3416 = vmatpush1.msra.mxu0 %v3333_v1  ;;  %3487 = vmatpush1.msra.mxu1 %v3335_v59 }
0x1549   :  { %3417 = vmatprep.subr.mxu0 %v3330_v29  ;;  %3488 = vmatprep.subr.mxu1 %v3332_v62 }
0x154a   :  { %3418 = vmatpush1.msra.mxu0 %v3329_v51  ;;  %3489 = vmatpush1.msra.mxu1 %v3331_v45 }
0x154b   :  { %3419 = vmatprep.subr.mxu0 %v3326_v47  ;;  %3490 = vmatprep.subr.mxu1 %v3328_v54 }
0x154c   :  { %3420 = vmatpush1.msra.mxu0 %v3325_v52  ;;  %3491 = vmatpush1.msra.mxu1 %v3327_v57 }
0x154d   :  { %3454 = vmatmul.mubr.f32.vlgmr.msra.gmra.mxu0 %v6724_v44  ;;  %5097 = vmatprep.subr.mxu0 %v7069_v11 }
0x154e   :  { %5129 = vmatprep.mubr.msk.f32.mxu0 %vm5692_vm0, %v7069_v11  ;;  %3525 = vmatmul.mubr.f32.vlgmr.msra.gmra.mxu1 %v6724_v44  ;;  %v3569_v44 = vld [vmem:[#allocation14 + $0x50] sm:$0xff] }
0x154f   :  { %5098 = vmatpush3.msra.mxu0 %v3574_v58 }
0x1550   :  { %5099 = vmatprep.subr.mxu0 %v7069_v11 }
0x1551   :  { %5100 = vmatpush3.msra.mxu0 %v3573_v4 }
0x1552   :  { %5101 = vmatprep.subr.mxu0 %v7069_v11 }
0x1553   :  { %5102 = vmatpush3.msra.mxu0 %v3572_v10 }
0x1554   :  { %5103 = vmatprep.subr.mxu0 %v7069_v11 }
0x1555   :  { %5104 = vmatpush3.msra.mxu0 %v3571_v13 }
0x1556   :  { %5105 = vmatprep.subr.mxu0 %v7069_v11 }
0x1557   :  { %5106 = vmatpush3.msra.mxu0 %v3570_v15 }
0x1558   :  { %5107 = vmatprep.subr.mxu0 %v7069_v11 }
0x1559   :  { %5108 = vmatpush3.msra.mxu0 %v3569_v44 }
0x155a   :  { %5109 = vmatprep.subr.mxu0 %v7069_v11 }
0x155b   :  { %5110 = vmatpush3.msra.mxu0 %v3568_v25 }
0x155c   :  { %5111 = vmatprep.subr.mxu0 %v7069_v11 }
0x155d   :  { %5112 = vmatpush3.msra.mxu0 %v3567_v26 }
0x155e   :  { %5113 = vmatprep.subr.mxu0 %v7069_v11 }
0x155f   :  { %5114 = vmatpush3.msra.mxu0 %v3566_v28 }
0x1560   :  { %5115 = vmatprep.subr.mxu0 %v7069_v11 }
0x1561   :  { %5116 = vmatpush3.msra.mxu0 %v3565_v8 }
0x1562   :  { %5117 = vmatprep.subr.mxu0 %v7069_v11 }
0x1563   :  { %5118 = vmatpush3.msra.mxu0 %v3564_v30 }
0x1564   :  { %5119 = vmatprep.subr.mxu0 %v7069_v11 }
0x1565   :  { %5120 = vmatpush3.msra.mxu0 %v3563_v31 }
0x1566   :  { %5121 = vmatprep.subr.mxu0 %v7069_v11 }
0x1567   :  { %5122 = vmatpush3.msra.mxu0 %v3562_v32 }
0x1568   :  { %5123 = vmatprep.subr.mxu0 %v7069_v11 }
0x1569   :  { %5124 = vmatpush3.msra.mxu0 %v3561_v18 }
0x156a   :  { %5125 = vmatprep.subr.mxu0 %v7069_v11 }
0x156b   :  { %5126 = vmatpush3.msra.mxu0 %v3560_v3 }
0x156c   :  { %5127 = vmatprep.subr.mxu0 %v7069_v11 }
0x156d   :  { %5128 = vmatpush3.msra.mxu0 %v3559_v27 }
0x160d   :  { %v3455_v34 = vpop.f32.mrf.mxu0 }
0x160e   :  { %v3531_v38 = vadd.f32 %v3455_v34, %v3321_v33  ;;  %v3526_v0 = vpop.f32.mrf.mxu1 }
0x160f   :  { %v3457_v40 = vpop.f32.mrf.mxu0  ;;  %v3533_v63 = vadd.f32 %v3526_v0, %v3323_v55 }
0x1610   :  { %v4869_v41 = vmul.f32 -1.442695, %v3531_v38  ;;  %v3532_v42 = vadd.f32 %v3457_v40, %v3322_v35  ;;  %v3528_v39 = vpop.f32.mrf.mxu1 }
0x1611   :  { %v3534_v61 = vadd.f32 %v3528_v39, %v3324_v56 }
0x1612   :  { %5466 = vpow2.f32 %v4869_v41  ;;  %v4870_v43 = vmul.f32 -1.442695, %v3532_v42 }
0x1613   :  { %v4871_v2 = vmul.f32 -1.442695, %v3534_v61 }
0x1614   :  { %5468 = vpow2.f32 %v4870_v43 }
0x1615   :  { %5470 = vtanh.f32 %v3533_v63 }
0x1616   :  { %5472 = vpow2.f32 %v4871_v2 }
0x161f   :  { %v5467_v50 = vpop.eup %5466 }
0x1620   :  { %v3544_v11 = vadd.f32 1.0, %v5467_v50 }
0x1621   :  { %v5469_v46 = vpop.eup %5468 }
0x1622   :  { %5474 = vrcp.f32 %v3544_v11  ;;  %v3545_v21 = vadd.f32 1.0, %v5469_v46  ;;  %v5471_v22 = vpop.eup %5470 }
0x1623   :  { %v5473_v7 = vpop.eup %5472 }
0x1624   :  { %5476 = vrcp.f32 %v3545_v21  ;;  %v3546_v23 = vadd.f32 1.0, %v5473_v7 }
0x1626   :  { %5478 = vrcp.f32 %v3546_v23 }
0x162f   :  { %v5475_v24 = vpop.eup %5474 }
0x1630   :  { %v3555_v36 = vmul.f32 %v5475_v24, %v5471_v22 }
0x1631   :  { %v5477_v20 = vpop.eup %5476 }
0x1632   :  { %v3554_v16 = vmul.f32 %v5477_v20, %v6721_v37 }
0x1633   :  { %v5479_v17 = vpop.eup %5478 }
0x1634   :  { %v6761_v53 = vadd.f32 %v3555_v36, %v3554_v16 }
0x1636   :  { %5480 = vtanh.f32 %v6761_v53 }
0x1643   :  { %v5481_v19 = vpop.eup %5480 }
0x1644   :  { %v6764_v14 = vmul.f32 %v5481_v19, %v5479_v17 }
0x1646   :  { %5130 = vmatmul.mubr.f32.vlgmr.msra.gmra.mxu0 %v6764_v14 }
0x1705   :  { %3651 = sbr.rel (%p4873_p13) target bundleno = 5901 (0x170d), region = 89 }
0x1706   :  { %v3641_v9 = vpop.f32.mrf.mxu0 }
0x1707   :  { %v3642_v1 = vadd.f32 %v6645_v60, %v3641_v9 }
0x1708   :  { %v5131_v12 = vpop.f32.mrf.mxu0 }
0x1709   :  { %3646 = vst [vmem:[#allocation16 + $0x18] sm:$0xff] %v3642_v1 }
0x170a   :  { %v3653_v37 = vld [vmem:[#allocation7 + $0x60] sm:$0xff]  ;;  %v3654_v29 = vld [vmem:[#allocation7 + $0x68] sm:$0xff]  ;;  %v3655_v5 = vld [vmem:[#allocation7 + $0x70] sm:$0xff] }
0x170b   :  { %3657 = vst [vmem:[#allocation2 + $0x10] sm:$0xff] %v3653_v37  ;;  %3658 = vst [vmem:[#allocation2] sm:$0xff] %v3654_v29  ;;  %v3656_v51 = vld [vmem:[#allocation7 + $0x78] sm:$0xff] }
0x170c   :  { %3659 = vst [vmem:[#allocation2 + $0x18] sm:$0xff] %v3655_v5  ;;  %3660 = vst [vmem:[#allocation2 + $0x8] sm:$0xff] %v3656_v51 }
0x170d PF:  { %p4874_p0 = scmp.ne.s32.totalorder %s4872_s19, 0 }
0x170f   :  { %3664 = sbr.rel (%p4874_p0) target bundleno = 6531 (0x1983), region = 93 }
0x1714   :  { %3665 = vmax.xlane.f32.xlu0 %v3642_v1  ;;  %v7070_v47 = vld [vmem:[#allocation25_spill] sm:$0xff]  ;;  %v3747_v59 = vld [vmem:[#allocation13 + $0x1e8] sm:$0xff]  ;;  %v3746_v45 = vld [vmem:[#allocation13 + $0x1e0] sm:$0xff] }
0x1715   :  { %v3749_v62 = vld [vmem:[#allocation13 + $0x1f8] sm:$0xff]  ;;  %3750 = vmatprep.subr.mxu0 %v3747_v59  ;;  %v3748_v54 = vld [vmem:[#allocation13 + $0x1f0] sm:$0xff]  ;;  %v3743_v57 = vld [vmem:[#allocation13 + $0x1c8] sm:$0xff] }
0x1716   :  { %3821 = vmatprep.subr.mxu1 %v3749_v62  ;;  %v3745_v58 = vld [vmem:[#allocation13 + $0x1d8] sm:$0xff]  ;;  %3751 = vmatpush1.msra.mxu0 %v3746_v45  ;;  %v3742_v4 = vld [vmem:[#allocation13 + $0x1c0] sm:$0xff]  ;;  %v3744_v10 = vld [vmem:[#allocation13 + $0x1d0] sm:$0xff] }
0x1717   :  { %3822 = vmatpush1.msra.mxu1 %v3748_v54  ;;  %v3739_v13 = vld [vmem:[#allocation13 + $0x1a8] sm:$0xff]  ;;  %3752 = vmatprep.subr.mxu0 %v3743_v57  ;;  %v3741_v15 = vld [vmem:[#allocation13 + $0x1b8] sm:$0xff]  ;;  %v3738_v44 = vld [vmem:[#allocation13 + $0x1a0] sm:$0xff] }
0x1718   :  { %3823 = vmatprep.subr.mxu1 %v3745_v58  ;;  %v3740_v25 = vld [vmem:[#allocation13 + $0x1b0] sm:$0xff]  ;;  %3753 = vmatpush1.msra.mxu0 %v3742_v4  ;;  %v3735_v26 = vld [vmem:[#allocation13 + $0x188] sm:$0xff]  ;;  %v3737_v28 = vld [vmem:[#allocation13 + $0x198] sm:$0xff] }
0x1719   :  { %3824 = vmatpush1.msra.mxu1 %v3744_v10  ;;  %3754 = vmatprep.subr.mxu0 %v3739_v13  ;;  %v3734_v8 = vld [vmem:[#allocation13 + $0x180] sm:$0xff]  ;;  %v3736_v30 = vld [vmem:[#allocation13 + $0x190] sm:$0xff]  ;;  %v3731_v31 = vld [vmem:[#allocation13 + $0x168] sm:$0xff]  ;;  %v5699_v13 = vmov 0.0  }
0x171a   :  { %3825 = vmatprep.subr.mxu1 %v3741_v15  ;;  %3755 = vmatpush1.msra.mxu0 %v3738_v44  ;;  %v3733_v32 = vld [vmem:[#allocation13 + $0x178] sm:$0xff]  ;;  %v3730_v18 = vld [vmem:[#allocation13 + $0x160] sm:$0xff]  ;;  %v3732_v3 = vld [vmem:[#allocation13 + $0x170] sm:$0xff] }
0x171b   :  { %3826 = vmatpush1.msra.mxu1 %v3740_v25  ;;  %3756 = vmatprep.subr.mxu0 %v3735_v26  ;;  %v3727_v27 = vld [vmem:[#allocation13 + $0x148] sm:$0xff]  ;;  %v3729_v33 = vld [vmem:[#allocation13 + $0x158] sm:$0xff]  ;;  %v3726_v34 = vld [vmem:[#allocation13 + $0x140] sm:$0xff] }
0x171c   :  { %3827 = vmatprep.subr.mxu1 %v3737_v28  ;;  %3757 = vmatpush1.msra.mxu0 %v3734_v8  ;;  %v3728_v35 = vld [vmem:[#allocation13 + $0x150] sm:$0xff]  ;;  %v3723_v38 = vld [vmem:[#allocation13 + $0x128] sm:$0xff]  ;;  %v3725_v40 = vld [vmem:[#allocation13 + $0x138] sm:$0xff]  ;;  %v5700_v8 = vmov 1.0  }
0x171d   :  { %3828 = vmatpush1.msra.mxu1 %v3736_v30  ;;  %3758 = vmatprep.subr.mxu0 %v3731_v31  ;;  %v3722_v41 = vld [vmem:[#allocation13 + $0x120] sm:$0xff]  ;;  %v3724_v42 = vld [vmem:[#allocation13 + $0x130] sm:$0xff]  ;;  %v3719_v43 = vld [vmem:[#allocation13 + $0x108] sm:$0xff] }
0x171e   :  { %3829 = vmatprep.subr.mxu1 %v3733_v32  ;;  %3759 = vmatpush1.msra.mxu0 %v3730_v18  ;;  %v3721_v0 = vld [vmem:[#allocation13 + $0x118] sm:$0xff]  ;;  %v3718_v56 = vld [vmem:[#allocation13 + $0x100] sm:$0xff]  ;;  %v3720_v39 = vld [vmem:[#allocation13 + $0x110] sm:$0xff] }
0x171f   :  { %3830 = vmatpush1.msra.mxu1 %v3732_v3  ;;  %3760 = vmatprep.subr.mxu0 %v3727_v27  ;;  %v3715_v55 = vld [vmem:[#allocation13 + $0xe8] sm:$0xff]  ;;  %v3717_v61 = vld [vmem:[#allocation13 + $0xf8] sm:$0xff]  ;;  %v3714_v63 = vld [vmem:[#allocation13 + $0xe0] sm:$0xff] }
0x1720   :  { %3831 = vmatprep.subr.mxu1 %v3729_v33  ;;  %3761 = vmatpush1.msra.mxu0 %v3726_v34  ;;  %v3716_v2 = vld [vmem:[#allocation13 + $0xf0] sm:$0xff]  ;;  %v3711_v50 = vld [vmem:[#allocation13 + $0xc8] sm:$0xff]  ;;  %v3713_v11 = vld [vmem:[#allocation13 + $0xd8] sm:$0xff] }
0x1721   :  { %3832 = vmatpush1.msra.mxu1 %v3728_v35  ;;  %3762 = vmatprep.subr.mxu0 %v3723_v38  ;;  %v3710_v46 = vld [vmem:[#allocation13 + $0xc0] sm:$0xff]  ;;  %v3712_v21 = vld [vmem:[#allocation13 + $0xd0] sm:$0xff]  ;;  %v3707_v22 = vld [vmem:[#allocation13 + $0xa8] sm:$0xff] }
0x1722   :  { %3833 = vmatprep.subr.mxu1 %v3725_v40  ;;  %3763 = vmatpush1.msra.mxu0 %v3722_v41  ;;  %v3709_v7 = vld [vmem:[#allocation13 + $0xb8] sm:$0xff]  ;;  %v3706_v24 = vld [vmem:[#allocation13 + $0xa0] sm:$0xff]  ;;  %v3708_v20 = vld [vmem:[#allocation13 + $0xb0] sm:$0xff] }
0x1723   :  { %3834 = vmatpush1.msra.mxu1 %v3724_v42  ;;  %3764 = vmatprep.subr.mxu0 %v3719_v43  ;;  %v3703_v23 = vld [vmem:[#allocation13 + $0x88] sm:$0xff]  ;;  %v3705_v16 = vld [vmem:[#allocation13 + $0x98] sm:$0xff]  ;;  %v3702_v36 = vld [vmem:[#allocation13 + $0x80] sm:$0xff] }
0x1724   :  { %3835 = vmatprep.subr.mxu1 %v3721_v0  ;;  %3765 = vmatpush1.msra.mxu0 %v3718_v56  ;;  %v3704_v17 = vld [vmem:[#allocation13 + $0x90] sm:$0xff]  ;;  %v3699_v19 = vld [vmem:[#allocation13 + $0x68] sm:$0xff]  ;;  %v3701_v9 = vld [vmem:[#allocation13 + $0x78] sm:$0xff] }
0x1725   :  { %3836 = vmatpush1.msra.mxu1 %v3720_v39  ;;  %3766 = vmatprep.subr.mxu0 %v3715_v55  ;;  %v3700_v12 = vld [vmem:[#allocation13 + $0x70] sm:$0xff]  ;;  %v3694_v59 = vld [vmem:[#allocation13 + $0x40] sm:$0xff]  ;;  %v3691_v45 = vld [vmem:[#allocation13 + $0x28] sm:$0xff] }
0x1726   :  { %3837 = vmatprep.subr.mxu1 %v3717_v61  ;;  %3767 = vmatpush1.msra.mxu0 %v3714_v63  ;;  %v3696_v62 = vld [vmem:[#allocation13 + $0x50] sm:$0xff]  ;;  %v3693_v54 = vld [vmem:[#allocation13 + $0x38] sm:$0xff]  ;;  %v3690_v57 = vld [vmem:[#allocation13 + $0x20] sm:$0xff] }
0x1727   :  { %3838 = vmatpush1.msra.mxu1 %v3716_v2  ;;  %3768 = vmatprep.subr.mxu0 %v3711_v50  ;;  %v3687_v58 = vld [vmem:[#allocation13 + $0x8] sm:$0xff]  ;;  %v3686_v4 = vld [vmem:[#allocation13] sm:$0xff]  ;;  %v3688_v10 = vld [vmem:[#allocation13 + $0x10] sm:$0xff] }
0x1728   :  { %3839 = vmatprep.subr.mxu1 %v3713_v11  ;;  %3769 = vmatpush1.msra.mxu0 %v3710_v46 }
0x1729   :  { %3840 = vmatpush1.msra.mxu1 %v3712_v21  ;;  %3770 = vmatprep.subr.mxu0 %v3707_v22 }
0x172a   :  { %3841 = vmatprep.subr.mxu1 %v3709_v7  ;;  %3771 = vmatpush1.msra.mxu0 %v3706_v24 }
0x172b   :  { %3842 = vmatpush1.msra.mxu1 %v3708_v20  ;;  %3772 = vmatprep.subr.mxu0 %v3703_v23 }
0x172c   :  { %3843 = vmatprep.subr.mxu1 %v3705_v16  ;;  %3773 = vmatpush1.msra.mxu0 %v3702_v36 }
0x172d   :  { %3844 = vmatpush1.msra.mxu1 %v3704_v17  ;;  %3774 = vmatprep.subr.mxu0 %v3699_v19 }
0x172e   :  { %3845 = vmatprep.subr.mxu1 %v3701_v9  ;;  %3814 = vmatprep.mubr.f32.mxu0 %v5699_v13 }
0x172f   :  { %3846 = vmatpush1.msra.mxu1 %v3700_v12  ;;  %3885 = vmatprep.mubr.f32.mxu1 %v5699_v13 }
0x179d   :  { %v3666_v49 = vpop.xlane.xlu0 %3665 }
0x179e   :  { %vm3667_vm10 = vcmp.ge.f32.partialorder %v3642_v1, %v3666_v49  ;;  %v3698_v1 = vld [vmem:[#allocation13 + $0x60] sm:$0xff]  ;;  %v3695_v49 = vld [vmem:[#allocation13 + $0x48] sm:$0xff] }
0x179f   :  { %v6769_v48 = vsel %vm3667_vm10, %v7070_v47, 128  ;;  %3775 = vmatpush1.msra.mxu0 %v3698_v1 }
0x17a0   :  { %v3670_v52 = vshra.s32 %v6769_v48, 16  ;;  %v3669_v37 = vand.u32 65535, %v6769_v48  ;;  %3776 = vmatprep.subr.mxu0 %v3695_v49  ;;  %v3692_v48 = vld [vmem:[#allocation13 + $0x30] sm:$0xff] }
0x17a1   :  { %3777 = vmatpush1.msra.mxu0 %v3694_v59 }
0x17a2   :  { %v6772_v6 = vcvt.s32.f32 %v3670_v52  ;;  %v3671_v5 = vcvt.s32.f32 %v3669_v37  ;;  %v3697_v52 = vld [vmem:[#allocation13 + $0x58] sm:$0xff]  ;;  %3778 = vmatprep.subr.mxu0 %v3691_v45 }
0x17a3   :  { %3847 = vmatprep.subr.mxu1 %v3697_v52  ;;  %3779 = vmatpush1.msra.mxu0 %v3690_v57 }
0x17a4   :  { %3673 = vmin.xlane.f32.xlu0 %v6772_v6  ;;  %3848 = vmatpush1.msra.mxu1 %v3696_v62 }
0x17a5   :  { %3849 = vmatprep.subr.mxu1 %v3693_v54  ;;  %3780 = vmatprep.subr.mxu0 %v3687_v58 }
0x17a6   :  { %3850 = vmatpush1.msra.mxu1 %v3692_v48  ;;  %3781 = vmatpush1.msra.mxu0 %v3686_v4 }
0x182d   :  { %v3674_v29 = vpop.xlane.xlu0 %3673 }
0x182e   :  { %vm3675_vm11 = vcmp.eq.f32.partialorder %v6772_v6, %v3674_v29  ;;  %v3689_v6 = vld [vmem:[#allocation13 + $0x18] sm:$0xff]  ;;  %v3680_v15 = vcvt.f32.s32 %v3674_v29 }
0x182f   :  { %v3676_v51 = vsel %vm3675_vm11, %v3671_v5, inf  ;;  %3851 = vmatprep.subr.mxu1 %v3689_v6 }
0x1830   :  { %3677 = vmin.xlane.f32.xlu1 %v3676_v51  ;;  %3852 = vmatpush1.msra.mxu1 %v3688_v10  ;;  %v3681_v25 = vshll.u32 %v3680_v15, 16 }
0x18b9   :  { %v3678_v44 = vpop.xlane.xlu1 %3677 }
0x18ba   :  { %v3679_v26 = vcvt.f32.s32 %v3678_v44 }
0x18bc   :  { %v3682_v28 = vadd.s32 %v3681_v25, %v3679_v26 }
0x18be   :  { %vm3683_vm12 = vcmp.eq.s32.totalorder %v7070_v47, %v3682_v28 }
0x18bf   :  { %4876 = vmatmul.mubr.msk.f32.vlgmr.msra.gmra.mxu0 %vm3683_vm12, %v5700_v8  ;;  %4877 = vmatmul.mubr.msk.f32.vlgmr.msra.gmra.mxu1 %vm3683_vm12, %v5700_v8 }
0x197f   :  { %v3816_v30 = vpop.f32.mrf.mxu0  ;;  %v3887_v31 = vpop.f32.mrf.mxu1 }
0x1980   :  { %3892 = vst [vmem:[#allocation2 + $0x10] sm:$0xff] %v3816_v30  ;;  %3894 = vst [vmem:[#allocation2 + $0x18] sm:$0xff] %v3887_v31 }
0x1981   :  { %v3818_v32 = vpop.f32.mrf.mxu0  ;;  %v3889_v18 = vpop.f32.mrf.mxu1 }
0x1982   :  { %3893 = vst [vmem:[#allocation2] sm:$0xff] %v3818_v32  ;;  %3895 = vst [vmem:[#allocation2 + $0x8] sm:$0xff] %v3889_v18 }
0x1983 PF:  { %v3961_v3 = vld [vmem:[#allocation11 + $0x1e8] sm:$0xff]  ;;  %v3960_v27 = vld [vmem:[#allocation11 + $0x1e0] sm:$0xff]  ;;  %v7071_v34 = vmov 0.0   ;;  %v3963_v42 = vld [vmem:[#allocation11 + $0x1f8] sm:$0xff]  ;;  %s4881_s20 = sld [smem:[#allocation9 + $0x4]] }
0x1984   :  { %v3957_v33 = vld [vmem:[#allocation11 + $0x1c8] sm:$0xff]  ;;  %4028 = vmatprep.mubr.f32.mxu0 %v7071_v34  ;;  %4099 = vmatprep.mubr.f32.mxu1 %v7071_v34  ;;  %v3956_v47 = vld [vmem:[#allocation11 + $0x1c0] sm:$0xff]  ;;  %v3962_v0 = vld [vmem:[#allocation11 + $0x1f0] sm:$0xff] }
0x1985   :  { %3964 = vmatprep.subr.mxu0 %v3961_v3  ;;  %v3953_v35 = vld [vmem:[#allocation11 + $0x1a8] sm:$0xff]  ;;  %v3952_v38 = vld [vmem:[#allocation11 + $0x1a0] sm:$0xff]  ;;  %4035 = vmatprep.subr.mxu1 %v3963_v42  ;;  %v3959_v39 = vld [vmem:[#allocation11 + $0x1d8] sm:$0xff] }
0x1986   :  { %3965 = vmatpush1.msra.mxu0 %v3960_v27  ;;  %v3949_v40 = vld [vmem:[#allocation11 + $0x188] sm:$0xff]  ;;  %v3948_v41 = vld [vmem:[#allocation11 + $0x180] sm:$0xff]  ;;  %4036 = vmatpush1.msra.mxu1 %v3962_v0  ;;  %v3958_v55 = vld [vmem:[#allocation11 + $0x1d0] sm:$0xff] }
0x1987   :  { %3966 = vmatprep.subr.mxu0 %v3957_v33  ;;  %v3945_v43 = vld [vmem:[#allocation11 + $0x168] sm:$0xff]  ;;  %v3944_v56 = vld [vmem:[#allocation11 + $0x160] sm:$0xff]  ;;  %4037 = vmatprep.subr.mxu1 %v3959_v39  ;;  %v3955_v63 = vld [vmem:[#allocation11 + $0x1b8] sm:$0xff] }
0x1988   :  { %3967 = vmatpush1.msra.mxu0 %v3956_v47  ;;  %v3941_v61 = vld [vmem:[#allocation11 + $0x148] sm:$0xff]  ;;  %v3940_v2 = vld [vmem:[#allocation11 + $0x140] sm:$0xff]  ;;  %4038 = vmatpush1.msra.mxu1 %v3958_v55  ;;  %v3954_v50 = vld [vmem:[#allocation11 + $0x1b0] sm:$0xff] }
0x1989   :  { %3968 = vmatprep.subr.mxu0 %v3953_v35  ;;  %v3951_v11 = vld [vmem:[#allocation11 + $0x198] sm:$0xff]  ;;  %v3937_v46 = vld [vmem:[#allocation11 + $0x128] sm:$0xff]  ;;  %4039 = vmatprep.subr.mxu1 %v3955_v63  ;;  %v3950_v21 = vld [vmem:[#allocation11 + $0x190] sm:$0xff]  ;;  %p4882_p1 = scmp.ne.s32.totalorder %s4881_s20, 1 }
0x198a   :  { %3969 = vmatpush1.msra.mxu0 %v3952_v38  ;;  %v3936_v22 = vld [vmem:[#allocation11 + $0x120] sm:$0xff]  ;;  %4040 = vmatpush1.msra.mxu1 %v3954_v50  ;;  %v3947_v7 = vld [vmem:[#allocation11 + $0x178] sm:$0xff]  ;;  %v3933_v24 = vld [vmem:[#allocation11 + $0x108] sm:$0xff] }
0x198b   :  { %3970 = vmatprep.subr.mxu0 %v3949_v40  ;;  %4041 = vmatprep.subr.mxu1 %v3951_v11  ;;  %v3946_v20 = vld [vmem:[#allocation11 + $0x170] sm:$0xff]  ;;  %v3932_v23 = vld [vmem:[#allocation11 + $0x100] sm:$0xff]  ;;  %v3943_v16 = vld [vmem:[#allocation11 + $0x158] sm:$0xff] }
0x198c   :  { %3971 = vmatpush1.msra.mxu0 %v3948_v41  ;;  %4042 = vmatpush1.msra.mxu1 %v3950_v21  ;;  %v3929_v36 = vld [vmem:[#allocation11 + $0xe8] sm:$0xff]  ;;  %v3942_v17 = vld [vmem:[#allocation11 + $0x150] sm:$0xff]  ;;  %v3928_v19 = vld [vmem:[#allocation11 + $0xe0] sm:$0xff] }
0x198d   :  { %3972 = vmatprep.subr.mxu0 %v3945_v43  ;;  %4043 = vmatprep.subr.mxu1 %v3947_v7  ;;  %v3939_v9 = vld [vmem:[#allocation11 + $0x138] sm:$0xff]  ;;  %v3925_v1 = vld [vmem:[#allocation11 + $0xc8] sm:$0xff]  ;;  %v3938_v12 = vld [vmem:[#allocation11 + $0x130] sm:$0xff] }
0x198e   :  { %3973 = vmatpush1.msra.mxu0 %v3944_v56  ;;  %4044 = vmatpush1.msra.mxu1 %v3946_v20  ;;  %v3924_v37 = vld [vmem:[#allocation11 + $0xc0] sm:$0xff]  ;;  %v3935_v29 = vld [vmem:[#allocation11 + $0x118] sm:$0xff]  ;;  %v3921_v5 = vld [vmem:[#allocation11 + $0xa8] sm:$0xff] }
0x198f   :  { %3974 = vmatprep.subr.mxu0 %v3941_v61  ;;  %4045 = vmatprep.subr.mxu1 %v3943_v16  ;;  %v3934_v51 = vld [vmem:[#allocation11 + $0x110] sm:$0xff]  ;;  %v3920_v49 = vld [vmem:[#allocation11 + $0xa0] sm:$0xff]  ;;  %v3931_v52 = vld [vmem:[#allocation11 + $0xf8] sm:$0xff] }
0x1990   :  { %3975 = vmatpush1.msra.mxu0 %v3940_v2  ;;  %4046 = vmatpush1.msra.mxu1 %v3942_v17  ;;  %v3917_v59 = vld [vmem:[#allocation11 + $0x88] sm:$0xff]  ;;  %v3930_v62 = vld [vmem:[#allocation11 + $0xf0] sm:$0xff]  ;;  %v3916_v45 = vld [vmem:[#allocation11 + $0x80] sm:$0xff] }
0x1991   :  { %3976 = vmatprep.subr.mxu0 %v3937_v46  ;;  %4047 = vmatprep.subr.mxu1 %v3939_v9  ;;  %v3927_v54 = vld [vmem:[#allocation11 + $0xd8] sm:$0xff]  ;;  %v3913_v57 = vld [vmem:[#allocation11 + $0x68] sm:$0xff]  ;;  %v3926_v48 = vld [vmem:[#allocation11 + $0xd0] sm:$0xff] }
0x1992   :  { %3977 = vmatpush1.msra.mxu0 %v3936_v22  ;;  %4048 = vmatpush1.msra.mxu1 %v3938_v12  ;;  %v3912_v58 = vld [vmem:[#allocation11 + $0x60] sm:$0xff]  ;;  %v3923_v6 = vld [vmem:[#allocation11 + $0xb8] sm:$0xff]  ;;  %v3909_v4 = vld [vmem:[#allocation11 + $0x48] sm:$0xff] }
0x1993   :  { %3978 = vmatprep.subr.mxu0 %v3933_v24  ;;  %4049 = vmatprep.subr.mxu1 %v3935_v29  ;;  %v3922_v10 = vld [vmem:[#allocation11 + $0xb0] sm:$0xff]  ;;  %v3908_v13 = vld [vmem:[#allocation11 + $0x40] sm:$0xff]  ;;  %v3919_v15 = vld [vmem:[#allocation11 + $0x98] sm:$0xff] }
0x1994   :  { %3979 = vmatpush1.msra.mxu0 %v3932_v23  ;;  %4050 = vmatpush1.msra.mxu1 %v3934_v51  ;;  %v3905_v44 = vld [vmem:[#allocation11 + $0x28] sm:$0xff]  ;;  %v3918_v25 = vld [vmem:[#allocation11 + $0x90] sm:$0xff]  ;;  %v3904_v26 = vld [vmem:[#allocation11 + $0x20] sm:$0xff] }
0x1995   :  { %3980 = vmatprep.subr.mxu0 %v3929_v36  ;;  %4051 = vmatprep.subr.mxu1 %v3931_v52  ;;  %v3915_v28 = vld [vmem:[#allocation11 + $0x78] sm:$0xff]  ;;  %v3901_v8 = vld [vmem:[#allocation11 + $0x8] sm:$0xff]  ;;  %v3914_v30 = vld [vmem:[#allocation11 + $0x70] sm:$0xff] }
0x1996   :  { %3981 = vmatpush1.msra.mxu0 %v3928_v19  ;;  %4052 = vmatpush1.msra.mxu1 %v3930_v62  ;;  %v3900_v31 = vld [vmem:[#allocation11] sm:$0xff]  ;;  %v3911_v32 = vld [vmem:[#allocation11 + $0x58] sm:$0xff]  ;;  %v3910_v18 = vld [vmem:[#allocation11 + $0x50] sm:$0xff] }
0x1997   :  { %3982 = vmatprep.subr.mxu0 %v3925_v1  ;;  %4053 = vmatprep.subr.mxu1 %v3927_v54  ;;  %v3907_v3 = vld [vmem:[#allocation11 + $0x38] sm:$0xff]  ;;  %v3906_v27 = vld [vmem:[#allocation11 + $0x30] sm:$0xff]  ;;  %v4147_v40 = vld [vmem:[#allocation14 + $0x68] sm:$0xff] }
0x1998   :  { %3983 = vmatpush1.msra.mxu0 %v3924_v37  ;;  %4054 = vmatpush1.msra.mxu1 %v3926_v48  ;;  %v3903_v33 = vld [vmem:[#allocation11 + $0x18] sm:$0xff]  ;;  %v3902_v47 = vld [vmem:[#allocation11 + $0x10] sm:$0xff]  ;;  %v4146_v41 = vld [vmem:[#allocation14 + $0x60] sm:$0xff] }
0x1999   :  { %3984 = vmatprep.subr.mxu0 %v3921_v5  ;;  %4055 = vmatprep.subr.mxu1 %v3923_v6  ;;  %v4149_v35 = vld [vmem:[#allocation14 + $0x78] sm:$0xff]  ;;  %v4148_v38 = vld [vmem:[#allocation14 + $0x70] sm:$0xff]  ;;  %v4143_v43 = vld [vmem:[#allocation14 + $0x48] sm:$0xff] }
0x199a   :  { %3985 = vmatpush1.msra.mxu0 %v3920_v49  ;;  %4056 = vmatpush1.msra.mxu1 %v3922_v10  ;;  %v4145_v42 = vld [vmem:[#allocation14 + $0x58] sm:$0xff]  ;;  %v4142_v0 = vld [vmem:[#allocation14 + $0x40] sm:$0xff]  ;;  %v4140_v39 = vld [vmem:[#allocation14 + $0x30] sm:$0xff] }
0x199b   :  { %3986 = vmatprep.subr.mxu0 %v3917_v59  ;;  %4057 = vmatprep.subr.mxu1 %v3919_v15  ;;  %v4141_v56 = vld [vmem:[#allocation14 + $0x38] sm:$0xff]  ;;  %v4139_v55 = vld [vmem:[#allocation14 + $0x28] sm:$0xff]  ;;  %v4138_v61 = vld [vmem:[#allocation14 + $0x20] sm:$0xff] }
0x199c   :  { %3987 = vmatpush1.msra.mxu0 %v3916_v45  ;;  %4058 = vmatpush1.msra.mxu1 %v3918_v25  ;;  %v4137_v63 = vld [vmem:[#allocation14 + $0x18] sm:$0xff]  ;;  %v4136_v2 = vld [vmem:[#allocation14 + $0x10] sm:$0xff]  ;;  %v4135_v50 = vld [vmem:[#allocation14 + $0x8] sm:$0xff] }
0x199d   :  { %3988 = vmatprep.subr.mxu0 %v3913_v57  ;;  %4059 = vmatprep.subr.mxu1 %v3915_v28  ;;  %v4134_v11 = vld [vmem:[#allocation14] sm:$0xff]  ;;  %v3896_v46 = vld [vmem:[#allocation2 + $0x10] sm:$0xff]  ;;  %v3899_v17 = vld [vmem:[#allocation2 + $0x8] sm:$0xff] }
0x199e   :  { %3989 = vmatpush1.msra.mxu0 %v3912_v58  ;;  %4060 = vmatpush1.msra.mxu1 %v3914_v30  ;;  %v3897_v22 = vld [vmem:[#allocation2] sm:$0xff]  ;;  %v3898_v9 = vld [vmem:[#allocation2 + $0x18] sm:$0xff] }
0x199f   :  { %3990 = vmatprep.subr.mxu0 %v3909_v4  ;;  %4061 = vmatprep.subr.mxu1 %v3911_v32 }
0x19a0   :  { %3991 = vmatpush1.msra.mxu0 %v3908_v13  ;;  %4062 = vmatpush1.msra.mxu1 %v3910_v18 }
0x19a1   :  { %3992 = vmatprep.subr.mxu0 %v3905_v44  ;;  %4063 = vmatprep.subr.mxu1 %v3907_v3 }
0x19a2   :  { %3993 = vmatpush1.msra.mxu0 %v3904_v26  ;;  %4064 = vmatpush1.msra.mxu1 %v3906_v27 }
0x19a3   :  { %3994 = vmatprep.subr.mxu0 %v3901_v8  ;;  %4065 = vmatprep.subr.mxu1 %v3903_v33 }
0x19a4   :  { %3995 = vmatpush1.msra.mxu0 %v3900_v31  ;;  %4066 = vmatpush1.msra.mxu1 %v3902_v47 }
0x19a5   :  { %4029 = vmatmul.mubr.f32.vlgmr.msra.gmra.mxu0 %v6764_v14  ;;  %5132 = vmatprep.subr.mxu0 %v7071_v34 }
0x19a6   :  { %5164 = vmatprep.mubr.msk.f32.mxu0 %vm5692_vm0, %v7071_v34  ;;  %4100 = vmatmul.mubr.f32.vlgmr.msra.gmra.mxu1 %v6764_v14  ;;  %v4144_v14 = vld [vmem:[#allocation14 + $0x50] sm:$0xff] }
0x19a7   :  { %5133 = vmatpush3.msra.mxu0 %v4149_v35 }
0x19a8   :  { %5134 = vmatprep.subr.mxu0 %v7071_v34 }
0x19a9   :  { %5135 = vmatpush3.msra.mxu0 %v4148_v38 }
0x19aa   :  { %5136 = vmatprep.subr.mxu0 %v7071_v34 }
0x19ab   :  { %5137 = vmatpush3.msra.mxu0 %v4147_v40 }
0x19ac   :  { %5138 = vmatprep.subr.mxu0 %v7071_v34 }
0x19ad   :  { %5139 = vmatpush3.msra.mxu0 %v4146_v41 }
0x19ae   :  { %5140 = vmatprep.subr.mxu0 %v7071_v34 }
0x19af   :  { %5141 = vmatpush3.msra.mxu0 %v4145_v42 }
0x19b0   :  { %5142 = vmatprep.subr.mxu0 %v7071_v34 }
0x19b1   :  { %5143 = vmatpush3.msra.mxu0 %v4144_v14 }
0x19b2   :  { %5144 = vmatprep.subr.mxu0 %v7071_v34 }
0x19b3   :  { %5145 = vmatpush3.msra.mxu0 %v4143_v43 }
0x19b4   :  { %5146 = vmatprep.subr.mxu0 %v7071_v34 }
0x19b5   :  { %5147 = vmatpush3.msra.mxu0 %v4142_v0 }
0x19b6   :  { %5148 = vmatprep.subr.mxu0 %v7071_v34 }
0x19b7   :  { %5149 = vmatpush3.msra.mxu0 %v4141_v56 }
0x19b8   :  { %5150 = vmatprep.subr.mxu0 %v7071_v34 }
0x19b9   :  { %5151 = vmatpush3.msra.mxu0 %v4140_v39 }
0x19ba   :  { %5152 = vmatprep.subr.mxu0 %v7071_v34 }
0x19bb   :  { %5153 = vmatpush3.msra.mxu0 %v4139_v55 }
0x19bc   :  { %5154 = vmatprep.subr.mxu0 %v7071_v34 }
0x19bd   :  { %5155 = vmatpush3.msra.mxu0 %v4138_v61 }
0x19be   :  { %5156 = vmatprep.subr.mxu0 %v7071_v34 }
0x19bf   :  { %5157 = vmatpush3.msra.mxu0 %v4137_v63 }
0x19c0   :  { %5158 = vmatprep.subr.mxu0 %v7071_v34 }
0x19c1   :  { %5159 = vmatpush3.msra.mxu0 %v4136_v2 }
0x19c2   :  { %5160 = vmatprep.subr.mxu0 %v7071_v34 }
0x19c3   :  { %5161 = vmatpush3.msra.mxu0 %v4135_v50 }
0x19c4   :  { %5162 = vmatprep.subr.mxu0 %v7071_v34 }
0x19c5   :  { %5163 = vmatpush3.msra.mxu0 %v4134_v11 }
0x1a65   :  { %v4030_v21 = vpop.f32.mrf.mxu0 }
0x1a66   :  { %v4106_v7 = vadd.f32 %v4030_v21, %v3896_v46  ;;  %v4101_v36 = vpop.f32.mrf.mxu1 }
0x1a67   :  { %v4032_v24 = vpop.f32.mrf.mxu0  ;;  %v4108_v12 = vadd.f32 %v4101_v36, %v3898_v9 }
0x1a68   :  { %v4878_v20 = vmul.f32 -1.442695, %v4106_v7  ;;  %v4107_v23 = vadd.f32 %v4032_v24, %v3897_v22  ;;  %v4103_v19 = vpop.f32.mrf.mxu1 }
0x1a69   :  { %v4109_v1 = vadd.f32 %v4103_v19, %v3899_v17 }
0x1a6a   :  { %5482 = vpow2.f32 %v4878_v20  ;;  %v4879_v16 = vmul.f32 -1.442695, %v4107_v23 }
0x1a6b   :  { %v4880_v37 = vmul.f32 -1.442695, %v4109_v1 }
0x1a6c   :  { %5484 = vpow2.f32 %v4879_v16 }
0x1a6d   :  { %5486 = vtanh.f32 %v4108_v12 }
0x1a6e   :  { %5488 = vpow2.f32 %v4880_v37 }
0x1a77   :  { %v5483_v29 = vpop.eup %5482 }
0x1a78   :  { %v4119_v34 = vadd.f32 1.0, %v5483_v29 }
0x1a79   :  { %v5485_v5 = vpop.eup %5484 }
0x1a7a   :  { %5490 = vrcp.f32 %v4119_v34  ;;  %v4120_v51 = vadd.f32 1.0, %v5485_v5  ;;  %v5487_v49 = vpop.eup %5486 }
0x1a7b   :  { %v5489_v52 = vpop.eup %5488 }
0x1a7c   :  { %5492 = vrcp.f32 %v4120_v51  ;;  %v4121_v45 = vadd.f32 1.0, %v5489_v52 }
0x1a7e   :  { %5494 = vrcp.f32 %v4121_v45 }
0x1a87   :  { %v5491_v59 = vpop.eup %5490 }
0x1a88   :  { %v4130_v57 = vmul.f32 %v5491_v59, %v5487_v49 }
0x1a89   :  { %v5493_v62 = vpop.eup %5492 }
0x1a8a   :  { %v4129_v54 = vmul.f32 %v5493_v62, %v6761_v53 }
0x1a8b   :  { %v5495_v58 = vpop.eup %5494 }
0x1a8c   :  { %v6801_v48 = vadd.f32 %v4130_v57, %v4129_v54 }
0x1a8e   :  { %5496 = vtanh.f32 %v6801_v48 }
0x1a9b   :  { %v5497_v6 = vpop.eup %5496 }
0x1a9c   :  { %v6804_v4 = vmul.f32 %v5497_v6, %v5495_v58 }
0x1a9e   :  { %5165 = vmatmul.mubr.f32.vlgmr.msra.gmra.mxu0 %v6804_v4 }
0x1b5d   :  { %4226 = sbr.rel (%p4882_p1) target bundleno = 7013 (0x1b65), region = 97 }
0x1b5e   :  { %v4216_v10 = vpop.f32.mrf.mxu0 }
0x1b5f   :  { %v4217_v13 = vadd.f32 %v6645_v60, %v4216_v10 }
0x1b60   :  { %v5166_v15 = vpop.f32.mrf.mxu0 }
0x1b61   :  { %4221 = vst [vmem:[#allocation16 + $0x20] sm:$0xff] %v4217_v13 }
0x1b62   :  { %v4228_v53 = vld [vmem:[#allocation7 + $0x80] sm:$0xff]  ;;  %v4229_v44 = vld [vmem:[#allocation7 + $0x88] sm:$0xff]  ;;  %v4230_v25 = vld [vmem:[#allocation7 + $0x90] sm:$0xff] }
0x1b63   :  { %4232 = vst [vmem:[#allocation2 + $0x10] sm:$0xff] %v4228_v53  ;;  %4233 = vst [vmem:[#allocation2] sm:$0xff] %v4229_v44  ;;  %v4231_v26 = vld [vmem:[#allocation7 + $0x98] sm:$0xff] }
0x1b64   :  { %4234 = vst [vmem:[#allocation2 + $0x18] sm:$0xff] %v4230_v25  ;;  %4235 = vst [vmem:[#allocation2 + $0x8] sm:$0xff] %v4231_v26 }
0x1b65 PF:  { %p4883_p2 = scmp.ne.s32.totalorder %s4881_s20, 0 }
0x1b67   :  { %4239 = sbr.rel (%p4883_p2) target bundleno = 7643 (0x1ddb), region = 101 }
0x1b6c   :  { %4240 = vmax.xlane.f32.xlu0 %v4217_v13  ;;  %v7072_v8 = vld [vmem:[#allocation25_spill] sm:$0xff]  ;;  %v4322_v18 = vld [vmem:[#allocation13 + $0x1e8] sm:$0xff]  ;;  %v4321_v27 = vld [vmem:[#allocation13 + $0x1e0] sm:$0xff] }
0x1b6d   :  { %v4324_v3 = vld [vmem:[#allocation13 + $0x1f8] sm:$0xff]  ;;  %4325 = vmatprep.subr.mxu0 %v4322_v18  ;;  %v4323_v33 = vld [vmem:[#allocation13 + $0x1f0] sm:$0xff]  ;;  %v4318_v47 = vld [vmem:[#allocation13 + $0x1c8] sm:$0xff] }
0x1b6e   :  { %4396 = vmatprep.subr.mxu1 %v4324_v3  ;;  %v4320_v35 = vld [vmem:[#allocation13 + $0x1d8] sm:$0xff]  ;;  %4326 = vmatpush1.msra.mxu0 %v4321_v27  ;;  %v4317_v38 = vld [vmem:[#allocation13 + $0x1c0] sm:$0xff]  ;;  %v4319_v40 = vld [vmem:[#allocation13 + $0x1d0] sm:$0xff] }
0x1b6f   :  { %4397 = vmatpush1.msra.mxu1 %v4323_v33  ;;  %v4314_v41 = vld [vmem:[#allocation13 + $0x1a8] sm:$0xff]  ;;  %4327 = vmatprep.subr.mxu0 %v4318_v47  ;;  %v4316_v42 = vld [vmem:[#allocation13 + $0x1b8] sm:$0xff]  ;;  %v4313_v14 = vld [vmem:[#allocation13 + $0x1a0] sm:$0xff] }
0x1b70   :  { %4398 = vmatprep.subr.mxu1 %v4320_v35  ;;  %v4315_v43 = vld [vmem:[#allocation13 + $0x1b0] sm:$0xff]  ;;  %4328 = vmatpush1.msra.mxu0 %v4317_v38  ;;  %v4310_v0 = vld [vmem:[#allocation13 + $0x188] sm:$0xff]  ;;  %v4312_v56 = vld [vmem:[#allocation13 + $0x198] sm:$0xff] }
0x1b71   :  { %4399 = vmatpush1.msra.mxu1 %v4319_v40  ;;  %4329 = vmatprep.subr.mxu0 %v4314_v41  ;;  %v4309_v39 = vld [vmem:[#allocation13 + $0x180] sm:$0xff]  ;;  %v4311_v55 = vld [vmem:[#allocation13 + $0x190] sm:$0xff]  ;;  %v4306_v61 = vld [vmem:[#allocation13 + $0x168] sm:$0xff]  ;;  %v5701_v41 = vmov 0.0  }
0x1b72   :  { %4400 = vmatprep.subr.mxu1 %v4316_v42  ;;  %4330 = vmatpush1.msra.mxu0 %v4313_v14  ;;  %v4308_v63 = vld [vmem:[#allocation13 + $0x178] sm:$0xff]  ;;  %v4305_v2 = vld [vmem:[#allocation13 + $0x160] sm:$0xff]  ;;  %v4307_v50 = vld [vmem:[#allocation13 + $0x170] sm:$0xff] }
0x1b73   :  { %4401 = vmatpush1.msra.mxu1 %v4315_v43  ;;  %4331 = vmatprep.subr.mxu0 %v4310_v0  ;;  %v4302_v11 = vld [vmem:[#allocation13 + $0x148] sm:$0xff]  ;;  %v4304_v46 = vld [vmem:[#allocation13 + $0x158] sm:$0xff]  ;;  %v4301_v21 = vld [vmem:[#allocation13 + $0x140] sm:$0xff] }
0x1b74   :  { %4402 = vmatprep.subr.mxu1 %v4312_v56  ;;  %4332 = vmatpush1.msra.mxu0 %v4309_v39  ;;  %v4303_v22 = vld [vmem:[#allocation13 + $0x150] sm:$0xff]  ;;  %v4298_v7 = vld [vmem:[#allocation13 + $0x128] sm:$0xff]  ;;  %v4300_v24 = vld [vmem:[#allocation13 + $0x138] sm:$0xff]  ;;  %v5702_v39 = vmov 1.0  }
0x1b75   :  { %4403 = vmatpush1.msra.mxu1 %v4311_v55  ;;  %4333 = vmatprep.subr.mxu0 %v4306_v61  ;;  %v4297_v20 = vld [vmem:[#allocation13 + $0x120] sm:$0xff]  ;;  %v4299_v23 = vld [vmem:[#allocation13 + $0x130] sm:$0xff]  ;;  %v4294_v16 = vld [vmem:[#allocation13 + $0x108] sm:$0xff] }
0x1b76   :  { %4404 = vmatprep.subr.mxu1 %v4308_v63  ;;  %4334 = vmatpush1.msra.mxu0 %v4305_v2  ;;  %v4296_v36 = vld [vmem:[#allocation13 + $0x118] sm:$0xff]  ;;  %v4293_v17 = vld [vmem:[#allocation13 + $0x100] sm:$0xff]  ;;  %v4295_v19 = vld [vmem:[#allocation13 + $0x110] sm:$0xff] }
0x1b77   :  { %4405 = vmatpush1.msra.mxu1 %v4307_v50  ;;  %4335 = vmatprep.subr.mxu0 %v4302_v11  ;;  %v4290_v9 = vld [vmem:[#allocation13 + $0xe8] sm:$0xff]  ;;  %v4292_v1 = vld [vmem:[#allocation13 + $0xf8] sm:$0xff]  ;;  %v4289_v12 = vld [vmem:[#allocation13 + $0xe0] sm:$0xff] }
0x1b78   :  { %4406 = vmatprep.subr.mxu1 %v4304_v46  ;;  %4336 = vmatpush1.msra.mxu0 %v4301_v21  ;;  %v4291_v37 = vld [vmem:[#allocation13 + $0xf0] sm:$0xff]  ;;  %v4286_v29 = vld [vmem:[#allocation13 + $0xc8] sm:$0xff]  ;;  %v4288_v34 = vld [vmem:[#allocation13 + $0xd8] sm:$0xff] }
0x1b79   :  { %4407 = vmatpush1.msra.mxu1 %v4303_v22  ;;  %4337 = vmatprep.subr.mxu0 %v4298_v7  ;;  %v4285_v5 = vld [vmem:[#allocation13 + $0xc0] sm:$0xff]  ;;  %v4287_v51 = vld [vmem:[#allocation13 + $0xd0] sm:$0xff]  ;;  %v4282_v49 = vld [vmem:[#allocation13 + $0xa8] sm:$0xff] }
0x1b7a   :  { %4408 = vmatprep.subr.mxu1 %v4300_v24  ;;  %4338 = vmatpush1.msra.mxu0 %v4297_v20  ;;  %v4284_v52 = vld [vmem:[#allocation13 + $0xb8] sm:$0xff]  ;;  %v4281_v59 = vld [vmem:[#allocation13 + $0xa0] sm:$0xff]  ;;  %v4283_v62 = vld [vmem:[#allocation13 + $0xb0] sm:$0xff] }
0x1b7b   :  { %4409 = vmatpush1.msra.mxu1 %v4299_v23  ;;  %4339 = vmatprep.subr.mxu0 %v4294_v16  ;;  %v4278_v45 = vld [vmem:[#allocation13 + $0x88] sm:$0xff]  ;;  %v4280_v54 = vld [vmem:[#allocation13 + $0x98] sm:$0xff]  ;;  %v4277_v57 = vld [vmem:[#allocation13 + $0x80] sm:$0xff] }
0x1b7c   :  { %4410 = vmatprep.subr.mxu1 %v4296_v36  ;;  %4340 = vmatpush1.msra.mxu0 %v4293_v17  ;;  %v4279_v58 = vld [vmem:[#allocation13 + $0x90] sm:$0xff]  ;;  %v4274_v6 = vld [vmem:[#allocation13 + $0x68] sm:$0xff]  ;;  %v4276_v10 = vld [vmem:[#allocation13 + $0x78] sm:$0xff] }
0x1b7d   :  { %4411 = vmatpush1.msra.mxu1 %v4295_v19  ;;  %4341 = vmatprep.subr.mxu0 %v4290_v9  ;;  %v4275_v15 = vld [vmem:[#allocation13 + $0x70] sm:$0xff]  ;;  %v4269_v18 = vld [vmem:[#allocation13 + $0x40] sm:$0xff]  ;;  %v4266_v27 = vld [vmem:[#allocation13 + $0x28] sm:$0xff] }
0x1b7e   :  { %4412 = vmatprep.subr.mxu1 %v4292_v1  ;;  %4342 = vmatpush1.msra.mxu0 %v4289_v12  ;;  %v4271_v3 = vld [vmem:[#allocation13 + $0x50] sm:$0xff]  ;;  %v4268_v33 = vld [vmem:[#allocation13 + $0x38] sm:$0xff]  ;;  %v4265_v47 = vld [vmem:[#allocation13 + $0x20] sm:$0xff] }
0x1b7f   :  { %4413 = vmatpush1.msra.mxu1 %v4291_v37  ;;  %4343 = vmatprep.subr.mxu0 %v4286_v29  ;;  %v4262_v35 = vld [vmem:[#allocation13 + $0x8] sm:$0xff]  ;;  %v4261_v38 = vld [vmem:[#allocation13] sm:$0xff]  ;;  %v4263_v40 = vld [vmem:[#allocation13 + $0x10] sm:$0xff] }
0x1b80   :  { %4414 = vmatprep.subr.mxu1 %v4288_v34  ;;  %4344 = vmatpush1.msra.mxu0 %v4285_v5 }
0x1b81   :  { %4415 = vmatpush1.msra.mxu1 %v4287_v51  ;;  %4345 = vmatprep.subr.mxu0 %v4282_v49 }
0x1b82   :  { %4416 = vmatprep.subr.mxu1 %v4284_v52  ;;  %4346 = vmatpush1.msra.mxu0 %v4281_v59 }
0x1b83   :  { %4417 = vmatpush1.msra.mxu1 %v4283_v62  ;;  %4347 = vmatprep.subr.mxu0 %v4278_v45 }
0x1b84   :  { %4418 = vmatprep.subr.mxu1 %v4280_v54  ;;  %4348 = vmatpush1.msra.mxu0 %v4277_v57 }
0x1b85   :  { %4419 = vmatpush1.msra.mxu1 %v4279_v58  ;;  %4349 = vmatprep.subr.mxu0 %v4274_v6 }
0x1b86   :  { %4420 = vmatprep.subr.mxu1 %v4276_v10  ;;  %4389 = vmatprep.mubr.f32.mxu0 %v5701_v41 }
0x1b87   :  { %4421 = vmatpush1.msra.mxu1 %v4275_v15  ;;  %4460 = vmatprep.mubr.f32.mxu1 %v5701_v41 }
0x1bf5   :  { %v4241_v28 = vpop.xlane.xlu0 %4240 }
0x1bf6   :  { %vm4242_vm13 = vcmp.ge.f32.partialorder %v4217_v13, %v4241_v28  ;;  %v4273_v13 = vld [vmem:[#allocation13 + $0x60] sm:$0xff]  ;;  %v4270_v28 = vld [vmem:[#allocation13 + $0x48] sm:$0xff] }
0x1bf7   :  { %v6809_v30 = vsel %vm4242_vm13, %v7072_v8, 128  ;;  %4350 = vmatpush1.msra.mxu0 %v4273_v13 }
0x1bf8   :  { %v4245_v31 = vshra.s32 %v6809_v30, 16  ;;  %v4244_v53 = vand.u32 65535, %v6809_v30  ;;  %4351 = vmatprep.subr.mxu0 %v4270_v28  ;;  %v4267_v30 = vld [vmem:[#allocation13 + $0x30] sm:$0xff] }
0x1bf9   :  { %4352 = vmatpush1.msra.mxu0 %v4269_v18 }
0x1bfa   :  { %v6812_v32 = vcvt.s32.f32 %v4245_v31  ;;  %v4246_v25 = vcvt.s32.f32 %v4244_v53  ;;  %v4272_v31 = vld [vmem:[#allocation13 + $0x58] sm:$0xff]  ;;  %4353 = vmatprep.subr.mxu0 %v4266_v27 }
0x1bfb   :  { %4422 = vmatprep.subr.mxu1 %v4272_v31  ;;  %4354 = vmatpush1.msra.mxu0 %v4265_v47 }
0x1bfc   :  { %4248 = vmin.xlane.f32.xlu0 %v6812_v32  ;;  %4423 = vmatpush1.msra.mxu1 %v4271_v3 }
0x1bfd   :  { %4424 = vmatprep.subr.mxu1 %v4268_v33  ;;  %4355 = vmatprep.subr.mxu0 %v4262_v35 }
0x1bfe   :  { %4425 = vmatpush1.msra.mxu1 %v4267_v30  ;;  %4356 = vmatpush1.msra.mxu0 %v4261_v38 }
0x1c85   :  { %v4249_v44 = vpop.xlane.xlu0 %4248 }
0x1c86   :  { %vm4250_vm14 = vcmp.eq.f32.partialorder %v6812_v32, %v4249_v44  ;;  %v4264_v32 = vld [vmem:[#allocation13 + $0x18] sm:$0xff]  ;;  %v4255_v42 = vcvt.f32.s32 %v4249_v44 }
0x1c87   :  { %v4251_v26 = vsel %vm4250_vm14, %v4246_v25, inf  ;;  %4426 = vmatprep.subr.mxu1 %v4264_v32 }
0x1c88   :  { %4252 = vmin.xlane.f32.xlu1 %v4251_v26  ;;  %4427 = vmatpush1.msra.mxu1 %v4263_v40  ;;  %v4256_v43 = vshll.u32 %v4255_v42, 16 }
0x1d11   :  { %v4253_v14 = vpop.xlane.xlu1 %4252 }
0x1d12   :  { %v4254_v0 = vcvt.f32.s32 %v4253_v14 }
0x1d14   :  { %v4257_v56 = vadd.s32 %v4256_v43, %v4254_v0 }
0x1d16   :  { %vm4258_vm15 = vcmp.eq.s32.totalorder %v7072_v8, %v4257_v56 }
0x1d17   :  { %4885 = vmatmul.mubr.msk.f32.vlgmr.msra.gmra.mxu0 %vm4258_vm15, %v5702_v39  ;;  %4886 = vmatmul.mubr.msk.f32.vlgmr.msra.gmra.mxu1 %vm4258_vm15, %v5702_v39 }
0x1dd7   :  { %v4391_v55 = vpop.f32.mrf.mxu0  ;;  %v4462_v61 = vpop.f32.mrf.mxu1 }
0x1dd8   :  { %4467 = vst [vmem:[#allocation2 + $0x10] sm:$0xff] %v4391_v55  ;;  %4469 = vst [vmem:[#allocation2 + $0x18] sm:$0xff] %v4462_v61 }
0x1dd9   :  { %v4393_v63 = vpop.f32.mrf.mxu0  ;;  %v4464_v2 = vpop.f32.mrf.mxu1 }
0x1dda   :  { %4468 = vst [vmem:[#allocation2] sm:$0xff] %v4393_v63  ;;  %4470 = vst [vmem:[#allocation2 + $0x8] sm:$0xff] %v4464_v2 }
0x1ddb PF:  { %v4536_v50 = vld [vmem:[#allocation11 + $0x1e8] sm:$0xff]  ;;  %v4535_v11 = vld [vmem:[#allocation11 + $0x1e0] sm:$0xff]  ;;  %v7073_v21 = vmov 0.0   ;;  %v4538_v23 = vld [vmem:[#allocation11 + $0x1f8] sm:$0xff]  ;;  %s5703_s1 = smov [#allocation16]  }
0x1ddc   :  { %v4532_v46 = vld [vmem:[#allocation11 + $0x1c8] sm:$0xff]  ;;  %4603 = vmatprep.mubr.f32.mxu0 %v7073_v21  ;;  %4674 = vmatprep.mubr.f32.mxu1 %v7073_v21  ;;  %v4531_v8 = vld [vmem:[#allocation11 + $0x1c0] sm:$0xff]  ;;  %v4537_v36 = vld [vmem:[#allocation11 + $0x1f0] sm:$0xff]  ;;  %s4802_s21 = sshll.u32 %s5703_s1, 4  ;;  %s4803_s21 = int_to_ptr.vmem [resolvable:$true] %s4802_s21 }
0x1ddd   :  { %4539 = vmatprep.subr.mxu0 %v4536_v50  ;;  %v4528_v22 = vld [vmem:[#allocation11 + $0x1a8] sm:$0xff]  ;;  %v4527_v7 = vld [vmem:[#allocation11 + $0x1a0] sm:$0xff]  ;;  %4610 = vmatprep.subr.mxu1 %v4538_v23  ;;  %v4534_v19 = vld [vmem:[#allocation11 + $0x1d8] sm:$0xff]  ;;  %s5646_s22 = scalar_lea.vmem %s4803_s21, 768  ;;  %p5651_p4 = scmp.lt.s32.totalorder %s4803_s21, %s4803_s21 }
0x1dde   :  { %4540 = vmatpush1.msra.mxu0 %v4535_v11  ;;  %v4524_v24 = vld [vmem:[#allocation11 + $0x188] sm:$0xff]  ;;  %v4523_v20 = vld [vmem:[#allocation11 + $0x180] sm:$0xff]  ;;  %4611 = vmatpush1.msra.mxu1 %v4537_v36  ;;  %v4533_v9 = vld [vmem:[#allocation11 + $0x1d0] sm:$0xff]  ;;  %p5647_p3 = scmp.ne.s32.totalorder %s4803_s21, %s5646_s22  ;;  %p5652_p5 = scmp.lt.s32.totalorder %s5646_s22, %s5646_s22 }
0x1ddf   :  { %4541 = vmatprep.subr.mxu0 %v4532_v46  ;;  %v4520_v16 = vld [vmem:[#allocation11 + $0x168] sm:$0xff]  ;;  %v4519_v17 = vld [vmem:[#allocation11 + $0x160] sm:$0xff]  ;;  %4612 = vmatprep.subr.mxu1 %v4534_v19  ;;  %v4530_v12 = vld [vmem:[#allocation11 + $0x1b8] sm:$0xff] }
0x1de0   :  { %4542 = vmatpush1.msra.mxu0 %v4531_v8  ;;  %v4516_v1 = vld [vmem:[#allocation11 + $0x148] sm:$0xff]  ;;  %v4515_v37 = vld [vmem:[#allocation11 + $0x140] sm:$0xff]  ;;  %4613 = vmatpush1.msra.mxu1 %v4533_v9  ;;  %v4529_v29 = vld [vmem:[#allocation11 + $0x1b0] sm:$0xff]  ;;  %p5653_p6 = por %p5652_p5, %p5651_p4 }
0x1de1   :  { %4543 = vmatprep.subr.mxu0 %v4528_v22  ;;  %v4526_v34 = vld [vmem:[#allocation11 + $0x198] sm:$0xff]  ;;  %v4512_v5 = vld [vmem:[#allocation11 + $0x128] sm:$0xff]  ;;  %4614 = vmatprep.subr.mxu1 %v4530_v12  ;;  %v4525_v51 = vld [vmem:[#allocation11 + $0x190] sm:$0xff] }
0x1de2   :  { %4544 = vmatpush1.msra.mxu0 %v4527_v7  ;;  %v4511_v49 = vld [vmem:[#allocation11 + $0x120] sm:$0xff]  ;;  %4615 = vmatpush1.msra.mxu1 %v4529_v29  ;;  %v4522_v52 = vld [vmem:[#allocation11 + $0x178] sm:$0xff]  ;;  %v4508_v59 = vld [vmem:[#allocation11 + $0x108] sm:$0xff]  ;;  %p5654_p7 = pnand %p5653_p6, %p5647_p3 }
0x1de3   :  { %4545 = vmatprep.subr.mxu0 %v4524_v24  ;;  %4616 = vmatprep.subr.mxu1 %v4526_v34  ;;  %v4521_v62 = vld [vmem:[#allocation11 + $0x170] sm:$0xff]  ;;  %v4507_v45 = vld [vmem:[#allocation11 + $0x100] sm:$0xff]  ;;  %v4518_v54 = vld [vmem:[#allocation11 + $0x158] sm:$0xff] }
0x1de4   :  { %4546 = vmatpush1.msra.mxu0 %v4523_v20  ;;  %4617 = vmatpush1.msra.mxu1 %v4525_v51  ;;  %v4504_v57 = vld [vmem:[#allocation11 + $0xe8] sm:$0xff]  ;;  %v4517_v58 = vld [vmem:[#allocation11 + $0x150] sm:$0xff]  ;;  %v4503_v6 = vld [vmem:[#allocation11 + $0xe0] sm:$0xff] }
0x1de5   :  { %4547 = vmatprep.subr.mxu0 %v4520_v16  ;;  %4618 = vmatprep.subr.mxu1 %v4522_v52  ;;  %v4514_v10 = vld [vmem:[#allocation11 + $0x138] sm:$0xff]  ;;  %v4500_v13 = vld [vmem:[#allocation11 + $0xc8] sm:$0xff]  ;;  %v4513_v15 = vld [vmem:[#allocation11 + $0x130] sm:$0xff] }
0x1de6   :  { %4548 = vmatpush1.msra.mxu0 %v4519_v17  ;;  %4619 = vmatpush1.msra.mxu1 %v4521_v62  ;;  %v4499_v53 = vld [vmem:[#allocation11 + $0xc0] sm:$0xff]  ;;  %v4510_v44 = vld [vmem:[#allocation11 + $0x118] sm:$0xff]  ;;  %v4496_v25 = vld [vmem:[#allocation11 + $0xa8] sm:$0xff] }
0x1de7   :  { %4549 = vmatprep.subr.mxu0 %v4516_v1  ;;  %4620 = vmatprep.subr.mxu1 %v4518_v54  ;;  %v4509_v26 = vld [vmem:[#allocation11 + $0x110] sm:$0xff]  ;;  %v4495_v28 = vld [vmem:[#allocation11 + $0xa0] sm:$0xff]  ;;  %v4506_v31 = vld [vmem:[#allocation11 + $0xf8] sm:$0xff] }
0x1de8   :  { %4550 = vmatpush1.msra.mxu0 %v4515_v37  ;;  %4621 = vmatpush1.msra.mxu1 %v4517_v58  ;;  %v4492_v18 = vld [vmem:[#allocation11 + $0x88] sm:$0xff]  ;;  %v4505_v3 = vld [vmem:[#allocation11 + $0xf0] sm:$0xff]  ;;  %v4491_v27 = vld [vmem:[#allocation11 + $0x80] sm:$0xff] }
0x1de9   :  { %4551 = vmatprep.subr.mxu0 %v4512_v5  ;;  %4622 = vmatprep.subr.mxu1 %v4514_v10  ;;  %v4502_v33 = vld [vmem:[#allocation11 + $0xd8] sm:$0xff]  ;;  %v4488_v47 = vld [vmem:[#allocation11 + $0x68] sm:$0xff]  ;;  %v4501_v30 = vld [vmem:[#allocation11 + $0xd0] sm:$0xff] }
0x1dea   :  { %4552 = vmatpush1.msra.mxu0 %v4511_v49  ;;  %4623 = vmatpush1.msra.mxu1 %v4513_v15  ;;  %v4487_v35 = vld [vmem:[#allocation11 + $0x60] sm:$0xff]  ;;  %v4498_v32 = vld [vmem:[#allocation11 + $0xb8] sm:$0xff]  ;;  %v4484_v38 = vld [vmem:[#allocation11 + $0x48] sm:$0xff] }
0x1deb   :  { %4553 = vmatprep.subr.mxu0 %v4508_v59  ;;  %4624 = vmatprep.subr.mxu1 %v4510_v44  ;;  %v4497_v40 = vld [vmem:[#allocation11 + $0xb0] sm:$0xff]  ;;  %v4483_v41 = vld [vmem:[#allocation11 + $0x40] sm:$0xff]  ;;  %v4494_v42 = vld [vmem:[#allocation11 + $0x98] sm:$0xff] }
0x1dec   :  { %4554 = vmatpush1.msra.mxu0 %v4507_v45  ;;  %4625 = vmatpush1.msra.mxu1 %v4509_v26  ;;  %v4480_v14 = vld [vmem:[#allocation11 + $0x28] sm:$0xff]  ;;  %v4493_v43 = vld [vmem:[#allocation11 + $0x90] sm:$0xff]  ;;  %v4479_v0 = vld [vmem:[#allocation11 + $0x20] sm:$0xff] }
0x1ded   :  { %4555 = vmatprep.subr.mxu0 %v4504_v57  ;;  %4626 = vmatprep.subr.mxu1 %v4506_v31  ;;  %v4490_v56 = vld [vmem:[#allocation11 + $0x78] sm:$0xff]  ;;  %v4476_v39 = vld [vmem:[#allocation11 + $0x8] sm:$0xff]  ;;  %v4489_v55 = vld [vmem:[#allocation11 + $0x70] sm:$0xff] }
0x1dee   :  { %4556 = vmatpush1.msra.mxu0 %v4503_v6  ;;  %4627 = vmatpush1.msra.mxu1 %v4505_v3  ;;  %v4475_v61 = vld [vmem:[#allocation11] sm:$0xff]  ;;  %v4486_v63 = vld [vmem:[#allocation11 + $0x58] sm:$0xff]  ;;  %v4485_v2 = vld [vmem:[#allocation11 + $0x50] sm:$0xff] }
0x1def   :  { %4557 = vmatprep.subr.mxu0 %v4500_v13  ;;  %4628 = vmatprep.subr.mxu1 %v4502_v33  ;;  %v4482_v50 = vld [vmem:[#allocation11 + $0x38] sm:$0xff]  ;;  %v4481_v11 = vld [vmem:[#allocation11 + $0x30] sm:$0xff]  ;;  %v4722_v24 = vld [vmem:[#allocation14 + $0x68] sm:$0xff] }
0x1df0   :  { %4558 = vmatpush1.msra.mxu0 %v4499_v53  ;;  %4629 = vmatpush1.msra.mxu1 %v4501_v30  ;;  %v4478_v46 = vld [vmem:[#allocation11 + $0x18] sm:$0xff]  ;;  %v4477_v8 = vld [vmem:[#allocation11 + $0x10] sm:$0xff]  ;;  %v4721_v20 = vld [vmem:[#allocation14 + $0x60] sm:$0xff] }
0x1df1   :  { %4559 = vmatprep.subr.mxu0 %v4496_v25  ;;  %4630 = vmatprep.subr.mxu1 %v4498_v32  ;;  %v4724_v22 = vld [vmem:[#allocation14 + $0x78] sm:$0xff]  ;;  %v4723_v7 = vld [vmem:[#allocation14 + $0x70] sm:$0xff]  ;;  %v4718_v16 = vld [vmem:[#allocation14 + $0x48] sm:$0xff] }
0x1df2   :  { %4560 = vmatpush1.msra.mxu0 %v4495_v28  ;;  %4631 = vmatpush1.msra.mxu1 %v4497_v40  ;;  %v4720_v23 = vld [vmem:[#allocation14 + $0x58] sm:$0xff]  ;;  %v4717_v36 = vld [vmem:[#allocation14 + $0x40] sm:$0xff]  ;;  %v4715_v19 = vld [vmem:[#allocation14 + $0x30] sm:$0xff] }
0x1df3   :  { %4561 = vmatprep.subr.mxu0 %v4492_v18  ;;  %4632 = vmatprep.subr.mxu1 %v4494_v42  ;;  %v4716_v17 = vld [vmem:[#allocation14 + $0x38] sm:$0xff]  ;;  %v4714_v9 = vld [vmem:[#allocation14 + $0x28] sm:$0xff]  ;;  %v4713_v1 = vld [vmem:[#allocation14 + $0x20] sm:$0xff] }
0x1df4   :  { %4562 = vmatpush1.msra.mxu0 %v4491_v27  ;;  %4633 = vmatpush1.msra.mxu1 %v4493_v43  ;;  %v4712_v12 = vld [vmem:[#allocation14 + $0x18] sm:$0xff]  ;;  %v4711_v37 = vld [vmem:[#allocation14 + $0x10] sm:$0xff]  ;;  %v4710_v29 = vld [vmem:[#allocation14 + $0x8] sm:$0xff] }
0x1df5   :  { %4563 = vmatprep.subr.mxu0 %v4488_v47  ;;  %4634 = vmatprep.subr.mxu1 %v4490_v56  ;;  %v4709_v34 = vld [vmem:[#allocation14] sm:$0xff]  ;;  %v4471_v5 = vld [vmem:[#allocation2 + $0x10] sm:$0xff]  ;;  %v4474_v58 = vld [vmem:[#allocation2 + $0x8] sm:$0xff] }
0x1df6   :  { %4564 = vmatpush1.msra.mxu0 %v4487_v35  ;;  %4635 = vmatpush1.msra.mxu1 %v4489_v55  ;;  %v4472_v49 = vld [vmem:[#allocation2] sm:$0xff]  ;;  %v4473_v10 = vld [vmem:[#allocation2 + $0x18] sm:$0xff] }
0x1df7   :  { %4565 = vmatprep.subr.mxu0 %v4484_v38  ;;  %4636 = vmatprep.subr.mxu1 %v4486_v63 }
0x1df8   :  { %4566 = vmatpush1.msra.mxu0 %v4483_v41  ;;  %4637 = vmatpush1.msra.mxu1 %v4485_v2 }
0x1df9   :  { %4567 = vmatprep.subr.mxu0 %v4480_v14  ;;  %4638 = vmatprep.subr.mxu1 %v4482_v50 }
0x1dfa   :  { %4568 = vmatpush1.msra.mxu0 %v4479_v0  ;;  %4639 = vmatpush1.msra.mxu1 %v4481_v11 }
0x1dfb   :  { %4569 = vmatprep.subr.mxu0 %v4476_v39  ;;  %4640 = vmatprep.subr.mxu1 %v4478_v46 }
0x1dfc   :  { %4570 = vmatpush1.msra.mxu0 %v4475_v61  ;;  %4641 = vmatpush1.msra.mxu1 %v4477_v8 }
0x1dfd   :  { %4604 = vmatmul.mubr.f32.vlgmr.msra.gmra.mxu0 %v6804_v4  ;;  %5167 = vmatprep.subr.mxu0 %v7073_v21 }
0x1dfe   :  { %5199 = vmatprep.mubr.msk.f32.mxu0 %vm5692_vm0, %v7073_v21  ;;  %4675 = vmatmul.mubr.f32.vlgmr.msra.gmra.mxu1 %v6804_v4  ;;  %v4719_v4 = vld [vmem:[#allocation14 + $0x50] sm:$0xff] }
0x1dff   :  { %5168 = vmatpush3.msra.mxu0 %v4724_v22 }
0x1e00   :  { %5169 = vmatprep.subr.mxu0 %v7073_v21 }
0x1e01   :  { %5170 = vmatpush3.msra.mxu0 %v4723_v7 }
0x1e02   :  { %5171 = vmatprep.subr.mxu0 %v7073_v21 }
0x1e03   :  { %5172 = vmatpush3.msra.mxu0 %v4722_v24 }
0x1e04   :  { %5173 = vmatprep.subr.mxu0 %v7073_v21 }
0x1e05   :  { %5174 = vmatpush3.msra.mxu0 %v4721_v20 }
0x1e06   :  { %5175 = vmatprep.subr.mxu0 %v7073_v21 }
0x1e07   :  { %5176 = vmatpush3.msra.mxu0 %v4720_v23 }
0x1e08   :  { %5177 = vmatprep.subr.mxu0 %v7073_v21 }
0x1e09   :  { %5178 = vmatpush3.msra.mxu0 %v4719_v4 }
0x1e0a   :  { %5179 = vmatprep.subr.mxu0 %v7073_v21 }
0x1e0b   :  { %5180 = vmatpush3.msra.mxu0 %v4718_v16 }
0x1e0c   :  { %5181 = vmatprep.subr.mxu0 %v7073_v21 }
0x1e0d   :  { %5182 = vmatpush3.msra.mxu0 %v4717_v36 }
0x1e0e   :  { %5183 = vmatprep.subr.mxu0 %v7073_v21 }
0x1e0f   :  { %5184 = vmatpush3.msra.mxu0 %v4716_v17 }
0x1e10   :  { %5185 = vmatprep.subr.mxu0 %v7073_v21 }
0x1e11   :  { %5186 = vmatpush3.msra.mxu0 %v4715_v19 }
0x1e12   :  { %5187 = vmatprep.subr.mxu0 %v7073_v21 }
0x1e13   :  { %5188 = vmatpush3.msra.mxu0 %v4714_v9 }
0x1e14   :  { %5189 = vmatprep.subr.mxu0 %v7073_v21 }
0x1e15   :  { %5190 = vmatpush3.msra.mxu0 %v4713_v1 }
0x1e16   :  { %5191 = vmatprep.subr.mxu0 %v7073_v21 }
0x1e17   :  { %5192 = vmatpush3.msra.mxu0 %v4712_v12 }
0x1e18   :  { %5193 = vmatprep.subr.mxu0 %v7073_v21 }
0x1e19   :  { %5194 = vmatpush3.msra.mxu0 %v4711_v37 }
0x1e1a   :  { %5195 = vmatprep.subr.mxu0 %v7073_v21 }
0x1e1b   :  { %5196 = vmatpush3.msra.mxu0 %v4710_v29 }
0x1e1c   :  { %5197 = vmatprep.subr.mxu0 %v7073_v21 }
0x1e1d   :  { %5198 = vmatpush3.msra.mxu0 %v4709_v34 }
0x1ebd   :  { %v4605_v51 = vpop.f32.mrf.mxu0 }
0x1ebe   :  { %v4681_v52 = vadd.f32 %v4605_v51, %v4471_v5  ;;  %v4676_v57 = vpop.f32.mrf.mxu1 }
0x1ebf   :  { %v4607_v59 = vpop.f32.mrf.mxu0  ;;  %v4683_v15 = vadd.f32 %v4676_v57, %v4473_v10 }
0x1ec0   :  { %v4887_v62 = vmul.f32 -1.442695, %v4681_v52  ;;  %v4682_v45 = vadd.f32 %v4607_v59, %v4472_v49  ;;  %v4678_v6 = vpop.f32.mrf.mxu1 }
0x1ec1   :  { %v4684_v13 = vadd.f32 %v4678_v6, %v4474_v58 }
0x1ec2   :  { %5498 = vpow2.f32 %v4887_v62  ;;  %v4888_v54 = vmul.f32 -1.442695, %v4682_v45 }
0x1ec3   :  { %v4889_v53 = vmul.f32 -1.442695, %v4684_v13 }
0x1ec4   :  { %5500 = vpow2.f32 %v4888_v54 }
0x1ec5   :  { %5502 = vtanh.f32 %v4683_v15 }
0x1ec6   :  { %5504 = vpow2.f32 %v4889_v53 }
0x1ecf   :  { %v5499_v44 = vpop.eup %5498 }
0x1ed0   :  { %v4694_v21 = vadd.f32 1.0, %v5499_v44 }
0x1ed1   :  { %v5501_v25 = vpop.eup %5500 }
0x1ed2   :  { %5506 = vrcp.f32 %v4694_v21  ;;  %v4695_v26 = vadd.f32 1.0, %v5501_v25  ;;  %v5503_v28 = vpop.eup %5502 }
0x1ed3   :  { %v5505_v31 = vpop.eup %5504 }
0x1ed4   :  { %5508 = vrcp.f32 %v4695_v26  ;;  %v4696_v27 = vadd.f32 1.0, %v5505_v31 }
0x1ed6   :  { %5510 = vrcp.f32 %v4696_v27 }
0x1edf   :  { %v5507_v18 = vpop.eup %5506 }
0x1ee0   :  { %v4705_v47 = vmul.f32 %v5507_v18, %v5503_v28 }
0x1ee1   :  { %v5509_v3 = vpop.eup %5508 }
0x1ee2   :  { %v4704_v33 = vmul.f32 %v5509_v3, %v6801_v48 }
0x1ee3   :  { %v5511_v35 = vpop.eup %5510 }
0x1ee4   :  { %v4706_v30 = vadd.f32 %v4705_v47, %v4704_v33 }
0x1ee6   :  { %5512 = vtanh.f32 %v4706_v30 }
0x1ef3   :  { %v5513_v32 = vpop.eup %5512 }
0x1ef4   :  { %v4708_v38 = vmul.f32 %v5513_v32, %v5511_v35 }
0x1ef6   :  { %5200 = vmatmul.mubr.f32.vlgmr.msra.gmra.mxu0 %v4708_v38 }
0x1fb6   :  { %v4791_v40 = vpop.f32.mrf.mxu0 }
0x1fb7   :  { %v4792_v41 = vadd.f32 %v6645_v60, %v4791_v40 }
0x1fb8   :  { %v5201_v42 = vpop.f32.mrf.mxu0 }
0x1fb9   :  { %4796 = vst [vmem:[#allocation16 + $0x28] sm:$0xff] %v4792_v41 }
0x1fba   :  { %5657 = shalt.err (!%p5654_p7)
}
0x1fbb   :  { %4808 = dma.vmem_to_hbm [thread:$0]  %s4803_s21, 768, %s6856_s8, [#allocation5], %s5689_s3, %s5689_s3, %s5690_s16  }
0x1fbc   :  { %5678 = dma.done.wait [#allocation5], 768  }
0x1fbd   :  { %5679 = vsyncadd [#allocation5], 4294966528 }
0x1fbe   :  { %4812 = vsyncpa [#allocation4], 1 }
0x1fbf   :  { %4813 = vsyncpa [#allocation8], 1 }
0x1fc0   :  { %4814 = vsyncpa [#allocation12], 1 }
0x1fc1   :  { %4815 = vsyncpa [#allocation15], 1 }
0x1fc2   :  { %4816 = vsyncpa [#allocation5], 1 }
0x1fc3   :  { %4817 = vsyncpa [#allocation6], 1 }

</bundles_post_ra>
